<compile_context>
chip_gen: v6e
topology: v6e:2x2x1
jax: 0.10.0
libtpu: 0.0.40
codegen_flags: <defaults>
</compile_context>

<pallas_src>
import jax
import jax.numpy as jnp
from jax.experimental import pallas as pl
from jax.experimental.pallas import tpu as pltpu

# Static geometry implied by the module.
H_IN = 18
W_IN = 18
C_IN, C1, C2, C3 = 3, 8, 16, 32
H1 = H_IN - 2          # 16 after conv1
P1 = H1 // 2           # 8  after pool1
H2 = P1 - 2            # 6  after conv2
P2 = H2 // 2           # 3  after pool2   (conv3: 3 -> 1)
HID = 16               # Linear(32, 16)

K1 = 56                # W_IN*C_IN = 54, padded up to a sublane multiple of 8
K2 = P1 * C1           # 64  (pool1 row width)
K3 = P2 * C2           # 48  (pool2 row width)
M1 = H1 * C1           # 128 (one conv1 output row)
M2 = H2 * C2           # 96  (one conv2 output row)
TB = 128               # batch tile (lane dimension), multiple of 128


def _cnn_kernel(x_ref, wb1_ref, wb2_ref, wb3_ref, bb1_ref, bb2_ref, bb3_ref,
                lw1_ref, lb1_ref, lw2_ref, lb2_ref, out_ref, p1_ref, p2_ref):
    f32 = jnp.float32
    bf16 = jnp.bfloat16
    tb = out_ref.shape[-1]

    wb1 = wb1_ref[...]              # (256, 224) bf16
    wb2 = wb2_ref[...]              # (192, 256) bf16
    bias1 = bb1_ref[...]            # (64, 1) f32   (hoisted out of loops)
    bias2 = bb2_ref[...]            # (48, 1) f32

    # ---- conv1 + pool1: one row-pair matmul per pooled row ----
    for i in range(P1):
        lo = 2 * i * K1
        slab = x_ref[0, lo:lo + 4 * K1, :]                          # (224, tb) bf16
        rows = jnp.dot(wb1, slab, preferred_element_type=f32)       # (256, tb) f32
        rmax = jnp.maximum(rows[:M1, :], rows[M1:, :])              # (128, tb)
        r = rmax.reshape(P1, 2 * C1, tb)
        pooled = jnp.maximum(r[:, :C1, :], r[:, C1:, :]).reshape(P1 * C1, tb)
        p1_ref[i * K2:(i + 1) * K2, :] = (pooled + bias1).astype(bf16)

    # ---- conv2 + pool2 ----
    for i in range(P2):
        lo = 2 * i * K2
        slab = p1_ref[lo:lo + 4 * K2, :]                            # (256, tb) bf16
        rows = jnp.dot(wb2, slab, preferred_element_type=f32)       # (192, tb) f32
        rmax = jnp.maximum(rows[:M2, :], rows[M2:, :])              # (96, tb)
        r = rmax.reshape(P2, 2 * C2, tb)
        pooled = jnp.maximum(r[:, :C2, :], r[:, C2:, :]).reshape(P2 * C2, tb)
        p2_ref[i * K3:(i + 1) * K3, :] = (pooled + bias2).astype(bf16)

    # ---- conv3 (-> flatten): single dy-fused matmul ----
    feat = jnp.dot(wb3_ref[...], p2_ref[...],
                   preferred_element_type=f32) + bb3_ref[...]       # (32, tb) f32

    # ---- ffnn over the whole batch tile ----
    h = jnp.dot(lw1_ref[...], feat.astype(bf16),
                preferred_element_type=f32) + lb1_ref[...]          # (16, tb)
    h = jnp.maximum(h, 0.0)
    logit = jnp.dot(lw2_ref[...], h.astype(bf16),
                    preferred_element_type=f32) + lb2_ref[...]      # (1, tb)
    out_ref[0] = pl.reciprocal(1.0 + jnp.exp(-logit), approx=True)  # sigmoid


def _make_dy_band(w_hwio, w_out_cols, k_row):
    """dy-fused block-banded conv weights, shape (w_out_cols*cout, 3*k_row).

    band @ concat(row[h], row[h+1], row[h+2]) is the valid 3x3 conv output
    row h for the (W*C, TB) row layout (w-major, channel-minor).
    """
    kh, kw, cin, cout = w_hwio.shape
    wt = jnp.transpose(w_hwio, (0, 1, 3, 2)).astype(jnp.float32)   # (kh,kw,co,ci)
    m = w_out_cols * cout
    band = jnp.zeros((m, kh * k_row), jnp.float32)
    for dy in range(kh):
        for wo in range(w_out_cols):
            for dx in range(kw):
                r0 = wo * cout
                c0 = dy * k_row + (wo + dx) * cin
                band = band.at[r0:r0 + cout, c0:c0 + cin].set(wt[dy, dx])
    return band


def _make_pair_band(w_hwio, w_out_cols, k_row):
    """Row-pair + dy-fused band, shape (2*m, 4*k_row).

    Top half produces conv output row 2i (input rows 2i..2i+2), bottom half
    row 2i+1 (input rows 2i+1..2i+3), so pair @ 4-row input slab yields both
    rows of one max-pool pair in a single matmul.
    """
    m = w_out_cols * w_hwio.shape[3]
    band = _make_dy_band(w_hwio, w_out_cols, k_row)                 # (m, 3*k_row)
    pair = jnp.zeros((2 * m, 4 * k_row), jnp.float32)
    pair = pair.at[:m, :3 * k_row].set(band)
    pair = pair.at[m:, k_row:].set(band)
    return pair


def _const_spec(a):
    nd = a.ndim
    return pl.BlockSpec(a.shape, lambda g, nd=nd: (0,) * nd)


def cnn_forward(x_nchw, params, tb=TB):
    """x_nchw: (B, 3, 18, 18) float32 (PyTorch layout). Returns (B, 1) float32."""
    w1, b1, w2, b2, w3, b3, lw1, lb1, lw2, lb2 = params
    B = x_nchw.shape[0]
    G = pl.cdiv(B, tb)
    Bp = G * tb

    # Batch-in-lanes packed input: (G, H*K1, TB) bf16, per-row layout w-major /
    # channel-minor with 2 zero padding columns (54,55) per row.
    x = jnp.transpose(x_nchw.astype(jnp.float32), (2, 3, 1, 0))     # (H, W, C, B)
    x = x.reshape(H_IN, W_IN * C_IN, B)
    x = jnp.pad(x, ((0, 0), (0, K1 - W_IN * C_IN), (0, Bp - B)))
    x = x.reshape(H_IN, K1, G, tb).transpose(2, 0, 1, 3)
    x = x.reshape(G, H_IN * K1, tb).astype(jnp.bfloat16)

    # Precomputed banded conv weights (bf16 MXU operands) + f32 biases.
    wb1 = _make_pair_band(w1, H1, K1).astype(jnp.bfloat16)          # (256, 224)
    wb2 = _make_pair_band(w2, H2, K2).astype(jnp.bfloat16)          # (192, 256)
    wb3 = _make_dy_band(w3, 1, K3).astype(jnp.bfloat16)             # ( 32, 144)
    bb1 = jnp.tile(b1, P1).reshape(P1 * C1, 1).astype(jnp.float32)  # (64, 1)
    bb2 = jnp.tile(b2, P2).reshape(P2 * C2, 1).astype(jnp.float32)  # (48, 1)
    bb3 = b3.reshape(C3, 1).astype(jnp.float32)                     # (32, 1)
    lw1t = lw1.T.astype(jnp.bfloat16)                               # (16, 32)
    lb1c = lb1.reshape(HID, 1).astype(jnp.float32)                  # (16, 1)
    lw2t = lw2.T.astype(jnp.bfloat16)                               # (1, 16)
    lb2c = lb2.reshape(1, 1).astype(jnp.float32)                    # (1, 1)

    consts = (wb1, wb2, wb3, bb1, bb2, bb3, lw1t, lb1c, lw2t, lb2c)
    in_specs = [pl.BlockSpec((1, H_IN * K1, tb), lambda g: (g, 0, 0))]
    in_specs += [_const_spec(a) for a in consts]

    const_bytes = sum(int(a.size) * a.dtype.itemsize for a in consts)
    flops = 2 * tb * (P1 * (2 * M1) * (4 * K1) + P2 * (2 * M2) * (4 * K2)
                      + C3 * (3 * K3) + HID * C3 + HID) * G
    cost = pl.CostEstimate(
        flops=int(flops),
        transcendentals=int(Bp),
        bytes_accessed=int((H_IN * K1 * tb * 2 + const_bytes + tb * 4) * G))

    out = pl.pallas_call(
        _cnn_kernel,
        out_shape=jax.ShapeDtypeStruct((G, 1, tb), jnp.float32),
        grid_spec=pltpu.PrefetchScalarGridSpec(
            num_scalar_prefetch=0,
            grid=(G,),
            in_specs=in_specs,
            out_specs=pl.BlockSpec((1, 1, tb), lambda g: (g, 0, 0)),
            scratch_shapes=[
                pltpu.VMEM((P1 * K2, tb), jnp.bfloat16),   # pool1 rows (512, tb)
                pltpu.VMEM((P2 * K3, tb), jnp.bfloat16),   # pool2 rows (144, tb)
            ]),
        compiler_params=pltpu.CompilerParams(
            dimension_semantics=("parallel",)),
        cost_estimate=cost,
    )(x, *consts)

    return out.reshape(G * tb)[:B].reshape(B, 1)


def init_params(key):
    ks = jax.random.split(key, 10)

    def nrm(k, shape, scale):
        return (scale * jax.random.normal(k, shape)).astype(jnp.float32)

    w1 = nrm(ks[0], (3, 3, C_IN, C1), 0.2)     # Conv2d(3, 8, 3)   HWIO
    b1 = nrm(ks[1], (C1,), 0.1)
    w2 = nrm(ks[2], (3, 3, C1, C2), 0.1)       # Conv2d(8, 16, 3)  HWIO
    b2 = nrm(ks[3], (C2,), 0.1)
    w3 = nrm(ks[4], (3, 3, C2, C3), 0.1)       # Conv2d(16, 32, 3) HWIO
    b3 = nrm(ks[5], (C3,), 0.1)
    lw1 = nrm(ks[6], (C3, HID), 0.1)           # Linear(32, 16)    (in, out)
    lb1 = nrm(ks[7], (HID,), 0.1)
    lw2 = nrm(ks[8], (HID, 1), 0.1)            # Linear(16, 1)     (in, out)
    lb2 = nrm(ks[9], (1,), 0.1)
    return (w1, b1, w2, b2, w3, b3, lw1, lb1, lw2, lb2)


def reference_forward_f32(x_nchw, params):
    """Pure-JAX f32 reference matching the PyTorch module semantics."""
    w1, b1, w2, b2, w3, b3, lw1, lb1, lw2, lb2 = params
    x = jnp.transpose(x_nchw, (0, 2, 3, 1)).astype(jnp.float32)
    hi = jax.lax.Precision.HIGHEST

    def conv(y, w, b):
        y = jax.lax.conv_general_dilated(
            y, w, (1, 1), 'VALID',
            dimension_numbers=('NHWC', 'HWIO', 'NHWC'), precision=hi)
        return y + b.reshape(1, 1, 1, -1)

    def pool(y):
        return jax.lax.reduce_window(
            y, -jnp.inf, jax.lax.max, (1, 2, 2, 1), (1, 2, 2, 1), 'VALID')

    y = pool(conv(x, w1, b1))
    y = pool(conv(y, w2, b2))
    y = conv(y, w3, b3)                          # (B, 1, 1, 32)
    feat = y.reshape(x.shape[0], -1)             # flatten -> (B, 32)
    h = jnp.maximum(jnp.dot(feat, lw1, precision=hi) + lb1, 0.0)
    return jax.nn.sigmoid(jnp.dot(h, lw2, precision=hi) + lb2)


def reference_forward_mixed(x_nchw, params):
    """Pure-JAX reference mirroring the kernel's bf16-operand / f32-accumulate
    mixed precision (tight correctness check for the Pallas kernel)."""
    w1, b1, w2, b2, w3, b3, lw1, lb1, lw2, lb2 = params
    bf16, f32 = jnp.bfloat16, jnp.float32

    def conv(y_bf16, w, b):
        out = jax.lax.conv_general_dilated(
            y_bf16, w.astype(bf16), (1, 1), 'VALID',
            dimension_numbers=('NHWC', 'HWIO', 'NHWC'),
            preferred_element_type=f32)
        return out + b.reshape(1, 1, 1, -1)

    def pool(y):
        return jax.lax.reduce_window(
            y, -jnp.inf, jax.lax.max, (1, 2, 2, 1), (1, 2, 2, 1), 'VALID')

    x = jnp.transpose(x_nchw, (0, 2, 3, 1)).astype(bf16)
    y = pool(conv(x, w1, b1)).astype(bf16)
    y = pool(conv(y, w2, b2)).astype(bf16)
    y = conv(y, w3, b3)                          # (B, 1, 1, 32) f32
    feat = y.reshape(x.shape[0], -1)
    h = jnp.dot(feat.astype(bf16), lw1.astype(bf16),
                preferred_element_type=f32) + lb1
    h = jnp.maximum(h, 0.0)
    logit = jnp.dot(h.astype(bf16), lw2.astype(bf16),
                    preferred_element_type=f32) + lb2
    return jax.nn.sigmoid(logit)


if __name__ == "__main__":
    key = jax.random.PRNGKey(0)
    kx, kp = jax.random.split(key)

    B = 200  # exercises 2 grid steps of TB=128 plus tail padding
    x = jax.random.normal(kx, (B, C_IN, H_IN, H_IN), dtype=jnp.float32)  # NCHW
    params = init_params(kp)

    out = jax.block_until_ready(jax.jit(cnn_forward)(x, params))
    ref_mixed = reference_forward_mixed(x, params)
    ref_f32 = reference_forward_f32(x, params)

    assert out.shape == (B, 1), out.shape
    assert bool(jnp.all(jnp.isfinite(out)))
    # Tight check vs a reference that uses the same bf16-operand math.
    assert jnp.allclose(out, ref_mixed, atol=2e-3, rtol=2e-3), (
        "mixed-ref max abs diff", float(jnp.max(jnp.abs(out - ref_mixed))))
    # Looser check vs the full-f32 module semantics (bf16 MXU operand rounding).
    assert jnp.allclose(out, ref_f32, atol=3e-2, rtol=3e-2), (
        "f32-ref max abs diff", float(jnp.max(jnp.abs(out - ref_f32))))
    print("KERNEL_OK")
</pallas_src>

<mosaic_0001>
module attributes {stable_mosaic.version = 11 : i64} {
  func.func @_cnn_kernel(%arg0: i32, %arg1: memref<1x1008x128xbf16, #tpu.memory_space<vmem>>, %arg2: memref<256x224xbf16, #tpu.memory_space<vmem>>, %arg3: memref<192x256xbf16, #tpu.memory_space<vmem>>, %arg4: memref<32x144xbf16, #tpu.memory_space<vmem>>, %arg5: memref<64x1xf32, #tpu.memory_space<vmem>>, %arg6: memref<48x1xf32, #tpu.memory_space<vmem>>, %arg7: memref<32x1xf32, #tpu.memory_space<vmem>>, %arg8: memref<16x32xbf16, #tpu.memory_space<vmem>>, %arg9: memref<16x1xf32, #tpu.memory_space<vmem>>, %arg10: memref<1x16xbf16, #tpu.memory_space<vmem>>, %arg11: memref<1x1xf32, #tpu.memory_space<vmem>>, %arg12: memref<1x1x128xf32, #tpu.memory_space<vmem>>, %arg13: memref<512x128xbf16, #tpu.memory_space<vmem>>, %arg14: memref<144x128xbf16, #tpu.memory_space<vmem>>) attributes {dimension_semantics = [#tpu.dimension_semantics<parallel>], iteration_bounds = array<i64: 2>, scalar_prefetch = 0 : i64, scratch_operands = 2 : i64, tpu.core_type = #tpu.core_type<tc>, window_params = [{transform_indices = @transform_0, window_bounds = array<i64: 1, 1008, 128>}, {pipeline_mode = #tpu.pipeline_mode<synchronous>, transform_indices = @transform_1, window_bounds = array<i64: 256, 224>}, {pipeline_mode = #tpu.pipeline_mode<synchronous>, transform_indices = @transform_2, window_bounds = array<i64: 192, 256>}, {pipeline_mode = #tpu.pipeline_mode<synchronous>, transform_indices = @transform_3, window_bounds = array<i64: 32, 144>}, {pipeline_mode = #tpu.pipeline_mode<synchronous>, transform_indices = @transform_4, window_bounds = array<i64: 64, 1>}, {pipeline_mode = #tpu.pipeline_mode<synchronous>, transform_indices = @transform_5, window_bounds = array<i64: 48, 1>}, {pipeline_mode = #tpu.pipeline_mode<synchronous>, transform_indices = @transform_6, window_bounds = array<i64: 32, 1>}, {pipeline_mode = #tpu.pipeline_mode<synchronous>, transform_indices = @transform_7, window_bounds = array<i64: 16, 32>}, {pipeline_mode = #tpu.pipeline_mode<synchronous>, transform_indices = @transform_8, window_bounds = array<i64: 16, 1>}, {pipeline_mode = #tpu.pipeline_mode<synchronous>, transform_indices = @transform_9, window_bounds = array<i64: 1, 16>}, {pipeline_mode = #tpu.pipeline_mode<synchronous>, transform_indices = @transform_10, window_bounds = array<i64: 1, 1>}, {transform_indices = @transform_11, window_bounds = array<i64: 1, 1, 128>}]} {
    %c0 = arith.constant 0 : index
    %c0_0 = arith.constant 0 : index
    %0 = vector.load %arg2[%c0, %c0_0] : memref<256x224xbf16, #tpu.memory_space<vmem>>, vector<256x224xbf16>
    %c0_1 = arith.constant 0 : index
    %c0_2 = arith.constant 0 : index
    %1 = vector.load %arg3[%c0_1, %c0_2] : memref<192x256xbf16, #tpu.memory_space<vmem>>, vector<192x256xbf16>
    %c0_3 = arith.constant 0 : index
    %c0_4 = arith.constant 0 : index
    %2 = vector.load %arg5[%c0_3, %c0_4] : memref<64x1xf32, #tpu.memory_space<vmem>>, vector<64x1xf32>
    %c0_5 = arith.constant 0 : index
    %c0_6 = arith.constant 0 : index
    %3 = vector.load %arg6[%c0_5, %c0_6] : memref<48x1xf32, #tpu.memory_space<vmem>>, vector<48x1xf32>
    %c0_7 = arith.constant 0 : index
    %c0_8 = arith.constant 0 : index
    %c0_9 = arith.constant 0 : index
    %4 = vector.load %arg1[%c0_7, %c0_8, %c0_9] : memref<1x1008x128xbf16, #tpu.memory_space<vmem>>, vector<1x224x128xbf16>
    %5 = vector.shape_cast %4 : vector<1x224x128xbf16> to vector<224x128xbf16>
    %cst = arith.constant dense<0.000000e+00> : vector<256x128xf32>
    %6 = tpu.matmul %0, %5, %cst {dimension_numbers = #tpu.dot_dimension_numbers<[1], [0], [0], [1], [0, 0, 1, 1], [], []>} : vector<256x224xbf16>, vector<224x128xbf16>, vector<256x128xf32> -> vector<256x128xf32>
    %7 = vector.extract_strided_slice %6 {offsets = [0, 0], sizes = [128, 128], strides = [1, 1]} : vector<256x128xf32> to vector<128x128xf32>
    %8 = vector.extract_strided_slice %6 {offsets = [128, 0], sizes = [128, 128], strides = [1, 1]} : vector<256x128xf32> to vector<128x128xf32>
    %9 = arith.maximumf %7, %8 : vector<128x128xf32>
    %10 = vector.shape_cast %9 : vector<128x128xf32> to vector<8x16x128xf32>
    %11 = vector.extract_strided_slice %10 {offsets = [0, 0, 0], sizes = [8, 8, 128], strides = [1, 1, 1]} : vector<8x16x128xf32> to vector<8x8x128xf32>
    %12 = vector.extract_strided_slice %10 {offsets = [0, 8, 0], sizes = [8, 8, 128], strides = [1, 1, 1]} : vector<8x16x128xf32> to vector<8x8x128xf32>
    %13 = arith.maximumf %11, %12 : vector<8x8x128xf32>
    %14 = vector.shape_cast %13 : vector<8x8x128xf32> to vector<64x128xf32>
    %15 = vector.broadcast %2 : vector<64x1xf32> to vector<64x128xf32>
    %16 = arith.addf %14, %15 : vector<64x128xf32>
    %17 = arith.truncf %16 : vector<64x128xf32> to vector<64x128xbf16>
    %c0_10 = arith.constant 0 : index
    %c0_11 = arith.constant 0 : index
    %18 = vector.load %arg13[%c0_10, %c0_11] : memref<512x128xbf16, #tpu.memory_space<vmem>>, vector<64x128xbf16>
    tpu.vector_store %arg13[%c0_10, %c0_11], %17 {strides = array<i32>} : memref<512x128xbf16, #tpu.memory_space<vmem>>, vector<64x128xbf16>,
    %c0_12 = arith.constant 0 : index
    %c112 = arith.constant 112 : index
    %c0_13 = arith.constant 0 : index
    %19 = vector.load %arg1[%c0_12, %c112, %c0_13] : memref<1x1008x128xbf16, #tpu.memory_space<vmem>>, vector<1x224x128xbf16>
    %20 = vector.shape_cast %19 : vector<1x224x128xbf16> to vector<224x128xbf16>
    %cst_14 = arith.constant dense<0.000000e+00> : vector<256x128xf32>
    %21 = tpu.matmul %0, %20, %cst_14 {dimension_numbers = #tpu.dot_dimension_numbers<[1], [0], [0], [1], [0, 0, 1, 1], [], []>} : vector<256x224xbf16>, vector<224x128xbf16>, vector<256x128xf32> -> vector<256x128xf32>
    %22 = vector.extract_strided_slice %21 {offsets = [0, 0], sizes = [128, 128], strides = [1, 1]} : vector<256x128xf32> to vector<128x128xf32>
    %23 = vector.extract_strided_slice %21 {offsets = [128, 0], sizes = [128, 128], strides = [1, 1]} : vector<256x128xf32> to vector<128x128xf32>
    %24 = arith.maximumf %22, %23 : vector<128x128xf32>
    %25 = vector.shape_cast %24 : vector<128x128xf32> to vector<8x16x128xf32>
    %26 = vector.extract_strided_slice %25 {offsets = [0, 0, 0], sizes = [8, 8, 128], strides = [1, 1, 1]} : vector<8x16x128xf32> to vector<8x8x128xf32>
    %27 = vector.extract_strided_slice %25 {offsets = [0, 8, 0], sizes = [8, 8, 128], strides = [1, 1, 1]} : vector<8x16x128xf32> to vector<8x8x128xf32>
    %28 = arith.maximumf %26, %27 : vector<8x8x128xf32>
    %29 = vector.shape_cast %28 : vector<8x8x128xf32> to vector<64x128xf32>
    %30 = vector.broadcast %2 : vector<64x1xf32> to vector<64x128xf32>
    %31 = arith.addf %29, %30 : vector<64x128xf32>
    %32 = arith.truncf %31 : vector<64x128xf32> to vector<64x128xbf16>
    %c64 = arith.constant 64 : index
    %c0_15 = arith.constant 0 : index
    %33 = vector.load %arg13[%c64, %c0_15] : memref<512x128xbf16, #tpu.memory_space<vmem>>, vector<64x128xbf16>
    tpu.vector_store %arg13[%c64, %c0_15], %32 {strides = array<i32>} : memref<512x128xbf16, #tpu.memory_space<vmem>>, vector<64x128xbf16>,
    %c0_16 = arith.constant 0 : index
    %c224 = arith.constant 224 : index
    %c0_17 = arith.constant 0 : index
    %34 = vector.load %arg1[%c0_16, %c224, %c0_17] : memref<1x1008x128xbf16, #tpu.memory_space<vmem>>, vector<1x224x128xbf16>
    %35 = vector.shape_cast %34 : vector<1x224x128xbf16> to vector<224x128xbf16>
    %cst_18 = arith.constant dense<0.000000e+00> : vector<256x128xf32>
    %36 = tpu.matmul %0, %35, %cst_18 {dimension_numbers = #tpu.dot_dimension_numbers<[1], [0], [0], [1], [0, 0, 1, 1], [], []>} : vector<256x224xbf16>, vector<224x128xbf16>, vector<256x128xf32> -> vector<256x128xf32>
    %37 = vector.extract_strided_slice %36 {offsets = [0, 0], sizes = [128, 128], strides = [1, 1]} : vector<256x128xf32> to vector<128x128xf32>
    %38 = vector.extract_strided_slice %36 {offsets = [128, 0], sizes = [128, 128], strides = [1, 1]} : vector<256x128xf32> to vector<128x128xf32>
    %39 = arith.maximumf %37, %38 : vector<128x128xf32>
    %40 = vector.shape_cast %39 : vector<128x128xf32> to vector<8x16x128xf32>
    %41 = vector.extract_strided_slice %40 {offsets = [0, 0, 0], sizes = [8, 8, 128], strides = [1, 1, 1]} : vector<8x16x128xf32> to vector<8x8x128xf32>
    %42 = vector.extract_strided_slice %40 {offsets = [0, 8, 0], sizes = [8, 8, 128], strides = [1, 1, 1]} : vector<8x16x128xf32> to vector<8x8x128xf32>
    %43 = arith.maximumf %41, %42 : vector<8x8x128xf32>
    %44 = vector.shape_cast %43 : vector<8x8x128xf32> to vector<64x128xf32>
    %45 = vector.broadcast %2 : vector<64x1xf32> to vector<64x128xf32>
    %46 = arith.addf %44, %45 : vector<64x128xf32>
    %47 = arith.truncf %46 : vector<64x128xf32> to vector<64x128xbf16>
    %c128 = arith.constant 128 : index
    %c0_19 = arith.constant 0 : index
    %48 = vector.load %arg13[%c128, %c0_19] : memref<512x128xbf16, #tpu.memory_space<vmem>>, vector<64x128xbf16>
    tpu.vector_store %arg13[%c128, %c0_19], %47 {strides = array<i32>} : memref<512x128xbf16, #tpu.memory_space<vmem>>, vector<64x128xbf16>,
    %c0_20 = arith.constant 0 : index
    %c336 = arith.constant 336 : index
    %c0_21 = arith.constant 0 : index
    %49 = vector.load %arg1[%c0_20, %c336, %c0_21] : memref<1x1008x128xbf16, #tpu.memory_space<vmem>>, vector<1x224x128xbf16>
    %50 = vector.shape_cast %49 : vector<1x224x128xbf16> to vector<224x128xbf16>
    %cst_22 = arith.constant dense<0.000000e+00> : vector<256x128xf32>
    %51 = tpu.matmul %0, %50, %cst_22 {dimension_numbers = #tpu.dot_dimension_numbers<[1], [0], [0], [1], [0, 0, 1, 1], [], []>} : vector<256x224xbf16>, vector<224x128xbf16>, vector<256x128xf32> -> vector<256x128xf32>
    %52 = vector.extract_strided_slice %51 {offsets = [0, 0], sizes = [128, 128], strides = [1, 1]} : vector<256x128xf32> to vector<128x128xf32>
    %53 = vector.extract_strided_slice %51 {offsets = [128, 0], sizes = [128, 128], strides = [1, 1]} : vector<256x128xf32> to vector<128x128xf32>
    %54 = arith.maximumf %52, %53 : vector<128x128xf32>
    %55 = vector.shape_cast %54 : vector<128x128xf32> to vector<8x16x128xf32>
    %56 = vector.extract_strided_slice %55 {offsets = [0, 0, 0], sizes = [8, 8, 128], strides = [1, 1, 1]} : vector<8x16x128xf32> to vector<8x8x128xf32>
    %57 = vector.extract_strided_slice %55 {offsets = [0, 8, 0], sizes = [8, 8, 128], strides = [1, 1, 1]} : vector<8x16x128xf32> to vector<8x8x128xf32>
    %58 = arith.maximumf %56, %57 : vector<8x8x128xf32>
    %59 = vector.shape_cast %58 : vector<8x8x128xf32> to vector<64x128xf32>
    %60 = vector.broadcast %2 : vector<64x1xf32> to vector<64x128xf32>
    %61 = arith.addf %59, %60 : vector<64x128xf32>
    %62 = arith.truncf %61 : vector<64x128xf32> to vector<64x128xbf16>
    %c192 = arith.constant 192 : index
    %c0_23 = arith.constant 0 : index
    %63 = vector.load %arg13[%c192, %c0_23] : memref<512x128xbf16, #tpu.memory_space<vmem>>, vector<64x128xbf16>
    tpu.vector_store %arg13[%c192, %c0_23], %62 {strides = array<i32>} : memref<512x128xbf16, #tpu.memory_space<vmem>>, vector<64x128xbf16>,
    %c0_24 = arith.constant 0 : index
    %c448 = arith.constant 448 : index
    %c0_25 = arith.constant 0 : index
    %64 = vector.load %arg1[%c0_24, %c448, %c0_25] : memref<1x1008x128xbf16, #tpu.memory_space<vmem>>, vector<1x224x128xbf16>
    %65 = vector.shape_cast %64 : vector<1x224x128xbf16> to vector<224x128xbf16>
    %cst_26 = arith.constant dense<0.000000e+00> : vector<256x128xf32>
    %66 = tpu.matmul %0, %65, %cst_26 {dimension_numbers = #tpu.dot_dimension_numbers<[1], [0], [0], [1], [0, 0, 1, 1], [], []>} : vector<256x224xbf16>, vector<224x128xbf16>, vector<256x128xf32> -> vector<256x128xf32>
    %67 = vector.extract_strided_slice %66 {offsets = [0, 0], sizes = [128, 128], strides = [1, 1]} : vector<256x128xf32> to vector<128x128xf32>
    %68 = vector.extract_strided_slice %66 {offsets = [128, 0], sizes = [128, 128], strides = [1, 1]} : vector<256x128xf32> to vector<128x128xf32>
    %69 = arith.maximumf %67, %68 : vector<128x128xf32>
    %70 = vector.shape_cast %69 : vector<128x128xf32> to vector<8x16x128xf32>
    %71 = vector.extract_strided_slice %70 {offsets = [0, 0, 0], sizes = [8, 8, 128], strides = [1, 1, 1]} : vector<8x16x128xf32> to vector<8x8x128xf32>
    %72 = vector.extract_strided_slice %70 {offsets = [0, 8, 0], sizes = [8, 8, 128], strides = [1, 1, 1]} : vector<8x16x128xf32> to vector<8x8x128xf32>
    %73 = arith.maximumf %71, %72 : vector<8x8x128xf32>
    %74 = vector.shape_cast %73 : vector<8x8x128xf32> to vector<64x128xf32>
    %75 = vector.broadcast %2 : vector<64x1xf32> to vector<64x128xf32>
    %76 = arith.addf %74, %75 : vector<64x128xf32>
    %77 = arith.truncf %76 : vector<64x128xf32> to vector<64x128xbf16>
    %c256 = arith.constant 256 : index
    %c0_27 = arith.constant 0 : index
    %78 = vector.load %arg13[%c256, %c0_27] : memref<512x128xbf16, #tpu.memory_space<vmem>>, vector<64x128xbf16>
    tpu.vector_store %arg13[%c256, %c0_27], %77 {strides = array<i32>} : memref<512x128xbf16, #tpu.memory_space<vmem>>, vector<64x128xbf16>,
    %c0_28 = arith.constant 0 : index
    %c560 = arith.constant 560 : index
    %c0_29 = arith.constant 0 : index
    %79 = vector.load %arg1[%c0_28, %c560, %c0_29] : memref<1x1008x128xbf16, #tpu.memory_space<vmem>>, vector<1x224x128xbf16>
    %80 = vector.shape_cast %79 : vector<1x224x128xbf16> to vector<224x128xbf16>
    %cst_30 = arith.constant dense<0.000000e+00> : vector<256x128xf32>
    %81 = tpu.matmul %0, %80, %cst_30 {dimension_numbers = #tpu.dot_dimension_numbers<[1], [0], [0], [1], [0, 0, 1, 1], [], []>} : vector<256x224xbf16>, vector<224x128xbf16>, vector<256x128xf32> -> vector<256x128xf32>
    %82 = vector.extract_strided_slice %81 {offsets = [0, 0], sizes = [128, 128], strides = [1, 1]} : vector<256x128xf32> to vector<128x128xf32>
    %83 = vector.extract_strided_slice %81 {offsets = [128, 0], sizes = [128, 128], strides = [1, 1]} : vector<256x128xf32> to vector<128x128xf32>
    %84 = arith.maximumf %82, %83 : vector<128x128xf32>
    %85 = vector.shape_cast %84 : vector<128x128xf32> to vector<8x16x128xf32>
    %86 = vector.extract_strided_slice %85 {offsets = [0, 0, 0], sizes = [8, 8, 128], strides = [1, 1, 1]} : vector<8x16x128xf32> to vector<8x8x128xf32>
    %87 = vector.extract_strided_slice %85 {offsets = [0, 8, 0], sizes = [8, 8, 128], strides = [1, 1, 1]} : vector<8x16x128xf32> to vector<8x8x128xf32>
    %88 = arith.maximumf %86, %87 : vector<8x8x128xf32>
    %89 = vector.shape_cast %88 : vector<8x8x128xf32> to vector<64x128xf32>
    %90 = vector.broadcast %2 : vector<64x1xf32> to vector<64x128xf32>
    %91 = arith.addf %89, %90 : vector<64x128xf32>
    %92 = arith.truncf %91 : vector<64x128xf32> to vector<64x128xbf16>
    %c320 = arith.constant 320 : index
    %c0_31 = arith.constant 0 : index
    %93 = vector.load %arg13[%c320, %c0_31] : memref<512x128xbf16, #tpu.memory_space<vmem>>, vector<64x128xbf16>
    tpu.vector_store %arg13[%c320, %c0_31], %92 {strides = array<i32>} : memref<512x128xbf16, #tpu.memory_space<vmem>>, vector<64x128xbf16>,
    %c0_32 = arith.constant 0 : index
    %c672 = arith.constant 672 : index
    %c0_33 = arith.constant 0 : index
    %94 = vector.load %arg1[%c0_32, %c672, %c0_33] : memref<1x1008x128xbf16, #tpu.memory_space<vmem>>, vector<1x224x128xbf16>
    %95 = vector.shape_cast %94 : vector<1x224x128xbf16> to vector<224x128xbf16>
    %cst_34 = arith.constant dense<0.000000e+00> : vector<256x128xf32>
    %96 = tpu.matmul %0, %95, %cst_34 {dimension_numbers = #tpu.dot_dimension_numbers<[1], [0], [0], [1], [0, 0, 1, 1], [], []>} : vector<256x224xbf16>, vector<224x128xbf16>, vector<256x128xf32> -> vector<256x128xf32>
    %97 = vector.extract_strided_slice %96 {offsets = [0, 0], sizes = [128, 128], strides = [1, 1]} : vector<256x128xf32> to vector<128x128xf32>
    %98 = vector.extract_strided_slice %96 {offsets = [128, 0], sizes = [128, 128], strides = [1, 1]} : vector<256x128xf32> to vector<128x128xf32>
    %99 = arith.maximumf %97, %98 : vector<128x128xf32>
    %100 = vector.shape_cast %99 : vector<128x128xf32> to vector<8x16x128xf32>
    %101 = vector.extract_strided_slice %100 {offsets = [0, 0, 0], sizes = [8, 8, 128], strides = [1, 1, 1]} : vector<8x16x128xf32> to vector<8x8x128xf32>
    %102 = vector.extract_strided_slice %100 {offsets = [0, 8, 0], sizes = [8, 8, 128], strides = [1, 1, 1]} : vector<8x16x128xf32> to vector<8x8x128xf32>
    %103 = arith.maximumf %101, %102 : vector<8x8x128xf32>
    %104 = vector.shape_cast %103 : vector<8x8x128xf32> to vector<64x128xf32>
    %105 = vector.broadcast %2 : vector<64x1xf32> to vector<64x128xf32>
    %106 = arith.addf %104, %105 : vector<64x128xf32>
    %107 = arith.truncf %106 : vector<64x128xf32> to vector<64x128xbf16>
    %c384 = arith.constant 384 : index
    %c0_35 = arith.constant 0 : index
    %108 = vector.load %arg13[%c384, %c0_35] : memref<512x128xbf16, #tpu.memory_space<vmem>>, vector<64x128xbf16>
    tpu.vector_store %arg13[%c384, %c0_35], %107 {strides = array<i32>} : memref<512x128xbf16, #tpu.memory_space<vmem>>, vector<64x128xbf16>,
    %c0_36 = arith.constant 0 : index
    %c784 = arith.constant 784 : index
    %c0_37 = arith.constant 0 : index
    %109 = vector.load %arg1[%c0_36, %c784, %c0_37] : memref<1x1008x128xbf16, #tpu.memory_space<vmem>>, vector<1x224x128xbf16>
    %110 = vector.shape_cast %109 : vector<1x224x128xbf16> to vector<224x128xbf16>
    %cst_38 = arith.constant dense<0.000000e+00> : vector<256x128xf32>
    %111 = tpu.matmul %0, %110, %cst_38 {dimension_numbers = #tpu.dot_dimension_numbers<[1], [0], [0], [1], [0, 0, 1, 1], [], []>} : vector<256x224xbf16>, vector<224x128xbf16>, vector<256x128xf32> -> vector<256x128xf32>
    %112 = vector.extract_strided_slice %111 {offsets = [0, 0], sizes = [128, 128], strides = [1, 1]} : vector<256x128xf32> to vector<128x128xf32>
    %113 = vector.extract_strided_slice %111 {offsets = [128, 0], sizes = [128, 128], strides = [1, 1]} : vector<256x128xf32> to vector<128x128xf32>
    %114 = arith.maximumf %112, %113 : vector<128x128xf32>
    %115 = vector.shape_cast %114 : vector<128x128xf32> to vector<8x16x128xf32>
    %116 = vector.extract_strided_slice %115 {offsets = [0, 0, 0], sizes = [8, 8, 128], strides = [1, 1, 1]} : vector<8x16x128xf32> to vector<8x8x128xf32>
    %117 = vector.extract_strided_slice %115 {offsets = [0, 8, 0], sizes = [8, 8, 128], strides = [1, 1, 1]} : vector<8x16x128xf32> to vector<8x8x128xf32>
    %118 = arith.maximumf %116, %117 : vector<8x8x128xf32>
    %119 = vector.shape_cast %118 : vector<8x8x128xf32> to vector<64x128xf32>
    %120 = vector.broadcast %2 : vector<64x1xf32> to vector<64x128xf32>
    %121 = arith.addf %119, %120 : vector<64x128xf32>
    %122 = arith.truncf %121 : vector<64x128xf32> to vector<64x128xbf16>
    %c448_39 = arith.constant 448 : index
    %c0_40 = arith.constant 0 : index
    %123 = vector.load %arg13[%c448_39, %c0_40] : memref<512x128xbf16, #tpu.memory_space<vmem>>, vector<64x128xbf16>
    tpu.vector_store %arg13[%c448_39, %c0_40], %122 {strides = array<i32>} : memref<512x128xbf16, #tpu.memory_space<vmem>>, vector<64x128xbf16>,
    %c0_41 = arith.constant 0 : index
    %c0_42 = arith.constant 0 : index
    %124 = vector.load %arg13[%c0_41, %c0_42] : memref<512x128xbf16, #tpu.memory_space<vmem>>, vector<256x128xbf16>
    %cst_43 = arith.constant dense<0.000000e+00> : vector<192x128xf32>
    %125 = tpu.matmul %1, %124, %cst_43 {dimension_numbers = #tpu.dot_dimension_numbers<[1], [0], [0], [1], [0, 0, 1, 1], [], []>} : vector<192x256xbf16>, vector<256x128xbf16>, vector<192x128xf32> -> vector<192x128xf32>
    %126 = vector.extract_strided_slice %125 {offsets = [0, 0], sizes = [96, 128], strides = [1, 1]} : vector<192x128xf32> to vector<96x128xf32>
    %127 = vector.extract_strided_slice %125 {offsets = [96, 0], sizes = [96, 128], strides = [1, 1]} : vector<192x128xf32> to vector<96x128xf32>
    %128 = arith.maximumf %126, %127 : vector<96x128xf32>
    %129 = vector.shape_cast %128 : vector<96x128xf32> to vector<3x32x128xf32>
    %130 = vector.extract_strided_slice %129 {offsets = [0, 0, 0], sizes = [3, 16, 128], strides = [1, 1, 1]} : vector<3x32x128xf32> to vector<3x16x128xf32>
    %131 = vector.extract_strided_slice %129 {offsets = [0, 16, 0], sizes = [3, 16, 128], strides = [1, 1, 1]} : vector<3x32x128xf32> to vector<3x16x128xf32>
    %132 = arith.maximumf %130, %131 : vector<3x16x128xf32>
    %133 = vector.shape_cast %132 : vector<3x16x128xf32> to vector<48x128xf32>
    %134 = vector.broadcast %3 : vector<48x1xf32> to vector<48x128xf32>
    %135 = arith.addf %133, %134 : vector<48x128xf32>
    %136 = arith.truncf %135 : vector<48x128xf32> to vector<48x128xbf16>
    %c0_44 = arith.constant 0 : index
    %c0_45 = arith.constant 0 : index
    %137 = vector.load %arg14[%c0_44, %c0_45] : memref<144x128xbf16, #tpu.memory_space<vmem>>, vector<48x128xbf16>
    tpu.vector_store %arg14[%c0_44, %c0_45], %136 {strides = array<i32>} : memref<144x128xbf16, #tpu.memory_space<vmem>>, vector<48x128xbf16>,
    %c128_46 = arith.constant 128 : index
    %c0_47 = arith.constant 0 : index
    %138 = vector.load %arg13[%c128_46, %c0_47] : memref<512x128xbf16, #tpu.memory_space<vmem>>, vector<256x128xbf16>
    %cst_48 = arith.constant dense<0.000000e+00> : vector<192x128xf32>
    %139 = tpu.matmul %1, %138, %cst_48 {dimension_numbers = #tpu.dot_dimension_numbers<[1], [0], [0], [1], [0, 0, 1, 1], [], []>} : vector<192x256xbf16>, vector<256x128xbf16>, vector<192x128xf32> -> vector<192x128xf32>
    %140 = vector.extract_strided_slice %139 {offsets = [0, 0], sizes = [96, 128], strides = [1, 1]} : vector<192x128xf32> to vector<96x128xf32>
    %141 = vector.extract_strided_slice %139 {offsets = [96, 0], sizes = [96, 128], strides = [1, 1]} : vector<192x128xf32> to vector<96x128xf32>
    %142 = arith.maximumf %140, %141 : vector<96x128xf32>
    %143 = vector.shape_cast %142 : vector<96x128xf32> to vector<3x32x128xf32>
    %144 = vector.extract_strided_slice %143 {offsets = [0, 0, 0], sizes = [3, 16, 128], strides = [1, 1, 1]} : vector<3x32x128xf32> to vector<3x16x128xf32>
    %145 = vector.extract_strided_slice %143 {offsets = [0, 16, 0], sizes = [3, 16, 128], strides = [1, 1, 1]} : vector<3x32x128xf32> to vector<3x16x128xf32>
    %146 = arith.maximumf %144, %145 : vector<3x16x128xf32>
    %147 = vector.shape_cast %146 : vector<3x16x128xf32> to vector<48x128xf32>
    %148 = vector.broadcast %3 : vector<48x1xf32> to vector<48x128xf32>
    %149 = arith.addf %147, %148 : vector<48x128xf32>
    %150 = arith.truncf %149 : vector<48x128xf32> to vector<48x128xbf16>
    %c48 = arith.constant 48 : index
    %c0_49 = arith.constant 0 : index
    %151 = vector.load %arg14[%c48, %c0_49] : memref<144x128xbf16, #tpu.memory_space<vmem>>, vector<48x128xbf16>
    tpu.vector_store %arg14[%c48, %c0_49], %150 {strides = array<i32>} : memref<144x128xbf16, #tpu.memory_space<vmem>>, vector<48x128xbf16>,
    %c256_50 = arith.constant 256 : index
    %c0_51 = arith.constant 0 : index
    %152 = vector.load %arg13[%c256_50, %c0_51] : memref<512x128xbf16, #tpu.memory_space<vmem>>, vector<256x128xbf16>
    %cst_52 = arith.constant dense<0.000000e+00> : vector<192x128xf32>
    %153 = tpu.matmul %1, %152, %cst_52 {dimension_numbers = #tpu.dot_dimension_numbers<[1], [0], [0], [1], [0, 0, 1, 1], [], []>} : vector<192x256xbf16>, vector<256x128xbf16>, vector<192x128xf32> -> vector<192x128xf32>
    %154 = vector.extract_strided_slice %153 {offsets = [0, 0], sizes = [96, 128], strides = [1, 1]} : vector<192x128xf32> to vector<96x128xf32>
    %155 = vector.extract_strided_slice %153 {offsets = [96, 0], sizes = [96, 128], strides = [1, 1]} : vector<192x128xf32> to vector<96x128xf32>
    %156 = arith.maximumf %154, %155 : vector<96x128xf32>
    %157 = vector.shape_cast %156 : vector<96x128xf32> to vector<3x32x128xf32>
    %158 = vector.extract_strided_slice %157 {offsets = [0, 0, 0], sizes = [3, 16, 128], strides = [1, 1, 1]} : vector<3x32x128xf32> to vector<3x16x128xf32>
    %159 = vector.extract_strided_slice %157 {offsets = [0, 16, 0], sizes = [3, 16, 128], strides = [1, 1, 1]} : vector<3x32x128xf32> to vector<3x16x128xf32>
    %160 = arith.maximumf %158, %159 : vector<3x16x128xf32>
    %161 = vector.shape_cast %160 : vector<3x16x128xf32> to vector<48x128xf32>
    %162 = vector.broadcast %3 : vector<48x1xf32> to vector<48x128xf32>
    %163 = arith.addf %161, %162 : vector<48x128xf32>
    %164 = arith.truncf %163 : vector<48x128xf32> to vector<48x128xbf16>
    %c96 = arith.constant 96 : index
    %c0_53 = arith.constant 0 : index
    %165 = vector.load %arg14[%c96, %c0_53] : memref<144x128xbf16, #tpu.memory_space<vmem>>, vector<48x128xbf16>
    tpu.vector_store %arg14[%c96, %c0_53], %164 {strides = array<i32>} : memref<144x128xbf16, #tpu.memory_space<vmem>>, vector<48x128xbf16>,
    %c0_54 = arith.constant 0 : index
    %c0_55 = arith.constant 0 : index
    %166 = vector.load %arg4[%c0_54, %c0_55] : memref<32x144xbf16, #tpu.memory_space<vmem>>, vector<32x144xbf16>
    %c0_56 = arith.constant 0 : index
    %c0_57 = arith.constant 0 : index
    %167 = vector.load %arg14[%c0_56, %c0_57] : memref<144x128xbf16, #tpu.memory_space<vmem>>, vector<144x128xbf16>
    %cst_58 = arith.constant dense<0.000000e+00> : vector<32x128xf32>
    %168 = tpu.matmul %166, %167, %cst_58 {dimension_numbers = #tpu.dot_dimension_numbers<[1], [0], [0], [1], [0, 0, 1, 1], [], []>} : vector<32x144xbf16>, vector<144x128xbf16>, vector<32x128xf32> -> vector<32x128xf32>
    %c0_59 = arith.constant 0 : index
    %c0_60 = arith.constant 0 : index
    %169 = vector.load %arg7[%c0_59, %c0_60] : memref<32x1xf32, #tpu.memory_space<vmem>>, vector<32x1xf32>
    %170 = vector.broadcast %169 : vector<32x1xf32> to vector<32x128xf32>
    %171 = arith.addf %168, %170 : vector<32x128xf32>
    %c0_61 = arith.constant 0 : index
    %c0_62 = arith.constant 0 : index
    %172 = vector.load %arg8[%c0_61, %c0_62] : memref<16x32xbf16, #tpu.memory_space<vmem>>, vector<16x32xbf16>
    %173 = arith.truncf %171 : vector<32x128xf32> to vector<32x128xbf16>
    %cst_63 = arith.constant dense<0.000000e+00> : vector<16x128xf32>
    %174 = tpu.matmul %172, %173, %cst_63 {dimension_numbers = #tpu.dot_dimension_numbers<[1], [0], [0], [1], [0, 0, 1, 1], [], []>} : vector<16x32xbf16>, vector<32x128xbf16>, vector<16x128xf32> -> vector<16x128xf32>
    %c0_64 = arith.constant 0 : index
    %c0_65 = arith.constant 0 : index
    %175 = vector.load %arg9[%c0_64, %c0_65] : memref<16x1xf32, #tpu.memory_space<vmem>>, vector<16x1xf32>
    %176 = vector.broadcast %175 : vector<16x1xf32> to vector<16x128xf32>
    %177 = arith.addf %174, %176 : vector<16x128xf32>
    %cst_66 = arith.constant 0.000000e+00 : f32
    %178 = vector.broadcast %cst_66 : f32 to vector<16x128xf32>
    %179 = arith.maximumf %177, %178 : vector<16x128xf32>
    %c0_67 = arith.constant 0 : index
    %c0_68 = arith.constant 0 : index
    %180 = vector.load %arg10[%c0_67, %c0_68] : memref<1x16xbf16, #tpu.memory_space<vmem>>, vector<1x16xbf16>
    %181 = arith.truncf %179 : vector<16x128xf32> to vector<16x128xbf16>
    %cst_69 = arith.constant dense<0.000000e+00> : vector<1x128xf32>
    %182 = tpu.matmul %180, %181, %cst_69 {dimension_numbers = #tpu.dot_dimension_numbers<[1], [0], [0], [1], [0, 0, 1, 1], [], []>} : vector<1x16xbf16>, vector<16x128xbf16>, vector<1x128xf32> -> vector<1x128xf32>
    %c0_70 = arith.constant 0 : index
    %c0_71 = arith.constant 0 : index
    %183 = vector.load %arg11[%c0_70, %c0_71] : memref<1x1xf32, #tpu.memory_space<vmem>>, vector<1x1xf32>
    %184 = vector.broadcast %183 : vector<1x1xf32> to vector<1x128xf32>
    %185 = arith.addf %182, %184 : vector<1x128xf32>
    %cst_72 = arith.constant 0.000000e+00 : f32
    %186 = vector.broadcast %cst_72 : f32 to vector<1x128xf32>
    %187 = arith.subf %186, %185 : vector<1x128xf32>
    %188 = math.exp %187 : vector<1x128xf32>
    %cst_73 = arith.constant 1.000000e+00 : f32
    %189 = vector.broadcast %cst_73 : f32 to vector<1x128xf32>
    %190 = arith.addf %189, %188 : vector<1x128xf32>
    %191 = tpu.reciprocal %190 {approx = true} : vector<1x128xf32> -> vector<1x128xf32>
    %c0_74 = arith.constant 0 : index
    %c0_75 = arith.constant 0 : index
    %c0_76 = arith.constant 0 : index
    %192 = vector.load %arg12[%c0_74, %c0_75, %c0_76] : memref<1x1x128xf32, #tpu.memory_space<vmem>>, vector<1x1x128xf32>
    %193 = vector.shape_cast %192 : vector<1x1x128xf32> to vector<1x128xf32>
    %194 = vector.shape_cast %191 : vector<1x128xf32> to vector<1x1x128xf32>
    tpu.vector_store %arg12[%c0_74, %c0_75, %c0_76], %194 {strides = array<i32>} : memref<1x1x128xf32, #tpu.memory_space<vmem>>, vector<1x1x128xf32>,
    return
  }
  func.func @transform_0(%arg0: i32) -> (i32, i32, i32) {
    %c0_i32 = arith.constant 0 : i32
    %c0_i32_0 = arith.constant 0 : i32
    %c0_i32_1 = arith.constant 0 : i32
    return %arg0, %c0_i32, %c0_i32_0 : i32, i32, i32
  }
  func.func @transform_1(%arg0: i32) -> (i32, i32) {
    %c0_i32 = arith.constant 0 : i32
    %c0_i32_0 = arith.constant 0 : i32
    %c0_i32_1 = arith.constant 0 : i32
    return %c0_i32, %c0_i32_0 : i32, i32
  }
  func.func @transform_2(%arg0: i32) -> (i32, i32) {
    %c0_i32 = arith.constant 0 : i32
    %c0_i32_0 = arith.constant 0 : i32
    %c0_i32_1 = arith.constant 0 : i32
    return %c0_i32, %c0_i32_0 : i32, i32
  }
  func.func @transform_3(%arg0: i32) -> (i32, i32) {
    %c0_i32 = arith.constant 0 : i32
    %c0_i32_0 = arith.constant 0 : i32
    %c0_i32_1 = arith.constant 0 : i32
    return %c0_i32, %c0_i32_0 : i32, i32
  }
  func.func @transform_4(%arg0: i32) -> (i32, i32) {
    %c0_i32 = arith.constant 0 : i32
    %c0_i32_0 = arith.constant 0 : i32
    %c0_i32_1 = arith.constant 0 : i32
    return %c0_i32, %c0_i32_0 : i32, i32
  }
  func.func @transform_5(%arg0: i32) -> (i32, i32) {
    %c0_i32 = arith.constant 0 : i32
    %c0_i32_0 = arith.constant 0 : i32
    %c0_i32_1 = arith.constant 0 : i32
    return %c0_i32, %c0_i32_0 : i32, i32
  }
  func.func @transform_6(%arg0: i32) -> (i32, i32) {
    %c0_i32 = arith.constant 0 : i32
    %c0_i32_0 = arith.constant 0 : i32
    %c0_i32_1 = arith.constant 0 : i32
    return %c0_i32, %c0_i32_0 : i32, i32
  }
  func.func @transform_7(%arg0: i32) -> (i32, i32) {
    %c0_i32 = arith.constant 0 : i32
    %c0_i32_0 = arith.constant 0 : i32
    %c0_i32_1 = arith.constant 0 : i32
    return %c0_i32, %c0_i32_0 : i32, i32
  }
  func.func @transform_8(%arg0: i32) -> (i32, i32) {
    %c0_i32 = arith.constant 0 : i32
    %c0_i32_0 = arith.constant 0 : i32
    %c0_i32_1 = arith.constant 0 : i32
    return %c0_i32, %c0_i32_0 : i32, i32
  }
  func.func @transform_9(%arg0: i32) -> (i32, i32) {
    %c0_i32 = arith.constant 0 : i32
    %c0_i32_0 = arith.constant 0 : i32
    %c0_i32_1 = arith.constant 0 : i32
    return %c0_i32, %c0_i32_0 : i32, i32
  }
  func.func @transform_10(%arg0: i32) -> (i32, i32) {
    %c0_i32 = arith.constant 0 : i32
    %c0_i32_0 = arith.constant 0 : i32
    %c0_i32_1 = arith.constant 0 : i32
    return %c0_i32, %c0_i32_0 : i32, i32
  }
  func.func @transform_11(%arg0: i32) -> (i32, i32, i32) {
    %c0_i32 = arith.constant 0 : i32
    %c0_i32_0 = arith.constant 0 : i32
    %c0_i32_1 = arith.constant 0 : i32
    return %arg0, %c0_i32, %c0_i32_0 : i32, i32, i32
  }
}

</mosaic_0001>

<bundles_post_ra>
// kernel: tile.13
= control target key start
LH: loop header
LB: loop body
LE: loop exit
PB: predicated region body
PF: predicated region fallthrough
CT: control target
= control target key end

     0   :  { %s22_s0 = inlined_call_operand.vmem [shape: f32[8], index: 0, kind: input, shape index: {}]   ;;  %s23_s1 = inlined_call_operand.vmem [shape: f32[8,8], index: 1, kind: output, shape index: {}]  }
   0x1   :  { %v4_v0 = vld [vmem:[%s22_s0] ss:$0 sm:$0xff] }
   0x2   :  { %5 = vst [vmem:[%s23_s1] sm:$0xff] %v4_v0 }

// kernel: tile.0
= control target key start
LH: loop header
LB: loop body
LE: loop exit
PB: predicated region body
PF: predicated region fallthrough
CT: control target
= control target key end

     0   :  { %vm3_vm0 = vcmask 7168   ;;  %s84_s8 = smov 125   ;;  %s85_s13 = smov 126   ;;  %s167_s0 = inlined_call_operand.vmem [shape: f32[8,8], index: 0, kind: input, shape index: {}]   ;;  %s168_s1 = inlined_call_operand.vmem [shape: f32[64,1], index: 1, kind: output, shape index: {}]  }
   0x1   :  { %v6_v0 = vld [vmem:[%s167_s0] sm:$0xff]   ;;  %s83_s0 = smov 127   ;;  %s86_s14 = smov 124  }
   0x2   :  { %7 = vrot.lane.b32.xlu0 %v6_v0, %s83_s0  ;;  %23 = vrot.lane.b32.xlu1 %v6_v0, %s84_s8  ;;  %4 = vst.msk [vmem:[%s168_s1] ss:$8 sm:$0xf] %vm3_vm0, %v6_v0   ;;  %5 = vst.msk [vmem:[%s168_s1] ss:$8 sm:$0xf0] %vm3_vm0, %v6_v0  }
   0x3   :  { %s87_s15 = smov 123   ;;  %s88_s16 = smov 122  }
   0x4   :  { %s89_s17 = smov 121  }
   0x6   :  { %15 = vrot.lane.b32.xlu0 %v6_v0, %s85_s13  ;;  %31 = vrot.lane.b32.xlu1 %v6_v0, %s86_s14 }
   0xa   :  { %39 = vrot.lane.b32.xlu0 %v6_v0, %s87_s15  ;;  %47 = vrot.lane.b32.xlu1 %v6_v0, %s88_s16 }
   0xe   :  { %55 = vrot.lane.b32.xlu0 %v6_v0, %s89_s17 }
  0x74   :  { %v8_v1 = vpop.permute.xlu0 %7   ;;  %v24_v2 = vpop.permute.xlu1 %23  }
  0x75   :  { %62 = vst.msk [vmem:[%s168_s1 + $0x1] ss:$8 sm:$0xf] %vm3_vm0, %v8_v1   ;;  %63 = vst.msk [vmem:[%s168_s1 + $0x1] ss:$8 sm:$0xf0] %vm3_vm0, %v8_v1  }
  0x76   :  { %66 = vst.msk [vmem:[%s168_s1 + $0x3] ss:$8 sm:$0xf] %vm3_vm0, %v24_v2   ;;  %67 = vst.msk [vmem:[%s168_s1 + $0x3] ss:$8 sm:$0xf0] %vm3_vm0, %v24_v2  }
  0x78   :  { %v16_v3 = vpop.permute.xlu0 %15   ;;  %v32_v4 = vpop.permute.xlu1 %31  }
  0x79   :  { %64 = vst.msk [vmem:[%s168_s1 + $0x2] ss:$8 sm:$0xf] %vm3_vm0, %v16_v3   ;;  %65 = vst.msk [vmem:[%s168_s1 + $0x2] ss:$8 sm:$0xf0] %vm3_vm0, %v16_v3  }
  0x7a   :  { %68 = vst.msk [vmem:[%s168_s1 + $0x4] ss:$8 sm:$0xf] %vm3_vm0, %v32_v4   ;;  %69 = vst.msk [vmem:[%s168_s1 + $0x4] ss:$8 sm:$0xf0] %vm3_vm0, %v32_v4  }
  0x7c   :  { %v40_v5 = vpop.permute.xlu0 %39   ;;  %v48_v6 = vpop.permute.xlu1 %47  }
  0x7d   :  { %70 = vst.msk [vmem:[%s168_s1 + $0x5] ss:$8 sm:$0xf] %vm3_vm0, %v40_v5   ;;  %71 = vst.msk [vmem:[%s168_s1 + $0x5] ss:$8 sm:$0xf0] %vm3_vm0, %v40_v5  }
  0x7e   :  { %72 = vst.msk [vmem:[%s168_s1 + $0x6] ss:$8 sm:$0xf] %vm3_vm0, %v48_v6   ;;  %73 = vst.msk [vmem:[%s168_s1 + $0x6] ss:$8 sm:$0xf0] %vm3_vm0, %v48_v6  }
  0x80   :  { %v56_v7 = vpop.permute.xlu0 %55  }
  0x81   :  { %74 = vst.msk [vmem:[%s168_s1 + $0x7] ss:$8 sm:$0xf] %vm3_vm0, %v56_v7   ;;  %75 = vst.msk [vmem:[%s168_s1 + $0x7] ss:$8 sm:$0xf0] %vm3_vm0, %v56_v7  }

// kernel: tile.18
= control target key start
LH: loop header
LB: loop body
LE: loop exit
PB: predicated region body
PF: predicated region fallthrough
CT: control target
= control target key end

     0   :  { %s22_s0 = inlined_call_operand.vmem [shape: f32[16], index: 0, kind: input, shape index: {}]   ;;  %s23_s1 = inlined_call_operand.vmem [shape: f32[3,16], index: 1, kind: output, shape index: {}]  }
   0x1   :  { %v4_v0 = vld [vmem:[%s22_s0] ss:$0 sm:$0xff] }
   0x2   :  { %5 = vst [vmem:[%s23_s1] sm:$0xf] %v4_v0 }

// kernel: tile.1
= control target key start
LH: loop header
LB: loop body
LE: loop exit
PB: predicated region body
PF: predicated region fallthrough
CT: control target
= control target key end

     0   :  { %s179_s8 = smov 125   ;;  %s180_s9 = smov 126   ;;  %vm8_vm0 = vcmask 7168   ;;  %s334_s0 = inlined_call_operand.vmem [shape: f32[3,16], index: 0, kind: input, shape index: {}]   ;;  %s335_s1 = inlined_call_operand.vmem [shape: f32[48,1], index: 1, kind: output, shape index: {}]  }
   0x1   :  { %v5_v0 = vld [vmem:[%s334_s0] sm:$0xf]  ;;  %s178_s0 = smov 127   ;;  %s181_s10 = smov 124  }
   0x2   :  { %6 = vst [vmem:[#allocation0] sm:$0xf] %v5_v0  ;;  %s182_s11 = smov 123   ;;  %s183_s12 = smov 122  }
   0x3   :  { %s184_s13 = smov 121   ;;  %s185_s14 = smov 120  }
   0x4   :  { %s186_s19 = smov 119   ;;  %s187_s20 = smov 118  }
   0x5   :  { %s188_s21 = smov 117   ;;  %s189_s22 = smov 116  }
   0x6   :  { %s190_s23 = smov 115   ;;  %s191_s24 = smov 114  }
   0x7   :  { %s192_s25 = smov 113  }
   0x9   :  { %v12_v1 = vld [vmem:[#allocation0] sm:$0x7]  }
   0xa   :  { %v28_v2 = vld [vmem:[#allocation0] sm:$0x7]   ;;  %13 = vrot.lane.b32.xlu0 %v12_v1, %s178_s0 }
   0xb   :  { %29 = vrot.lane.b32.xlu1 %v28_v2, %s179_s8  ;;  %v20_v3 = vld [vmem:[#allocation0] sm:$0x7]  }
   0xc   :  { %v36_v4 = vld [vmem:[#allocation0] sm:$0x7]  }
   0xd   :  { %v44_v5 = vld [vmem:[#allocation0] sm:$0x7]  }
   0xe   :  { %21 = vrot.lane.b32.xlu0 %v20_v3, %s180_s9  ;;  %v52_v6 = vld [vmem:[#allocation0] sm:$0x7]  }
   0xf   :  { %37 = vrot.lane.b32.xlu1 %v36_v4, %s181_s10  ;;  %v60_v7 = vld [vmem:[#allocation0] sm:$0x7]  }
  0x10   :  { %v68_v8 = vld [vmem:[#allocation0] sm:$0x7]  }
  0x11   :  { %v76_v9 = vld [vmem:[#allocation0] sm:$0x7]  }
  0x12   :  { %45 = vrot.lane.b32.xlu0 %v44_v5, %s182_s11  ;;  %v84_v10 = vld [vmem:[#allocation0] sm:$0x7]  }
  0x13   :  { %53 = vrot.lane.b32.xlu1 %v52_v6, %s183_s12  ;;  %v7_v11 = vld [vmem:[#allocation0] sm:$0x7]  }
  0x14   :  { %9 = vst.msk [vmem:[%s335_s1] ss:$16 sm:$0x3] %vm8_vm0, %v7_v11   ;;  %132 = vst.msk [vmem:[%s335_s1 + $0x1e] sm:$0x4] %vm8_vm0, %v7_v11  }
  0x15   :  { %v92_v12 = vld [vmem:[#allocation0] sm:$0x7]  }
  0x16   :  { %61 = vrot.lane.b32.xlu0 %v60_v7, %s184_s13  ;;  %v100_v13 = vld [vmem:[#allocation0] sm:$0x7]  }
  0x17   :  { %69 = vrot.lane.b32.xlu1 %v68_v8, %s185_s14  ;;  %v108_v14 = vld [vmem:[#allocation0] sm:$0x7]  }
  0x18   :  { %v116_v15 = vld [vmem:[#allocation0] sm:$0x7]  }
  0x19   :  { %v124_v16 = vld [vmem:[#allocation0] sm:$0x7]  }
  0x1a   :  { %77 = vrot.lane.b32.xlu0 %v76_v9, %s186_s19 }
  0x1b   :  { %85 = vrot.lane.b32.xlu1 %v84_v10, %s187_s20 }
  0x1e   :  { %93 = vrot.lane.b32.xlu0 %v92_v12, %s188_s21 }
  0x1f   :  { %101 = vrot.lane.b32.xlu1 %v100_v13, %s189_s22 }
  0x22   :  { %109 = vrot.lane.b32.xlu0 %v108_v14, %s190_s23 }
  0x23   :  { %117 = vrot.lane.b32.xlu1 %v116_v15, %s191_s24 }
  0x26   :  { %125 = vrot.lane.b32.xlu0 %v124_v16, %s192_s25 }
  0x7c   :  { %v14_v17 = vpop.permute.xlu0 %13  }
  0x7d   :  { %v30_v18 = vpop.permute.xlu1 %29   ;;  %133 = vst.msk [vmem:[%s335_s1 + $0x1] ss:$16 sm:$0x3] %vm8_vm0, %v14_v17   ;;  %134 = vst.msk [vmem:[%s335_s1 + $0x1f] sm:$0x4] %vm8_vm0, %v14_v17  }
  0x7e   :  { %137 = vst.msk [vmem:[%s335_s1 + $0x3] ss:$16 sm:$0x3] %vm8_vm0, %v30_v18   ;;  %138 = vst.msk [vmem:[%s335_s1 + $0x21] sm:$0x4] %vm8_vm0, %v30_v18  }
  0x80   :  { %v22_v19 = vpop.permute.xlu0 %21  }
  0x81   :  { %v38_v20 = vpop.permute.xlu1 %37   ;;  %135 = vst.msk [vmem:[%s335_s1 + $0x2] ss:$16 sm:$0x3] %vm8_vm0, %v22_v19   ;;  %136 = vst.msk [vmem:[%s335_s1 + $0x20] sm:$0x4] %vm8_vm0, %v22_v19  }
  0x82   :  { %139 = vst.msk [vmem:[%s335_s1 + $0x4] ss:$16 sm:$0x3] %vm8_vm0, %v38_v20   ;;  %140 = vst.msk [vmem:[%s335_s1 + $0x22] sm:$0x4] %vm8_vm0, %v38_v20  }
  0x84   :  { %v46_v21 = vpop.permute.xlu0 %45  }
  0x85   :  { %v54_v22 = vpop.permute.xlu1 %53   ;;  %141 = vst.msk [vmem:[%s335_s1 + $0x5] ss:$16 sm:$0x3] %vm8_vm0, %v46_v21   ;;  %142 = vst.msk [vmem:[%s335_s1 + $0x23] sm:$0x4] %vm8_vm0, %v46_v21  }
  0x86   :  { %143 = vst.msk [vmem:[%s335_s1 + $0x6] ss:$16 sm:$0x3] %vm8_vm0, %v54_v22   ;;  %144 = vst.msk [vmem:[%s335_s1 + $0x24] sm:$0x4] %vm8_vm0, %v54_v22  }
  0x88   :  { %v62_v23 = vpop.permute.xlu0 %61  }
  0x89   :  { %v70_v24 = vpop.permute.xlu1 %69   ;;  %145 = vst.msk [vmem:[%s335_s1 + $0x7] ss:$16 sm:$0x3] %vm8_vm0, %v62_v23   ;;  %146 = vst.msk [vmem:[%s335_s1 + $0x25] sm:$0x4] %vm8_vm0, %v62_v23  }
  0x8a   :  { %147 = vst.msk [vmem:[%s335_s1 + $0x8] ss:$16 sm:$0x3] %vm8_vm0, %v70_v24   ;;  %148 = vst.msk [vmem:[%s335_s1 + $0x26] sm:$0x4] %vm8_vm0, %v70_v24  }
  0x8c   :  { %v78_v25 = vpop.permute.xlu0 %77  }
  0x8d   :  { %v86_v26 = vpop.permute.xlu1 %85   ;;  %149 = vst.msk [vmem:[%s335_s1 + $0x9] ss:$16 sm:$0x3] %vm8_vm0, %v78_v25   ;;  %150 = vst.msk [vmem:[%s335_s1 + $0x27] sm:$0x4] %vm8_vm0, %v78_v25  }
  0x8e   :  { %151 = vst.msk [vmem:[%s335_s1 + $0xa] ss:$16 sm:$0x3] %vm8_vm0, %v86_v26   ;;  %152 = vst.msk [vmem:[%s335_s1 + $0x28] sm:$0x4] %vm8_vm0, %v86_v26  }
  0x90   :  { %v94_v27 = vpop.permute.xlu0 %93  }
  0x91   :  { %v102_v28 = vpop.permute.xlu1 %101   ;;  %153 = vst.msk [vmem:[%s335_s1 + $0xb] ss:$16 sm:$0x3] %vm8_vm0, %v94_v27   ;;  %154 = vst.msk [vmem:[%s335_s1 + $0x29] sm:$0x4] %vm8_vm0, %v94_v27  }
  0x92   :  { %155 = vst.msk [vmem:[%s335_s1 + $0xc] ss:$16 sm:$0x3] %vm8_vm0, %v102_v28   ;;  %156 = vst.msk [vmem:[%s335_s1 + $0x2a] sm:$0x4] %vm8_vm0, %v102_v28  }
  0x94   :  { %v110_v29 = vpop.permute.xlu0 %109  }
  0x95   :  { %v118_v30 = vpop.permute.xlu1 %117   ;;  %157 = vst.msk [vmem:[%s335_s1 + $0xd] ss:$16 sm:$0x3] %vm8_vm0, %v110_v29   ;;  %158 = vst.msk [vmem:[%s335_s1 + $0x2b] sm:$0x4] %vm8_vm0, %v110_v29  }
  0x96   :  { %159 = vst.msk [vmem:[%s335_s1 + $0xe] ss:$16 sm:$0x3] %vm8_vm0, %v118_v30   ;;  %160 = vst.msk [vmem:[%s335_s1 + $0x2c] sm:$0x4] %vm8_vm0, %v118_v30  }
  0x98   :  { %v126_v31 = vpop.permute.xlu0 %125  }
  0x99   :  { %161 = vst.msk [vmem:[%s335_s1 + $0xf] ss:$16 sm:$0x3] %vm8_vm0, %v126_v31   ;;  %162 = vst.msk [vmem:[%s335_s1 + $0x2d] sm:$0x4] %vm8_vm0, %v126_v31  }

// kernel: cnn_forward.1
= control target key start
LH: loop header
LB: loop body
LE: loop exit
PB: predicated region body
PF: predicated region fallthrough
CT: control target
= control target key end

     0   :  { %s8381_s0 = inlined_call_operand.vmem [shape: bf16[2,1008,128], index: 0, kind: input, shape index: {}]   ;;  %s8382_s1 = inlined_call_operand.vmem [shape: bf16[256,224], index: 1, kind: input, shape index: {}]   ;;  %s8383_s2 = inlined_call_operand.vmem [shape: bf16[192,256], index: 2, kind: input, shape index: {}]   ;;  %s8384_s3 = inlined_call_operand.vmem [shape: bf16[32,144], index: 3, kind: input, shape index: {}]   ;;  %s8385_s4 = inlined_call_operand.vmem [shape: f32[64,1], index: 4, kind: input, shape index: {}]   ;;  %s8386_s5 = inlined_call_operand.vmem [shape: f32[48,1], index: 5, kind: input, shape index: {}]   ;;  %s8387_s6 = inlined_call_operand.vmem [shape: f32[32,1], index: 6, kind: input, shape index: {}]   ;;  %s8388_s7 = inlined_call_operand.vmem [shape: bf16[16,32], index: 7, kind: input, shape index: {}]   ;;  %s8389_s8 = inlined_call_operand.vmem [shape: f32[16,1], index: 8, kind: input, shape index: {}]   ;;  %s8390_s9 = inlined_call_operand.vmem [shape: bf16[1,16], index: 9, kind: input, shape index: {}]   ;;  %s8391_s10 = inlined_call_operand.<no memory space> [shape: f32[1,1], index: 10, kind: input, shape index: {}]   ;;  %s8392_s11 = inlined_call_operand.hbm [shape: f32[2,1,128], index: 11, kind: output, shape index: {}]  }
   0x1   :  { %v16_v0 = vstv %s8391_s10 }
   0x2   :  { %17 = vst [vmem:[#allocation4] sm:$0x1] %v16_v0 }
   0x3   :  { %18 = vsyncpa [#allocation6], 0 }
   0x4   :  { %20 = vsyncpa [#allocation6 + $0x1], 0  ;;  %s6474_s19 = smov 0   ;;  %s6476_s20 = smov 0  }
   0x5   :  { %s6478_s21 = smov 0   ;;  %s6480_s22 = smov 0  }
   0x6 LB: > { %s6495_s10 = sadd.s32 4294967295, %s6405_s22   ;;  %s4904_s23 = sadd.s32 4294967294, %s6405_s22   ;;  %s6405_s22 = sphi %s6480_s22, %s8499_s22   ;;  %s6401_s21 = sphi %s6478_s21, %s8498_s21   ;;  %s6397_s20 = sphi %s6476_s20, %s8497_s20   ;;  %s6393_s19 = sphi %s6474_s19, %s8496_s19  }
   0x7   : > { %s6499_s24 = sadd.s32 1, %s6405_s22   ;;  %s269_s25 = sadd.s32 1, %s6401_s21 }
   0x8   : > { %s266_s26 = ssub.s32 %s6405_s22, %s6499_s24  ;;  %p279_p0 = scmp.ne.s32.totalorder %s6401_s21, %s6397_s20 }
   0x9   : > { %p267_p1 = scmp.eq.s32.totalorder %s266_s26, 0  ;;  %p280_p2 = scmp.eq.s32.totalorder %s6495_s10, 1 }
   0xa   : > { %p285_p3 = scmp.ne.s32.totalorder %s6397_s20, %s6393_s19  ;;  %p286_p4 = scmp.eq.s32.totalorder %s4904_s23, 1 }
   0xb   : > { %s6510_s27 = scalar_select %p267_p1, %s6401_s21, %s269_s25  }
   0xc   : > { %p6512_p5 = por %p280_p2, %p279_p0  ;;  %p6516_p6 = por %p286_p4, %p285_p3 }
   0xd   : > { %p4907_p7 = scmp.ge.s32.totalorder %s6405_s22, 1  ;;  %p342_p8 = scmp.lt.s32.totalorder %s6405_s22, 3 }
   0xf   : > { %p343_p9 = pnand %p4907_p7, %p342_p8 }
  0x11   : > { %346 = sbr.rel (%p343_p9) target bundleno = 1822 (0x71e), region = 64 }
  0x16   : > { %p381_p10 = scmp.lt.s32.totalorder %s6495_s10, 1  ;;  %v6054_v1 = vld [vmem:[%s8382_s1 + $0x4] ss:$8 sps:$4 sm:$0xff]   ;;  %v8393_v2 = vmov 0   ;;  %vm713_vm0 = vcmask 785408   ;;  %v449_v45 = vld [vmem:[%s8385_s4 + $0x30] sm:$0xff] }
  0x17   : > { %762 = vmatprep.subr.bf16.mxu0 %v8393_v2  ;;  %1147 = vmatprep.subr.bf16.mxu1 %v8393_v2  ;;  %v6595_v31 = vld [vmem:[%s8382_s1] ss:$8 sps:$4 sm:$0xff]   ;;  %v6600_v32 = vld [vmem:[%s8382_s1 + $0x14] ss:$8 sps:$4 sm:$0xff]   ;;  %v6618_v37 = vld [vmem:[%s8382_s1 + $0x10] ss:$8 sps:$4 sm:$0xff]  }
  0x18   : > { %s382_s13 = scalar_select %p381_p10, %s6495_s10, 1  ;;  %4955 = vmatprep.mubr.msk.bf16.mxu0 %vm713_vm0, %v6054_v1  ;;  %4993 = vmatprep.mubr.msk.bf16.mxu1 %vm713_vm0, %v6054_v1  ;;  %v6624_v38 = vld [vmem:[%s8382_s1 + $0x24] ss:$8 sps:$4 sm:$0xff]   ;;  %v6642_v43 = vld [vmem:[%s8382_s1 + $0x20] ss:$8 sps:$4 sm:$0xff]   ;;  %v450_v50 = vld [vmem:[%s8385_s4 + $0x38] sm:$0xff] }
  0x19   : > { %6024 = vset.pattern.permute.xlu0 %v8393_v2  ;;  %6025 = vset.pattern.permute.xlu1 %v8393_v2  ;;  %v6648_v44 = vld [vmem:[%s8382_s1 + $0x34] ss:$8 sps:$4 sm:$0xff]   ;;  %v447_v51 = vld [vmem:[%s8385_s4 + $0x20] sm:$0xff]  ;;  %v6674_v52 = vld [vmem:[%s8382_s1 + $0x30] ss:$8 sps:$4 sm:$0xff]   ;;  %vm4651_vm1 = vcmask 130048  }
  0x1a   : > { %s5981_s14 = smul.u32 504, %s382_s13  ;;  %979 = vperm.xlu0 %6024, %v449_v45   ;;  %v6679_v53 = vld [vmem:[%s8382_s1 + $0x44] ss:$8 sps:$4 sm:$0xff]   ;;  %969 = vperm.xlu1 %6025, %v447_v51   ;;  %v445_v56 = vld [vmem:[%s8385_s4 + $0x10] sm:$0xff]  ;;  %v6704_v60 = vld [vmem:[%s8382_s1 + $0x40] ss:$8 sps:$4 sm:$0xff]  }
  0x1b   : > { %v448_v58 = vld [vmem:[%s8385_s4 + $0x28] sm:$0xff]  ;;  %v6709_v61 = vld [vmem:[%s8382_s1 + $0x54] ss:$8 sps:$4 sm:$0xff]   ;;  %v443_v0 = vld [vmem:[%s8385_s4] sm:$0xff]  ;;  %vm6409_vm2 = vmmov 0   ;;  %vm4728_vm3 = vcmask 261120  }
  0x1c   : > { %s6536_s17 = scalar_lea.vmem %s8381_s0, %s5981_s14  ;;  %s379_s14 = sand.u32 1, %s6397_s20  }
  0x1d   : > { %v6026_v3 = vld [vmem:[%s6536_s17 + $0x38] sm:$0xff]   ;;  %v6027_v4 = vld [vmem:[%s6536_s17 + $0x70] sm:$0xff]   ;;  %v6029_v6 = vld [vmem:[%s6536_s17 + $0x68] sm:$0xff]   ;;  %s380_s15 = scalar_lea.vmem [#allocation5], %s379_s14  ;;  %s4837_s26 = scalar_lea.sflag [#allocation6], %s379_s14 }
  0x1e   : > { %763 = vmatpush1.bf16.msra.mxu0 %v6026_v3  ;;  %v6028_v5 = vld [vmem:[%s6536_s17 + $0x30] sm:$0xff]   ;;  %1148 = vmatpush1.bf16.msra.mxu1 %v6027_v4  ;;  %v6030_v7 = vld [vmem:[%s6536_s17 + $0x28] sm:$0xff]   ;;  %v6031_v8 = vld [vmem:[%s6536_s17 + $0x60] sm:$0xff]   ;;  %s4849_s16 = sshll.u32 %s380_s15, 4  ;;  %s6410_s12 = smov [#allocation5]   ;;  %s4850_s16 = int_to_ptr.vmem [resolvable:$true] %s4849_s16 }
  0x1f   : > { %764 = vmatprep.subr.bf16.mxu0 %v8393_v2  ;;  %1149 = vmatprep.subr.bf16.mxu1 %v8393_v2  ;;  %v6032_v9 = vld [vmem:[%s6536_s17 + $0x20] sm:$0xff]   ;;  %v6033_v10 = vld [vmem:[%s6536_s17 + $0x58] sm:$0xff]   ;;  %v6035_v12 = vld [vmem:[%s6536_s17 + $0x50] sm:$0xff]   ;;  %s6345_s30 = scalar_lea.vmem %s4850_s16, 16  ;;  %s6349_s13 = sshll.u32 %s6410_s12, 4  ;;  %s6350_s13 = int_to_ptr.vmem [resolvable:$false] %s6349_s13 }
  0x20   : > { %v6034_v11 = vld [vmem:[%s6536_s17 + $0x18] sm:$0xff]   ;;  %v6036_v13 = vld [vmem:[%s6536_s17 + $0x10] sm:$0xff]   ;;  %v6037_v14 = vld [vmem:[%s6536_s17 + $0x48] sm:$0xff]   ;;  %984 = vperm.xlu0 %6024, %v450_v50   ;;  %974 = vperm.xlu1 %6025, %v448_v58   ;;  %p6346_p11 = scmp.ne.s32.totalorder %s4850_s16, %s6345_s30  ;;  %p6352_p0 = scmp.lt.s32.totalorder %s4850_s16, %s6350_s13 }
  0x21   : > { %v6038_v15 = vld [vmem:[%s6536_s17 + $0x8] sm:$0xff]   ;;  %v6039_v16 = vld [vmem:[%s6536_s17 + $0x40] sm:$0xff]   ;;  %v6041_v18 = vld [vmem:[%s6536_s17 + $0x38] sm:$0xff]  }
  0x22   : > { %765 = vmatpush1.bf16.msra.mxu0 %v6028_v5  ;;  %1150 = vmatpush1.bf16.msra.mxu1 %v6029_v6  ;;  %v6040_v17 = vld [vmem:[%s6536_s17] sm:$0xff]   ;;  %v6042_v19 = vld [vmem:[%s6536_s17 + $0x68] sm:$0xff]   ;;  %v6045_v22 = vld [vmem:[%s6536_s17 + $0x98] sm:$0xff]   ;;  %p6347_p12 = pnand %p6346_p11, %p6512_p5 }
  0x23   : > { %766 = vmatprep.subr.bf16.mxu0 %v8393_v2  ;;  %1151 = vmatprep.subr.bf16.mxu1 %v8393_v2  ;;  %v6043_v20 = vld [vmem:[%s6536_s17 + $0xa0] sm:$0xff]   ;;  %v6046_v23 = vld [vmem:[%s6536_s17 + $0x58] sm:$0xff]   ;;  %v6047_v24 = vld [vmem:[%s6536_s17 + $0x90] sm:$0xff]  }
  0x24   : > { %v6044_v21 = vld [vmem:[%s6536_s17 + $0x60] sm:$0xff]   ;;  %v6048_v25 = vld [vmem:[%s6536_s17 + $0x50] sm:$0xff]   ;;  %v6049_v26 = vld [vmem:[%s6536_s17 + $0x88] sm:$0xff]   ;;  %959 = vperm.xlu0 %6024, %v445_v56   ;;  %p6348_p13 = pneg %p6347_p12 }
  0x25   : > { %v6050_v27 = vld [vmem:[%s6536_s17 + $0x48] sm:$0xff]   ;;  %v6051_v28 = vld [vmem:[%s6536_s17 + $0x80] sm:$0xff]   ;;  %v6053_v30 = vld [vmem:[%s6536_s17 + $0x78] sm:$0xff]  }
  0x26   : > { %767 = vmatpush1.bf16.msra.mxu0 %v6030_v7  ;;  %1152 = vmatpush1.bf16.msra.mxu1 %v6031_v8  ;;  %v6052_v29 = vld [vmem:[%s6536_s17 + $0x40] sm:$0xff]   ;;  %v6086_v34 = vld [vmem:[%s6536_s17 + $0xa8] sm:$0xff]   ;;  %v6084_v35 = vld [vmem:[%s6536_s17 + $0xd8] sm:$0xff]  }
  0x27   : > { %768 = vmatprep.subr.bf16.mxu0 %v8393_v2  ;;  %1153 = vmatprep.subr.bf16.mxu1 %v8393_v2  ;;  %v6078_v33 = vld [vmem:[%s6536_s17 + $0xe0] sm:$0xff]   ;;  %v6091_v39 = vld [vmem:[%s6536_s17 + $0xd0] sm:$0xff]   ;;  %v6092_v40 = vld [vmem:[%s6536_s17 + $0x98] sm:$0xff]  }
  0x28   : > { %v6087_v36 = vld [vmem:[%s6536_s17 + $0xa0] sm:$0xff]   ;;  %v6094_v41 = vld [vmem:[%s6536_s17 + $0xc8] sm:$0xff]   ;;  %v6093_v42 = vld [vmem:[%s6536_s17 + $0x90] sm:$0xff]   ;;  %949 = vperm.xlu0 %6024, %v443_v0  }
  0x29   : > { %v6099_v46 = vld [vmem:[%s6536_s17 + $0xc0] sm:$0xff]   ;;  %v6098_v47 = vld [vmem:[%s6536_s17 + $0x88] sm:$0xff]   ;;  %v6101_v48 = vld [vmem:[%s6536_s17 + $0xb8] sm:$0xff]  }
  0x2a   : > { %769 = vmatpush1.bf16.msra.mxu0 %v6032_v9  ;;  %1154 = vmatpush1.bf16.msra.mxu1 %v6033_v10  ;;  %v6100_v49 = vld [vmem:[%s6536_s17 + $0x80] sm:$0xff]   ;;  %v6106_v54 = vld [vmem:[%s6536_s17 + $0xb0] sm:$0xff]   ;;  %v6105_v55 = vld [vmem:[%s6536_s17 + $0x78] sm:$0xff]  }
  0x2b   : > { %770 = vmatprep.subr.bf16.mxu0 %v8393_v2  ;;  %1155 = vmatprep.subr.bf16.mxu1 %v8393_v2  ;;  %v6108_v57 = vld [vmem:[%s6536_s17 + $0xa8] sm:$0xff]   ;;  %v6107_v59 = vld [vmem:[%s6536_s17 + $0x70] sm:$0xff]   ;;  %v6112_v63 = vld [vmem:[%s6536_s17 + $0xd8] sm:$0xff]  }
  0x2c   : > { %v6113_v62 = vld [vmem:[%s6536_s17 + $0x110] sm:$0xff]   ;;  %v6115_v1 = vld [vmem:[%s6536_s17 + $0x108] sm:$0xff]   ;;  %v446_v3 = vld [vmem:[%s8385_s4 + $0x18] sm:$0xff] }
  0x2d   : > { %v6114_v4 = vld [vmem:[%s6536_s17 + $0xd0] sm:$0xff]   ;;  %v6739_v6 = vld [vmem:[%s8382_s1 + $0x64] ss:$8 sps:$4 sm:$0xff]   ;;  %964 = vperm.xlu1 %6025, %v446_v3   ;;  %v6122_v10 = vld [vmem:[%s6536_s17 + $0xf8] sm:$0xff]  }
  0x2e   : > { %771 = vmatpush1.bf16.msra.mxu0 %v6034_v11  ;;  %1156 = vmatpush1.bf16.msra.mxu1 %v6035_v12  ;;  %v6734_v5 = vld [vmem:[%s8382_s1 + $0x50] ss:$8 sps:$4 sm:$0xff]   ;;  %v6120_v7 = vld [vmem:[%s6536_s17 + $0x100] sm:$0xff]   ;;  %v6119_v8 = vld [vmem:[%s6536_s17 + $0xc8] sm:$0xff]  }
  0x2f   : > { %772 = vmatprep.subr.bf16.mxu0 %v8393_v2  ;;  %1157 = vmatprep.subr.bf16.mxu1 %v8393_v2  ;;  %v444_v9 = vld [vmem:[%s8385_s4 + $0x8] sm:$0xff]  ;;  %v6121_v11 = vld [vmem:[%s6536_s17 + $0xc0] sm:$0xff]   ;;  %v6133_v45 = vld [vmem:[%s6536_s17 + $0x110] sm:$0xff]  }
  0x30   : > { %v6761_v12 = vld [vmem:[%s8382_s1 + $0x60] ss:$8 sps:$4 sm:$0xff]   ;;  %v6151_v56 = vld [vmem:[%s6536_s17 + $0x170] sm:$0xff]  }
  0x31   : > { %954 = vperm.xlu1 %6025, %v444_v9   ;;  %v6143_v50 = vld [vmem:[%s6536_s17 + $0x120] sm:$0xff]   ;;  %v6153_v58 = vld [vmem:[%s6536_s17 + $0x168] sm:$0xff]  }
  0x32   : > { %773 = vmatpush1.bf16.msra.mxu0 %v6036_v13  ;;  %1158 = vmatpush1.bf16.msra.mxu1 %v6037_v14  ;;  %v6766_v13 = vld [vmem:[%s8382_s1 + $0x74] ss:$8 sps:$4 sm:$0xff]   ;;  %v6144_v51 = vld [vmem:[%s6536_s17 + $0xe0] sm:$0xff]  }
  0x33   : > { %774 = vmatprep.subr.bf16.mxu0 %v8393_v2  ;;  %1159 = vmatprep.subr.bf16.mxu1 %v8393_v2  ;;  %v6127_v14 = vld [vmem:[%s6536_s17 + $0xf0] sm:$0xff]  }
  0x36   : > { %775 = vmatpush1.bf16.msra.mxu0 %v6038_v15  ;;  %1160 = vmatpush1.bf16.msra.mxu1 %v6039_v16  ;;  %v6126_v15 = vld [vmem:[%s6536_s17 + $0xb8] sm:$0xff]   ;;  %v6129_v16 = vld [vmem:[%s6536_s17 + $0xe8] sm:$0xff]  }
  0x37   : > { %776 = vmatprep.subr.bf16.mxu0 %v8393_v2  ;;  %1161 = vmatprep.subr.bf16.mxu1 %v8393_v2 }
  0x3a   : > { %777 = vmatpush1.bf16.msra.mxu0 %v6040_v17  ;;  %1162 = vmatpush1.bf16.msra.mxu1 %v6041_v18  ;;  %v6128_v17 = vld [vmem:[%s6536_s17 + $0xb0] sm:$0xff]  }
  0x3b   : > { %782 = vmatprep.subr.bf16.mxu0 %v8393_v2  ;;  %1167 = vmatprep.subr.bf16.mxu1 %v8393_v2  ;;  %v6785_v18 = vld [vmem:[%s8382_s1 + $0x70] ss:$8 sps:$4 sm:$0xff]  }
  0x3e   : > { %783 = vmatpush2.bf16.msra.mxu0 %v6042_v19  ;;  %1168 = vmatpush2.bf16.msra.mxu1 %v6043_v20  ;;  %v6790_v19 = vld [vmem:[%s8382_s1 + $0x84] ss:$8 sps:$4 sm:$0xff]   ;;  %v6805_v20 = vld [vmem:[%s8382_s1 + $0x80] ss:$8 sps:$4 sm:$0xff]  }
  0x3f   : > { %784 = vmatprep.subr.bf16.mxu0 %v8393_v2  ;;  %1169 = vmatprep.subr.bf16.mxu1 %v8393_v2 }
  0x42   : > { %785 = vmatpush2.bf16.msra.mxu0 %v6044_v21  ;;  %1170 = vmatpush2.bf16.msra.mxu1 %v6045_v22  ;;  %v6810_v21 = vld [vmem:[%s8382_s1 + $0x94] ss:$8 sps:$4 sm:$0xff]   ;;  %v6821_v22 = vld [vmem:[%s8382_s1 + $0x90] ss:$8 sps:$4 sm:$0xff]  }
  0x43   : > { %786 = vmatprep.subr.bf16.mxu0 %v8393_v2  ;;  %1171 = vmatprep.subr.bf16.mxu1 %v8393_v2 }
  0x46   : > { %787 = vmatpush2.bf16.msra.mxu0 %v6046_v23  ;;  %1172 = vmatpush2.bf16.msra.mxu1 %v6047_v24  ;;  %v6826_v23 = vld [vmem:[%s8382_s1 + $0xa4] ss:$8 sps:$4 sm:$0xff]   ;;  %v6837_v24 = vld [vmem:[%s8382_s1 + $0xa0] ss:$8 sps:$4 sm:$0xff]  }
  0x47   : > { %788 = vmatprep.subr.bf16.mxu0 %v8393_v2  ;;  %1173 = vmatprep.subr.bf16.mxu1 %v8393_v2 }
  0x4a   : > { %789 = vmatpush2.bf16.msra.mxu0 %v6048_v25  ;;  %1174 = vmatpush2.bf16.msra.mxu1 %v6049_v26  ;;  %v6842_v25 = vld [vmem:[%s8382_s1 + $0xb4] ss:$8 sps:$4 sm:$0xff]   ;;  %v6853_v26 = vld [vmem:[%s8382_s1 + $0xb0] ss:$8 sps:$4 sm:$0xff]  }
  0x4b   : > { %790 = vmatprep.subr.bf16.mxu0 %v8393_v2  ;;  %1175 = vmatprep.subr.bf16.mxu1 %v8393_v2 }
  0x4e   : > { %791 = vmatpush2.bf16.msra.mxu0 %v6050_v27  ;;  %1176 = vmatpush2.bf16.msra.mxu1 %v6051_v28  ;;  %v6858_v27 = vld [vmem:[%s8382_s1 + $0xc4] ss:$8 sps:$4 sm:$0xff]   ;;  %v6869_v28 = vld [vmem:[%s8382_s1 + $0xc0] ss:$8 sps:$4 sm:$0xff]  }
  0x4f   : > { %792 = vmatprep.subr.bf16.mxu0 %v8393_v2  ;;  %1177 = vmatprep.subr.bf16.mxu1 %v8393_v2 }
  0x52   : > { %793 = vmatpush2.bf16.msra.mxu0 %v6052_v29  ;;  %1178 = vmatpush2.bf16.msra.mxu1 %v6053_v30  ;;  %v6874_v29 = vld [vmem:[%s8382_s1 + $0xd4] ss:$8 sps:$4 sm:$0xff]   ;;  %v6885_v30 = vld [vmem:[%s8382_s1 + $0xd0] ss:$8 sps:$4 sm:$0xff]  }
  0x53   : > { %1492 = vmatprep.subr.bf16.mxu0 %v8393_v2  ;;  %1837 = vmatprep.subr.bf16.mxu1 %v8393_v2 }
  0x55   : > { %795 = vmatmul.mubr.bf16.vlgmr.msra.gmra.mxu0 %v6595_v31  ;;  %1180 = vmatmul.mubr.bf16.vlgmr.msra.gmra.mxu1 %v6595_v31 }
  0x56   : > { %4956 = vmatprep.mubr.msk.bf16.mxu0 %vm713_vm0, %v6600_v32  ;;  %4994 = vmatprep.mubr.msk.bf16.mxu1 %vm713_vm0, %v6600_v32 }
  0x57   : > { %1838 = vmatpush1.bf16.msra.mxu1 %v6078_v33  ;;  %1493 = vmatpush1.bf16.msra.mxu0 %v6086_v34  ;;  %v6890_v33 = vld [vmem:[%s8382_s1 + $0xe4] ss:$8 sps:$4 sm:$0xff]   ;;  %v6901_v34 = vld [vmem:[%s8382_s1 + $0xe0] ss:$8 sps:$4 sm:$0xff]  }
  0x58   : > { %1839 = vmatprep.subr.bf16.mxu1 %v8393_v2  ;;  %1494 = vmatprep.subr.bf16.mxu0 %v8393_v2 }
  0x5b   : > { %1840 = vmatpush1.bf16.msra.mxu1 %v6084_v35  ;;  %1495 = vmatpush1.bf16.msra.mxu0 %v6087_v36  ;;  %v6906_v35 = vld [vmem:[%s8382_s1 + $0xf4] ss:$8 sps:$4 sm:$0xff]   ;;  %v6917_v36 = vld [vmem:[%s8382_s1 + $0xf0] ss:$8 sps:$4 sm:$0xff]  }
  0x5c   : > { %1841 = vmatprep.subr.bf16.mxu1 %v8393_v2  ;;  %1496 = vmatprep.subr.bf16.mxu0 %v8393_v2 }
  0x5d   : > { %803 = vmatmul.mubr.bf16.gmra.mxu0 %v6618_v37  ;;  %1188 = vmatmul.mubr.bf16.gmra.mxu1 %v6618_v37 }
  0x5e   : > { %4957 = vmatprep.mubr.msk.bf16.mxu0 %vm713_vm0, %v6624_v38  ;;  %4995 = vmatprep.mubr.msk.bf16.mxu1 %vm713_vm0, %v6624_v38 }
  0x5f   : > { %1842 = vmatpush1.bf16.msra.mxu1 %v6091_v39  ;;  %1497 = vmatpush1.bf16.msra.mxu0 %v6092_v40  ;;  %v6924_v39 = vld [vmem:[%s8382_s1 + $0x4] ss:$8 sps:$4 sm:$0xff]   ;;  %v6130_v40 = vld [vmem:[%s6536_s17 + $0x150] sm:$0xff]  }
  0x60   : > { %1843 = vmatprep.subr.bf16.mxu1 %v8393_v2  ;;  %1498 = vmatprep.subr.bf16.mxu0 %v8393_v2 }
  0x63   : > { %1844 = vmatpush1.bf16.msra.mxu1 %v6094_v41  ;;  %1499 = vmatpush1.bf16.msra.mxu0 %v6093_v42  ;;  %v6132_v41 = vld [vmem:[%s6536_s17 + $0x118] sm:$0xff]   ;;  %v6131_v42 = vld [vmem:[%s6536_s17 + $0x148] sm:$0xff]  }
  0x64   : > { %1845 = vmatprep.subr.bf16.mxu1 %v8393_v2  ;;  %1500 = vmatprep.subr.bf16.mxu0 %v8393_v2 }
  0x65   : > { %811 = vmatmul.mubr.bf16.gmra.mxu0 %v6642_v43  ;;  %1196 = vmatmul.mubr.bf16.gmra.mxu1 %v6642_v43 }
  0x66   : > { %4958 = vmatprep.mubr.msk.bf16.mxu0 %vm713_vm0, %v6648_v44  ;;  %4996 = vmatprep.mubr.msk.bf16.mxu1 %vm713_vm0, %v6648_v44 }
  0x67   : > { %1846 = vmatpush1.bf16.msra.mxu1 %v6099_v46  ;;  %1501 = vmatpush1.bf16.msra.mxu0 %v6098_v47  ;;  %v6134_v46 = vld [vmem:[%s6536_s17 + $0x140] sm:$0xff]  }
  0x68   : > { %1847 = vmatprep.subr.bf16.mxu1 %v8393_v2  ;;  %1502 = vmatprep.subr.bf16.mxu0 %v8393_v2  ;;  %v6136_v47 = vld [vmem:[%s6536_s17 + $0x100] sm:$0xff]  }
  0x6b   : > { %1848 = vmatpush1.bf16.msra.mxu1 %v6101_v48  ;;  %1503 = vmatpush1.bf16.msra.mxu0 %v6100_v49  ;;  %v6139_v48 = vld [vmem:[%s6536_s17 + $0x130] sm:$0xff]  }
  0x6c   : > { %1849 = vmatprep.subr.bf16.mxu1 %v8393_v2  ;;  %1504 = vmatprep.subr.bf16.mxu0 %v8393_v2  ;;  %v6140_v49 = vld [vmem:[%s6536_s17 + $0xf0] sm:$0xff]  }
  0x6d   : > { %819 = vmatmul.mubr.bf16.gmra.mxu0 %v6674_v52  ;;  %1204 = vmatmul.mubr.bf16.gmra.mxu1 %v6674_v52 }
  0x6e   : > { %4959 = vmatprep.mubr.msk.bf16.mxu0 %vm713_vm0, %v6679_v53  ;;  %4997 = vmatprep.mubr.msk.bf16.mxu1 %vm713_vm0, %v6679_v53 }
  0x6f   : > { %1850 = vmatpush1.bf16.msra.mxu1 %v6106_v54  ;;  %1505 = vmatpush1.bf16.msra.mxu0 %v6105_v55  ;;  %v6147_v54 = vld [vmem:[%s6536_s17 + $0x180] sm:$0xff]  }
  0x70   : > { %1851 = vmatprep.subr.bf16.mxu1 %v8393_v2  ;;  %1506 = vmatprep.subr.bf16.mxu0 %v8393_v2  ;;  %v6148_v55 = vld [vmem:[%s6536_s17 + $0x140] sm:$0xff]  }
  0x73   : > { %1852 = vmatpush1.bf16.msra.mxu1 %v6108_v57  ;;  %1507 = vmatpush1.bf16.msra.mxu0 %v6107_v59  ;;  %v6150_v57 = vld [vmem:[%s6536_s17 + $0x138] sm:$0xff]   ;;  %v6152_v59 = vld [vmem:[%s6536_s17 + $0x130] sm:$0xff]  }
  0x74   : > { %1857 = vmatprep.subr.bf16.mxu1 %v8393_v2  ;;  %1512 = vmatprep.subr.bf16.mxu0 %v8393_v2 }
  0x75   : > { %827 = vmatmul.mubr.bf16.gmra.mxu0 %v6704_v60  ;;  %1212 = vmatmul.mubr.bf16.gmra.mxu1 %v6704_v60 }
  0x76   : > { %4960 = vmatprep.mubr.msk.bf16.mxu0 %vm713_vm0, %v6709_v61  ;;  %4998 = vmatprep.mubr.msk.bf16.mxu1 %vm713_vm0, %v6709_v61 }
  0x77   : > { %1858 = vmatpush2.bf16.msra.mxu1 %v6113_v62  ;;  %1513 = vmatpush2.bf16.msra.mxu0 %v6112_v63  ;;  %v6157_v62 = vld [vmem:[%s6536_s17 + $0x158] sm:$0xff]   ;;  %v6156_v63 = vld [vmem:[%s6536_s17 + $0x120] sm:$0xff]  }
  0x78   : > { %1859 = vmatprep.subr.bf16.mxu1 %v8393_v2  ;;  %1514 = vmatprep.subr.bf16.mxu0 %v8393_v2 }
  0x7b   : > { %1860 = vmatpush2.bf16.msra.mxu1 %v6115_v1  ;;  %1515 = vmatpush2.bf16.msra.mxu0 %v6114_v4 }
  0x7c   : > { %1861 = vmatprep.subr.bf16.mxu1 %v8393_v2  ;;  %1516 = vmatprep.subr.bf16.mxu0 %v8393_v2 }
  0x7d   : > { %835 = vmatmul.mubr.bf16.gmra.mxu0 %v6734_v5  ;;  %1220 = vmatmul.mubr.bf16.gmra.mxu1 %v6734_v5 }
  0x7e   : > { %4961 = vmatprep.mubr.msk.bf16.mxu0 %vm713_vm0, %v6739_v6  ;;  %4999 = vmatprep.mubr.msk.bf16.mxu1 %vm713_vm0, %v6739_v6 }
  0x7f   : > { %1862 = vmatpush2.bf16.msra.mxu1 %v6120_v7  ;;  %1517 = vmatpush2.bf16.msra.mxu0 %v6119_v8 }
  0x80   : > { %1863 = vmatprep.subr.bf16.mxu1 %v8393_v2  ;;  %1518 = vmatprep.subr.bf16.mxu0 %v8393_v2 }
  0x83   : > { %1864 = vmatpush2.bf16.msra.mxu1 %v6122_v10  ;;  %1519 = vmatpush2.bf16.msra.mxu0 %v6121_v11 }
  0x84   : > { %1865 = vmatprep.subr.bf16.mxu1 %v8393_v2  ;;  %1520 = vmatprep.subr.bf16.mxu0 %v8393_v2 }
  0x85   : > { %843 = vmatmul.mubr.bf16.gmra.mxu0 %v6761_v12  ;;  %1228 = vmatmul.mubr.bf16.gmra.mxu1 %v6761_v12 }
  0x86   : > { %4962 = vmatprep.mubr.msk.bf16.mxu0 %vm713_vm0, %v6766_v13  ;;  %5000 = vmatprep.mubr.msk.bf16.mxu1 %vm713_vm0, %v6766_v13 }
  0x87   : > { %1866 = vmatpush2.bf16.msra.mxu1 %v6127_v14  ;;  %1521 = vmatpush2.bf16.msra.mxu0 %v6126_v15 }
  0x88   : > { %1867 = vmatprep.subr.bf16.mxu1 %v8393_v2  ;;  %1522 = vmatprep.subr.bf16.mxu0 %v8393_v2 }
  0x8b   : > { %1868 = vmatpush2.bf16.msra.mxu1 %v6129_v16  ;;  %1523 = vmatpush2.bf16.msra.mxu0 %v6128_v17 }
  0x8c   : > { %2527 = vmatprep.subr.bf16.mxu1 %v8393_v2  ;;  %2182 = vmatprep.subr.bf16.mxu0 %v8393_v2 }
  0x8d   : > { %851 = vmatmul.mubr.bf16.gmra.mxu0 %v6785_v18  ;;  %1236 = vmatmul.mubr.bf16.gmra.mxu1 %v6785_v18 }
  0x8e   : > { %4963 = vmatprep.mubr.msk.bf16.mxu0 %vm713_vm0, %v6790_v19  ;;  %5001 = vmatprep.mubr.msk.bf16.mxu1 %vm713_vm0, %v6790_v19 }
  0x95   : > { %859 = vmatmul.mubr.bf16.gmra.mxu0 %v6805_v20  ;;  %1244 = vmatmul.mubr.bf16.gmra.mxu1 %v6805_v20 }
  0x96   : > { %4964 = vmatprep.mubr.msk.bf16.mxu0 %vm713_vm0, %v6810_v21  ;;  %5002 = vmatprep.mubr.msk.bf16.mxu1 %vm713_vm0, %v6810_v21 }
  0x9d   : > { %867 = vmatmul.mubr.bf16.gmra.mxu0 %v6821_v22  ;;  %1252 = vmatmul.mubr.bf16.gmra.mxu1 %v6821_v22 }
  0x9e   : > { %4965 = vmatprep.mubr.msk.bf16.mxu0 %vm713_vm0, %v6826_v23  ;;  %5003 = vmatprep.mubr.msk.bf16.mxu1 %vm713_vm0, %v6826_v23 }
  0xa5   : > { %875 = vmatmul.mubr.bf16.gmra.mxu0 %v6837_v24  ;;  %1260 = vmatmul.mubr.bf16.gmra.mxu1 %v6837_v24 }
  0xa6   : > { %4966 = vmatprep.mubr.msk.bf16.mxu0 %vm713_vm0, %v6842_v25  ;;  %5004 = vmatprep.mubr.msk.bf16.mxu1 %vm713_vm0, %v6842_v25 }
  0xad   : > { %883 = vmatmul.mubr.bf16.gmra.mxu0 %v6853_v26  ;;  %1268 = vmatmul.mubr.bf16.gmra.mxu1 %v6853_v26 }
  0xae   : > { %4967 = vmatprep.mubr.msk.bf16.mxu0 %vm713_vm0, %v6858_v27  ;;  %5005 = vmatprep.mubr.msk.bf16.mxu1 %vm713_vm0, %v6858_v27 }
  0xb5   : > { %891 = vmatmul.mubr.bf16.gmra.mxu0 %v6869_v28  ;;  %1276 = vmatmul.mubr.bf16.gmra.mxu1 %v6869_v28 }
  0xb6   : > { %4968 = vmatprep.mubr.msk.bf16.mxu0 %vm713_vm0, %v6874_v29  ;;  %5006 = vmatprep.mubr.msk.bf16.mxu1 %vm713_vm0, %v6874_v29 }
  0xbd   : > { %899 = vmatmul.mubr.bf16.gmra.mxu0 %v6885_v30  ;;  %1284 = vmatmul.mubr.bf16.gmra.mxu1 %v6885_v30 }
  0xbe   : > { %4969 = vmatprep.mubr.msk.bf16.mxu0 %vm713_vm0, %v6890_v33  ;;  %5007 = vmatprep.mubr.msk.bf16.mxu1 %vm713_vm0, %v6890_v33 }
  0xc5   : > { %907 = vmatmul.mubr.bf16.gmra.mxu0 %v6901_v34  ;;  %1292 = vmatmul.mubr.bf16.gmra.mxu1 %v6901_v34 }
  0xc6   : > { %4970 = vmatprep.mubr.msk.bf16.mxu0 %vm713_vm0, %v6906_v35  ;;  %5008 = vmatprep.mubr.msk.bf16.mxu1 %vm713_vm0, %v6906_v35 }
  0xcd   : > { %915 = vmatmul.mubr.bf16.gmra.mxu0 %v6917_v36  ;;  %1300 = vmatmul.mubr.bf16.gmra.mxu1 %v6917_v36 }
  0xce   : > { %5031 = vmatprep.mubr.msk.bf16.mxu0 %vm713_vm0, %v6924_v39  ;;  %5069 = vmatprep.mubr.msk.bf16.mxu1 %vm713_vm0, %v6924_v39 }
  0xd5   : > { %1525 = vmatmul.mubr.bf16.vlgmr.msra.gmra.mxu0 %v6595_v31  ;;  %1870 = vmatmul.mubr.bf16.vlgmr.msra.gmra.mxu1 %v6595_v31  ;;  %v6135_v31 = vld [vmem:[%s6536_s17 + $0x108] sm:$0xff]  }
  0xd6   : > { %5032 = vmatprep.mubr.msk.bf16.mxu0 %vm713_vm0, %v6600_v32  ;;  %5070 = vmatprep.mubr.msk.bf16.mxu1 %vm713_vm0, %v6600_v32  ;;  %v6137_v32 = vld [vmem:[%s6536_s17 + $0x138] sm:$0xff]  }
  0xd7   : > { %2528 = vmatpush1.bf16.msra.mxu1 %v6130_v40  ;;  %2183 = vmatpush1.bf16.msra.mxu0 %v6132_v41 }
  0xd8   : > { %2529 = vmatprep.subr.bf16.mxu1 %v8393_v2  ;;  %2184 = vmatprep.subr.bf16.mxu0 %v8393_v2 }
  0xdb   : > { %2530 = vmatpush1.bf16.msra.mxu1 %v6131_v42  ;;  %2185 = vmatpush1.bf16.msra.mxu0 %v6133_v45 }
  0xdc   : > { %2531 = vmatprep.subr.bf16.mxu1 %v8393_v2  ;;  %2186 = vmatprep.subr.bf16.mxu0 %v8393_v2 }
  0xdd   : > { %1533 = vmatmul.mubr.bf16.gmra.mxu0 %v6618_v37  ;;  %1878 = vmatmul.mubr.bf16.gmra.mxu1 %v6618_v37  ;;  %v6138_v37 = vld [vmem:[%s6536_s17 + $0xf8] sm:$0xff]  }
  0xde   : > { %5033 = vmatprep.mubr.msk.bf16.mxu0 %vm713_vm0, %v6624_v38  ;;  %5071 = vmatprep.mubr.msk.bf16.mxu1 %vm713_vm0, %v6624_v38  ;;  %v6141_v38 = vld [vmem:[%s6536_s17 + $0x128] sm:$0xff]  }
  0xdf   : > { %2532 = vmatpush1.bf16.msra.mxu1 %v6134_v46  ;;  %2187 = vmatpush1.bf16.msra.mxu0 %v6135_v31 }
  0xe0   : > { %2533 = vmatprep.subr.bf16.mxu1 %v8393_v2  ;;  %2188 = vmatprep.subr.bf16.mxu0 %v8393_v2 }
  0xe3   : > { %2534 = vmatpush1.bf16.msra.mxu1 %v6137_v32  ;;  %2189 = vmatpush1.bf16.msra.mxu0 %v6136_v47 }
  0xe4   : > { %2535 = vmatprep.subr.bf16.mxu1 %v8393_v2  ;;  %2190 = vmatprep.subr.bf16.mxu0 %v8393_v2 }
  0xe5   : > { %1541 = vmatmul.mubr.bf16.gmra.mxu0 %v6642_v43  ;;  %1886 = vmatmul.mubr.bf16.gmra.mxu1 %v6642_v43  ;;  %v6142_v43 = vld [vmem:[%s6536_s17 + $0xe8] sm:$0xff]  }
  0xe6   : > { %5034 = vmatprep.mubr.msk.bf16.mxu0 %vm713_vm0, %v6648_v44  ;;  %5072 = vmatprep.mubr.msk.bf16.mxu1 %vm713_vm0, %v6648_v44  ;;  %v6145_v44 = vld [vmem:[%s6536_s17 + $0x118] sm:$0xff]  }
  0xe7   : > { %2536 = vmatpush1.bf16.msra.mxu1 %v6139_v48  ;;  %2191 = vmatpush1.bf16.msra.mxu0 %v6138_v37 }
  0xe8   : > { %2537 = vmatprep.subr.bf16.mxu1 %v8393_v2  ;;  %2192 = vmatprep.subr.bf16.mxu0 %v8393_v2 }
  0xeb   : > { %2538 = vmatpush1.bf16.msra.mxu1 %v6141_v38  ;;  %2193 = vmatpush1.bf16.msra.mxu0 %v6140_v49 }
  0xec   : > { %2539 = vmatprep.subr.bf16.mxu1 %v8393_v2  ;;  %2194 = vmatprep.subr.bf16.mxu0 %v8393_v2 }
  0xed   : > { %1549 = vmatmul.mubr.bf16.gmra.mxu0 %v6674_v52  ;;  %1894 = vmatmul.mubr.bf16.gmra.mxu1 %v6674_v52  ;;  %v6146_v52 = vld [vmem:[%s6536_s17 + $0x148] sm:$0xff]  }
  0xee   : > { %5035 = vmatprep.mubr.msk.bf16.mxu0 %vm713_vm0, %v6679_v53  ;;  %5073 = vmatprep.mubr.msk.bf16.mxu1 %vm713_vm0, %v6679_v53  ;;  %v6149_v53 = vld [vmem:[%s6536_s17 + $0x178] sm:$0xff]  }
  0xef   : > { %2540 = vmatpush1.bf16.msra.mxu1 %v6143_v50  ;;  %2195 = vmatpush1.bf16.msra.mxu0 %v6142_v43 }
  0xf0   : > { %2541 = vmatprep.subr.bf16.mxu1 %v8393_v2  ;;  %2196 = vmatprep.subr.bf16.mxu0 %v8393_v2 }
  0xf3   : > { %2542 = vmatpush1.bf16.msra.mxu1 %v6145_v44  ;;  %2197 = vmatpush1.bf16.msra.mxu0 %v6144_v51 }
  0xf4   : > { %2547 = vmatprep.subr.bf16.mxu1 %v8393_v2  ;;  %2202 = vmatprep.subr.bf16.mxu0 %v8393_v2 }
  0xf5   : > { %1557 = vmatmul.mubr.bf16.gmra.mxu0 %v6704_v60  ;;  %1902 = vmatmul.mubr.bf16.gmra.mxu1 %v6704_v60  ;;  %v6155_v60 = vld [vmem:[%s6536_s17 + $0x160] sm:$0xff]  }
  0xf6   : > { %5036 = vmatprep.mubr.msk.bf16.mxu0 %vm713_vm0, %v6709_v61  ;;  %5074 = vmatprep.mubr.msk.bf16.mxu1 %vm713_vm0, %v6709_v61  ;;  %v6154_v61 = vld [vmem:[%s6536_s17 + $0x128] sm:$0xff]  }
  0xf7   : > { %2548 = vmatpush2.bf16.msra.mxu1 %v6147_v54  ;;  %2203 = vmatpush2.bf16.msra.mxu0 %v6146_v52 }
  0xf8   : > { %2549 = vmatprep.subr.bf16.mxu1 %v8393_v2  ;;  %2204 = vmatprep.subr.bf16.mxu0 %v8393_v2 }
  0xfb   : > { %2550 = vmatpush2.bf16.msra.mxu1 %v6149_v53  ;;  %2205 = vmatpush2.bf16.msra.mxu0 %v6148_v55 }
  0xfc   : > { %2551 = vmatprep.subr.bf16.mxu1 %v8393_v2  ;;  %2206 = vmatprep.subr.bf16.mxu0 %v8393_v2 }
  0xfd   : > { %1565 = vmatmul.mubr.bf16.gmra.mxu0 %v6734_v5  ;;  %1910 = vmatmul.mubr.bf16.gmra.mxu1 %v6734_v5 }
  0xfe   : > { %5037 = vmatprep.mubr.msk.bf16.mxu0 %vm713_vm0, %v6739_v6  ;;  %5075 = vmatprep.mubr.msk.bf16.mxu1 %vm713_vm0, %v6739_v6 }
  0xff   : > { %2552 = vmatpush2.bf16.msra.mxu1 %v6151_v56  ;;  %2207 = vmatpush2.bf16.msra.mxu0 %v6150_v57 }
 0x100   : > { %2553 = vmatprep.subr.bf16.mxu1 %v8393_v2  ;;  %2208 = vmatprep.subr.bf16.mxu0 %v8393_v2 }
 0x103   : > { %2554 = vmatpush2.bf16.msra.mxu1 %v6153_v58  ;;  %2209 = vmatpush2.bf16.msra.mxu0 %v6152_v59 }
 0x104   : > { %2555 = vmatprep.subr.bf16.mxu1 %v8393_v2  ;;  %2210 = vmatprep.subr.bf16.mxu0 %v8393_v2 }
 0x105   : > { %1573 = vmatmul.mubr.bf16.gmra.mxu0 %v6761_v12  ;;  %1918 = vmatmul.mubr.bf16.gmra.mxu1 %v6761_v12 }
 0x106   : > { %5038 = vmatprep.mubr.msk.bf16.mxu0 %vm713_vm0, %v6766_v13  ;;  %5076 = vmatprep.mubr.msk.bf16.mxu1 %vm713_vm0, %v6766_v13 }
 0x107   : > { %2556 = vmatpush2.bf16.msra.mxu1 %v6155_v60  ;;  %2211 = vmatpush2.bf16.msra.mxu0 %v6154_v61 }
 0x108   : > { %2557 = vmatprep.subr.bf16.mxu1 %v8393_v2  ;;  %2212 = vmatprep.subr.bf16.mxu0 %v8393_v2 }
 0x10b   : > { %2558 = vmatpush2.bf16.msra.mxu1 %v6157_v62  ;;  %2213 = vmatpush2.bf16.msra.mxu0 %v6156_v63  ;;  %v7142_v63 = vpop.permute.xlu0 %979 }
 0x10c   : > { %3217 = vmatprep.subr.bf16.mxu1 %v8393_v2  ;;  %2872 = vmatprep.subr.bf16.mxu0 %v8393_v2  ;;  %8436 = vst [vmem:[#allocation8_spill] sm:$0xff] %v7142_v63 }
 0x10d   : > { %1581 = vmatmul.mubr.bf16.gmra.mxu0 %v6785_v18  ;;  %1926 = vmatmul.mubr.bf16.gmra.mxu1 %v6785_v18 }
 0x10e   : > { %5039 = vmatprep.mubr.msk.bf16.mxu0 %vm713_vm0, %v6790_v19  ;;  %5077 = vmatprep.mubr.msk.bf16.mxu1 %vm713_vm0, %v6790_v19 }
 0x115   : > { %v7034_v0 = vpop.f32.mrf.mxu0  ;;  %1589 = vmatmul.mubr.bf16.gmra.mxu0 %v6805_v20  ;;  %v7037_v1 = vpop.f32.mrf.mxu1  ;;  %1934 = vmatmul.mubr.bf16.gmra.mxu1 %v6805_v20 }
 0x116   : > { %5040 = vmatprep.mubr.msk.bf16.mxu0 %vm713_vm0, %v6810_v21  ;;  %5078 = vmatprep.mubr.msk.bf16.mxu1 %vm713_vm0, %v6810_v21 }
 0x117   : > { %v798_v3 = vpop.f32.mrf.mxu0  ;;  %v1183_v4 = vpop.f32.mrf.mxu1 }
 0x118   : > { %v7146_v4 = vpop.permute.xlu1 %969 }
 0x119   : > { %v7044_v5 = vpop.f32.mrf.mxu0  ;;  %v7046_v6 = vpop.f32.mrf.mxu1 }
 0x11b   : > { %v801_v7 = vpop.f32.mrf.mxu0  ;;  %v1186_v8 = vpop.f32.mrf.mxu1 }
 0x11d   : > { %v7048_v9 = vpop.f32.mrf.mxu0  ;;  %1597 = vmatmul.mubr.bf16.gmra.mxu0 %v6821_v22  ;;  %v7051_v10 = vpop.f32.mrf.mxu1  ;;  %1942 = vmatmul.mubr.bf16.gmra.mxu1 %v6821_v22 }
 0x11e   : > { %5041 = vmatprep.mubr.msk.bf16.mxu0 %vm713_vm0, %v6826_v23  ;;  %5079 = vmatprep.mubr.msk.bf16.mxu1 %vm713_vm0, %v6826_v23 }
 0x11f   : > { %v806_v11 = vpop.f32.mrf.mxu0  ;;  %v1191_v12 = vpop.f32.mrf.mxu1 }
 0x120   : > { %v6158_v11 = vld [vmem:[%s6536_s17 + $0x1c0] sm:$0xff]   ;;  %v6160_v12 = vld [vmem:[%s6536_s17 + $0x188] sm:$0xff]  }
 0x121   : > { %v7058_v13 = vpop.f32.mrf.mxu0  ;;  %v7060_v14 = vpop.f32.mrf.mxu1 }
 0x123   : > { %v809_v15 = vpop.f32.mrf.mxu0  ;;  %v1194_v16 = vpop.f32.mrf.mxu1 }
 0x124   : > { %v7158_v16 = vpop.permute.xlu0 %984 }
 0x125   : > { %v7062_v17 = vpop.f32.mrf.mxu0  ;;  %1605 = vmatmul.mubr.bf16.gmra.mxu0 %v6837_v24  ;;  %v7065_v18 = vpop.f32.mrf.mxu1  ;;  %1950 = vmatmul.mubr.bf16.gmra.mxu1 %v6837_v24  ;;  %8437 = vst [vmem:[#allocation9_spill] sm:$0xff] %v7158_v16 }
 0x126   : > { %5042 = vmatprep.mubr.msk.bf16.mxu0 %vm713_vm0, %v6842_v25  ;;  %5080 = vmatprep.mubr.msk.bf16.mxu1 %vm713_vm0, %v6842_v25 }
 0x127   : > { %v814_v19 = vpop.f32.mrf.mxu0  ;;  %v1199_v20 = vpop.f32.mrf.mxu1 }
 0x128   : > { %v7164_v20 = vld [vmem:[%s8382_s1 + $0x14] ss:$8 sps:$4 sm:$0xff]  }
 0x129   : > { %v7072_v21 = vpop.f32.mrf.mxu0  ;;  %v7074_v22 = vpop.f32.mrf.mxu1 }
 0x12b   : > { %v817_v23 = vpop.f32.mrf.mxu0  ;;  %v1202_v40 = vpop.f32.mrf.mxu1 }
 0x12c   : > { %v7170_v40 = vpop.permute.xlu1 %974 }
 0x12d   : > { %v7076_v41 = vpop.f32.mrf.mxu0  ;;  %1613 = vmatmul.mubr.bf16.gmra.mxu0 %v6853_v26  ;;  %v7079_v42 = vpop.f32.mrf.mxu1  ;;  %1958 = vmatmul.mubr.bf16.gmra.mxu1 %v6853_v26 }
 0x12e   : > { %5043 = vmatprep.mubr.msk.bf16.mxu0 %vm713_vm0, %v6858_v27  ;;  %5081 = vmatprep.mubr.msk.bf16.mxu1 %vm713_vm0, %v6858_v27 }
 0x12f   : > { %v822_v24 = vpop.f32.mrf.mxu0  ;;  %v1207_v25 = vpop.f32.mrf.mxu1 }
 0x130   : > { %v6159_v24 = vld [vmem:[%s6536_s17 + $0x1b8] sm:$0xff]  }
 0x131   : > { %v7086_v45 = vpop.f32.mrf.mxu0  ;;  %v7088_v46 = vpop.f32.mrf.mxu1 }
 0x133   : > { %v825_v31 = vpop.f32.mrf.mxu0  ;;  %v1210_v32 = vpop.f32.mrf.mxu1 }
 0x134   : > { %v6161_v31 = vld [vmem:[%s6536_s17 + $0x180] sm:$0xff]  }
 0x135   : > { %v7090_v47 = vpop.f32.mrf.mxu0  ;;  %1621 = vmatmul.mubr.bf16.gmra.mxu0 %v6869_v28  ;;  %v7093_v48 = vpop.f32.mrf.mxu1  ;;  %1966 = vmatmul.mubr.bf16.gmra.mxu1 %v6869_v28 }
 0x136   : > { %5044 = vmatprep.mubr.msk.bf16.mxu0 %vm713_vm0, %v6874_v29  ;;  %5082 = vmatprep.mubr.msk.bf16.mxu1 %vm713_vm0, %v6874_v29 }
 0x137   : > { %v830_v26 = vpop.f32.mrf.mxu0  ;;  %v1215_v27 = vpop.f32.mrf.mxu1 }
 0x139   : > { %v7100_v37 = vpop.f32.mrf.mxu0  ;;  %v7102_v38 = vpop.f32.mrf.mxu1 }
 0x13b   : > { %v833_v49 = vpop.f32.mrf.mxu0  ;;  %v1218_v50 = vpop.f32.mrf.mxu1 }
 0x13d   : > { %v7104_v43 = vpop.f32.mrf.mxu0  ;;  %1629 = vmatmul.mubr.bf16.gmra.mxu0 %v6885_v30  ;;  %v7107_v44 = vpop.f32.mrf.mxu1  ;;  %1974 = vmatmul.mubr.bf16.gmra.mxu1 %v6885_v30 }
 0x13e   : > { %5045 = vmatprep.mubr.msk.bf16.mxu0 %vm713_vm0, %v6890_v33  ;;  %5083 = vmatprep.mubr.msk.bf16.mxu1 %vm713_vm0, %v6890_v33 }
 0x13f   : > { %v838_v28 = vpop.f32.mrf.mxu0  ;;  %v1223_v29 = vpop.f32.mrf.mxu1 }
 0x141   : > { %v7114_v51 = vpop.f32.mrf.mxu0  ;;  %v7116_v54 = vpop.f32.mrf.mxu1 }
 0x143   : > { %v841_v52 = vpop.f32.mrf.mxu0  ;;  %v1226_v53 = vpop.f32.mrf.mxu1 }
 0x144   : > { %v6162_v52 = vld [vmem:[%s6536_s17 + $0x1b0] sm:$0xff]   ;;  %v7181_v53 = vpop.permute.xlu0 %959 }
 0x145   : > { %v7118_v55 = vpop.f32.mrf.mxu0  ;;  %1637 = vmatmul.mubr.bf16.gmra.mxu0 %v6901_v34  ;;  %v7121_v56 = vpop.f32.mrf.mxu1  ;;  %1982 = vmatmul.mubr.bf16.gmra.mxu1 %v6901_v34 }
 0x146   : > { %5046 = vmatprep.mubr.msk.bf16.mxu0 %vm713_vm0, %v6906_v35  ;;  %5084 = vmatprep.mubr.msk.bf16.mxu1 %vm713_vm0, %v6906_v35 }
 0x147   : > { %v846_v30 = vpop.f32.mrf.mxu0  ;;  %v1231_v33 = vpop.f32.mrf.mxu1 }
 0x149   : > { %v7128_v57 = vpop.f32.mrf.mxu0  ;;  %v7130_v58 = vpop.f32.mrf.mxu1 }
 0x14b   : > { %v849_v59 = vpop.f32.mrf.mxu0  ;;  %v1234_v60 = vpop.f32.mrf.mxu1 }
 0x14c   : > { %v6163_v59 = vld [vmem:[%s6536_s17 + $0x178] sm:$0xff]  }
 0x14d   : > { %v7132_v61 = vpop.f32.mrf.mxu0  ;;  %1645 = vmatmul.mubr.bf16.gmra.mxu0 %v6917_v36  ;;  %v7135_v34 = vpop.f32.mrf.mxu1  ;;  %1990 = vmatmul.mubr.bf16.gmra.mxu1 %v6917_v36 }
 0x14e   : > { %5107 = vmatprep.mubr.msk.bf16.mxu0 %vm713_vm0, %v6924_v39  ;;  %5145 = vmatprep.mubr.msk.bf16.mxu1 %vm713_vm0, %v6924_v39  ;;  %v7155_v39 = vld [vmem:[%s8382_s1] ss:$8 sps:$4 sm:$0xff]  }
 0x14f   : > { %v854_v35 = vpop.f32.mrf.mxu0  ;;  %v1239_v62 = vpop.f32.mrf.mxu1 }
 0x150   : > { %v7198_v35 = vld [vmem:[%s8382_s1 + $0x24] ss:$8 sps:$4 sm:$0xff]  }
 0x151   : > { %v7144_v3 = vpop.f32.mrf.mxu0  ;;  %v7148_v7 = vpop.f32.mrf.mxu1 }
 0x153   : > { %v857_v8 = vpop.f32.mrf.mxu0  ;;  %v1242_v36 = vpop.f32.mrf.mxu1 }
 0x154   : > { %v6165_v8 = vld [vmem:[%s6536_s17 + $0x1a8] sm:$0xff]   ;;  %v6164_v36 = vld [vmem:[%s6536_s17 + $0x170] sm:$0xff]  }
 0x155   : > { %v860_v15 = vpop.f32.mrf.mxu0  ;;  %2215 = vmatmul.mubr.bf16.vlgmr.msra.gmra.mxu0 %v7155_v39  ;;  %v1245_v19 = vpop.f32.mrf.mxu1  ;;  %2560 = vmatmul.mubr.bf16.vlgmr.msra.gmra.mxu1 %v7155_v39 }
 0x156   : > { %5108 = vmatprep.mubr.msk.bf16.mxu0 %vm713_vm0, %v7164_v20  ;;  %5146 = vmatprep.mubr.msk.bf16.mxu1 %vm713_vm0, %v7164_v20  ;;  %v923_v26 = vmax.f32 %v7034_v0, %v860_v15  ;;  %v1308_v50 = vmax.f32 %v7037_v1, %v1245_v19  ;;  %v7188_v1 = vld [vmem:[%s8382_s1 + $0x10] ss:$8 sps:$4 sm:$0xff]   ;;  %v7208_v15 = vpop.permute.xlu0 %949 }
 0x157   : > { %v862_v23 = vpop.f32.mrf.mxu0  ;;  %3218 = vmatpush1.bf16.msra.mxu1 %v6158_v11  ;;  %v1247_v25 = vpop.f32.mrf.mxu1  ;;  %2873 = vmatpush1.bf16.msra.mxu0 %v6160_v12 }
 0x158   : > { %3219 = vmatprep.subr.bf16.mxu1 %v8393_v2  ;;  %2874 = vmatprep.subr.bf16.mxu0 %v8393_v2 }
 0x159   : > { %v863_v32 = vpop.f32.mrf.mxu0  ;;  %v1248_v49 = vpop.f32.mrf.mxu1 }
 0x15a   : > { %v924_v27 = vmax.f32 %v7044_v5, %v863_v32  ;;  %v1309_v28 = vmax.f32 %v7046_v6, %v1248_v49  ;;  %v7191_v5 = vpop.permute.xlu1 %964 }
 0x15b   : > { %v865_v29 = vpop.f32.mrf.mxu0  ;;  %3220 = vmatpush1.bf16.msra.mxu1 %v6159_v24  ;;  %v1250_v33 = vpop.f32.mrf.mxu1  ;;  %2875 = vmatpush1.bf16.msra.mxu0 %v6161_v31 }
 0x15c   : > { %v939_v30 = vmax.f32 %v923_v26, %v924_v27  ;;  %3221 = vmatprep.subr.bf16.mxu1 %v8393_v2  ;;  %v1324_v0 = vmax.f32 %v1308_v50, %v1309_v28  ;;  %2876 = vmatprep.subr.bf16.mxu0 %v8393_v2  ;;  %v6167_v27 = vld [vmem:[%s6536_s17 + $0x1a0] sm:$0xff]   ;;  %v6166_v28 = vld [vmem:[%s6536_s17 + $0x168] sm:$0xff]   ;;  %v7232_v33 = vld [vmem:[%s8382_s1 + $0x34] ss:$8 sps:$4 sm:$0xff]  }
 0x15d   : > { %v868_v60 = vpop.f32.mrf.mxu0  ;;  %2223 = vmatmul.mubr.bf16.gmra.mxu0 %v7188_v1  ;;  %v1253_v6 = vpop.f32.mrf.mxu1  ;;  %2568 = vmatmul.mubr.bf16.gmra.mxu1 %v7188_v1 }
 0x15e   : > { %5109 = vmatprep.mubr.msk.bf16.mxu0 %vm713_vm0, %v7198_v35  ;;  %5147 = vmatprep.mubr.msk.bf16.mxu1 %vm713_vm0, %v7198_v35  ;;  %v925_v19 = vmax.f32 %v7048_v9, %v868_v60  ;;  %v1310_v25 = vmax.f32 %v7051_v10, %v1253_v6  ;;  %v7214_v26 = vpop.permute.xlu1 %954  ;;  %v7222_v10 = vld [vmem:[%s8382_s1 + $0x20] ss:$8 sps:$4 sm:$0xff]  }
 0x15f   : > { %v870_v62 = vpop.f32.mrf.mxu0  ;;  %3222 = vmatpush1.bf16.msra.mxu1 %v6162_v52  ;;  %v1255_v11 = vpop.f32.mrf.mxu1  ;;  %2877 = vmatpush1.bf16.msra.mxu0 %v6163_v59  ;;  %v1332_v59 = vadd.f32 %v1324_v0, %v7208_v15 }
 0x160   : > { %3223 = vmatprep.subr.bf16.mxu1 %v8393_v2  ;;  %2878 = vmatprep.subr.bf16.mxu0 %v8393_v2  ;;  %v6168_v11 = vld [vmem:[%s6536_s17 + $0x160] sm:$0xff]  }
 0x161   : > { %v871_v12 = vpop.f32.mrf.mxu0  ;;  %v1256_v24 = vpop.f32.mrf.mxu1 }
 0x162   : > { %v926_v23 = vmax.f32 %v7058_v13, %v871_v12  ;;  %v1311_v31 = vmax.f32 %v7060_v14, %v1256_v24  ;;  %v987_v13 = vadd.f32 %v7208_v15, %v939_v30  ;;  %v6169_v30 = vld [vmem:[%s6536_s17 + $0x198] sm:$0xff]  }
 0x163   : > { %v873_v32 = vpop.f32.mrf.mxu0  ;;  %3224 = vmatpush1.bf16.msra.mxu1 %v6165_v8  ;;  %v1258_v50 = vpop.f32.mrf.mxu1  ;;  %2879 = vmatpush1.bf16.msra.mxu0 %v6164_v36 }
 0x164   : > { %v940_v49 = vmax.f32 %v925_v19, %v926_v23  ;;  %3225 = vmatprep.subr.bf16.mxu1 %v8393_v2  ;;  %v1325_v29 = vmax.f32 %v1310_v25, %v1311_v31  ;;  %2880 = vmatprep.subr.bf16.mxu0 %v8393_v2  ;;  %v6171_v32 = vld [vmem:[%s6536_s17 + $0x190] sm:$0xff]   ;;  %v6170_v50 = vld [vmem:[%s6536_s17 + $0x158] sm:$0xff]  }
 0x165   : > { %v876_v9 = vpop.f32.mrf.mxu0  ;;  %2231 = vmatmul.mubr.bf16.gmra.mxu0 %v7222_v10  ;;  %v1261_v52 = vpop.f32.mrf.mxu1  ;;  %2576 = vmatmul.mubr.bf16.gmra.mxu1 %v7222_v10 }
 0x166   : > { %v988_v14 = vadd.f32 %v7214_v26, %v940_v49  ;;  %5110 = vmatprep.mubr.msk.bf16.mxu0 %vm713_vm0, %v7232_v33  ;;  %v1333_v60 = vadd.f32 %v1325_v29, %v7214_v26  ;;  %5148 = vmatprep.mubr.msk.bf16.mxu1 %vm713_vm0, %v7232_v33  ;;  %v927_v0 = vmax.f32 %v7062_v17, %v876_v9  ;;  %v6173_v9 = vld [vmem:[%s6536_s17 + $0x188] sm:$0xff]  }
 0x167   : > { %v878_v6 = vpop.f32.mrf.mxu0  ;;  %3226 = vmatpush1.bf16.msra.mxu1 %v6167_v27  ;;  %v1263_v8 = vpop.f32.mrf.mxu1  ;;  %2881 = vmatpush1.bf16.msra.mxu0 %v6166_v28  ;;  %v1312_v24 = vmax.f32 %v7065_v18, %v1261_v52 }
 0x168   : > { %v5441_v62 = vpack.c.bf16 %v988_v14, %v987_v13  ;;  %3227 = vmatprep.subr.bf16.mxu1 %v8393_v2  ;;  %v5461_v36 = vpack.c.bf16 %v1333_v60, %v1332_v59  ;;  %2882 = vmatprep.subr.bf16.mxu0 %v8393_v2  ;;  %v6172_v14 = vld [vmem:[%s6536_s17 + $0x150] sm:$0xff]  }
 0x169   : > { %v879_v12 = vpop.f32.mrf.mxu0  ;;  %v1264_v23 = vpop.f32.mrf.mxu1 }
 0x16a   : > { %5442 = vst [vmem:[#allocation2] sm:$0xff] %v5441_v62   ;;  %v928_v19 = vmax.f32 %v7072_v21, %v879_v12  ;;  %5646 = vst [vmem:[#allocation2 + $0x20] sm:$0xff] %v5461_v36   ;;  %v1313_v25 = vmax.f32 %v7074_v22, %v1264_v23  ;;  %v7254_v21 = vld [vmem:[%s8382_s1 + $0x30] ss:$8 sps:$4 sm:$0xff]   ;;  %v7262_v22 = vld [vmem:[%s8382_s1 + $0x44] ss:$8 sps:$4 sm:$0xff]  }
 0x16b   : > { %v881_v31 = vpop.f32.mrf.mxu0  ;;  %3228 = vmatpush1.bf16.msra.mxu1 %v6169_v30  ;;  %v1266_v49 = vpop.f32.mrf.mxu1  ;;  %2883 = vmatpush1.bf16.msra.mxu0 %v6168_v11  ;;  %v6175_v11 = vld [vmem:[%s6536_s17 + $0x1f0] sm:$0xff]  }
 0x16c   : > { %v941_v27 = vmax.f32 %v927_v0, %v928_v19  ;;  %3229 = vmatprep.subr.bf16.mxu1 %v8393_v2  ;;  %v1326_v28 = vmax.f32 %v1312_v24, %v1313_v25  ;;  %2884 = vmatprep.subr.bf16.mxu0 %v8393_v2  ;;  %v6174_v0 = vld [vmem:[%s6536_s17 + $0x1b8] sm:$0xff]  }
 0x16d   : > { %v884_v17 = vpop.f32.mrf.mxu0  ;;  %2239 = vmatmul.mubr.bf16.gmra.mxu0 %v7254_v21  ;;  %v1269_v18 = vpop.f32.mrf.mxu1  ;;  %2584 = vmatmul.mubr.bf16.gmra.mxu1 %v7254_v21  ;;  %v7292_v24 = vld [vmem:[%s8382_s1 + $0x54] ss:$8 sps:$4 sm:$0xff]  }
 0x16e   : > { %5111 = vmatprep.mubr.msk.bf16.mxu0 %vm713_vm0, %v7262_v22  ;;  %5149 = vmatprep.mubr.msk.bf16.mxu1 %vm713_vm0, %v7262_v22  ;;  %v929_v59 = vmax.f32 %v7076_v41, %v884_v17  ;;  %v1314_v30 = vmax.f32 %v7079_v42, %v1269_v18  ;;  %v7282_v41 = vld [vmem:[%s8382_s1 + $0x40] ss:$8 sps:$4 sm:$0xff]   ;;  %v989_v42 = vadd.f32 %v7181_v53, %v941_v27  ;;  %v6176_v17 = vld [vmem:[%s6536_s17 + $0x1b0] sm:$0xff]  }
 0x16f   : > { %v886_v29 = vpop.f32.mrf.mxu0  ;;  %3230 = vmatpush1.bf16.msra.mxu1 %v6171_v32  ;;  %v1271_v13 = vpop.f32.mrf.mxu1  ;;  %2885 = vmatpush1.bf16.msra.mxu0 %v6170_v50  ;;  %v1334_v25 = vadd.f32 %v1326_v28, %v7181_v53  ;;  %v6177_v27 = vld [vmem:[%s6536_s17 + $0x1e8] sm:$0xff]  }
 0x170   : > { %3231 = vmatprep.subr.bf16.mxu1 %v8393_v2  ;;  %2886 = vmatprep.subr.bf16.mxu0 %v8393_v2 }
 0x171   : > { %v887_v52 = vpop.f32.mrf.mxu0  ;;  %v1272_v6 = vpop.f32.mrf.mxu1 }
 0x172   : > { %v930_v60 = vmax.f32 %v7086_v45, %v887_v52  ;;  %v1315_v62 = vmax.f32 %v7088_v46, %v1272_v6 }
 0x173   : > { %v889_v8 = vpop.f32.mrf.mxu0  ;;  %3232 = vmatpush1.bf16.msra.mxu1 %v6173_v9  ;;  %v1274_v12 = vpop.f32.mrf.mxu1  ;;  %2887 = vmatpush1.bf16.msra.mxu0 %v6172_v14 }
 0x174   : > { %v942_v36 = vmax.f32 %v929_v59, %v930_v60  ;;  %3237 = vmatprep.subr.bf16.mxu1 %v8393_v2  ;;  %v1327_v19 = vmax.f32 %v1314_v30, %v1315_v62  ;;  %2892 = vmatprep.subr.bf16.mxu0 %v8393_v2  ;;  %v6179_v60 = vld [vmem:[%s6536_s17 + $0x1e0] sm:$0xff]   ;;  %v6178_v62 = vld [vmem:[%s6536_s17 + $0x1a8] sm:$0xff]  }
 0x175   : > { %v892_v23 = vpop.f32.mrf.mxu0  ;;  %2247 = vmatmul.mubr.bf16.gmra.mxu0 %v7282_v41  ;;  %v1277_v46 = vpop.f32.mrf.mxu1  ;;  %2592 = vmatmul.mubr.bf16.gmra.mxu1 %v7282_v41 }
 0x176   : > { %v990_v45 = vadd.f32 %v7191_v5, %v942_v36  ;;  %5112 = vmatprep.mubr.msk.bf16.mxu0 %vm713_vm0, %v7292_v24  ;;  %v1335_v31 = vadd.f32 %v1327_v19, %v7191_v5  ;;  %5150 = vmatprep.mubr.msk.bf16.mxu1 %vm713_vm0, %v7292_v24  ;;  %v931_v28 = vmax.f32 %v7090_v47, %v892_v23  ;;  %v6181_v36 = vld [vmem:[%s6536_s17 + $0x1d8] sm:$0xff]  }
 0x177   : > { %v894_v32 = vpop.f32.mrf.mxu0  ;;  %3238 = vmatpush2.bf16.msra.mxu1 %v6175_v11  ;;  %v1279_v50 = vpop.f32.mrf.mxu1  ;;  %2893 = vmatpush2.bf16.msra.mxu0 %v6174_v0  ;;  %v1316_v14 = vmax.f32 %v7093_v48, %v1277_v46  ;;  %v6180_v0 = vld [vmem:[%s6536_s17 + $0x1a0] sm:$0xff]  }
 0x178   : > { %v5446_v49 = vpack.c.bf16 %v990_v45, %v989_v42  ;;  %3239 = vmatprep.subr.bf16.mxu1 %v8393_v2  ;;  %v5466_v18 = vpack.c.bf16 %v1335_v31, %v1334_v25  ;;  %2894 = vmatprep.subr.bf16.mxu0 %v8393_v2  ;;  %v6183_v32 = vld [vmem:[%s6536_s17 + $0x1d0] sm:$0xff]   ;;  %v6182_v50 = vld [vmem:[%s6536_s17 + $0x198] sm:$0xff]  }
 0x179   : > { %v895_v29 = vpop.f32.mrf.mxu0  ;;  %v1280_v13 = vpop.f32.mrf.mxu1 }
 0x17a   : > { %5643 = vst [vmem:[#allocation2 + $0x8] sm:$0xff] %v5446_v49   ;;  %v932_v9 = vmax.f32 %v7100_v37, %v895_v29  ;;  %5647 = vst [vmem:[#allocation2 + $0x28] sm:$0xff] %v5466_v18   ;;  %v1317_v52 = vmax.f32 %v7102_v38, %v1280_v13  ;;  %v7314_v37 = vld [vmem:[%s8382_s1 + $0x50] ss:$8 sps:$4 sm:$0xff]   ;;  %v7322_v38 = vld [vmem:[%s8382_s1 + $0x64] ss:$8 sps:$4 sm:$0xff]  }
 0x17b   : > { %v897_v59 = vpop.f32.mrf.mxu0  ;;  %3240 = vmatpush2.bf16.msra.mxu1 %v6177_v27  ;;  %v1282_v30 = vpop.f32.mrf.mxu1  ;;  %2895 = vmatpush2.bf16.msra.mxu0 %v6176_v17  ;;  %v7352_v29 = vld [vmem:[%s8382_s1 + $0x74] ss:$8 sps:$4 sm:$0xff]  }
 0x17c   : > { %v943_v6 = vmax.f32 %v931_v28, %v932_v9  ;;  %3241 = vmatprep.subr.bf16.mxu1 %v8393_v2  ;;  %v1328_v8 = vmax.f32 %v1316_v14, %v1317_v52  ;;  %2896 = vmatprep.subr.bf16.mxu0 %v8393_v2  ;;  %v6185_v14 = vld [vmem:[%s6536_s17 + $0x1c8] sm:$0xff]  }
 0x17d   : > { %v900_v47 = vpop.f32.mrf.mxu0  ;;  %2255 = vmatmul.mubr.bf16.gmra.mxu0 %v7314_v37  ;;  %v1285_v48 = vpop.f32.mrf.mxu1  ;;  %2600 = vmatmul.mubr.bf16.gmra.mxu1 %v7314_v37 }
 0x17e   : > { %5113 = vmatprep.mubr.msk.bf16.mxu0 %vm713_vm0, %v7322_v38  ;;  %5151 = vmatprep.mubr.msk.bf16.mxu1 %vm713_vm0, %v7322_v38  ;;  %v933_v23 = vmax.f32 %v7104_v43, %v900_v47  ;;  %v1318_v46 = vmax.f32 %v7107_v44, %v1285_v48  ;;  %v7342_v43 = vld [vmem:[%s8382_s1 + $0x60] ss:$8 sps:$4 sm:$0xff]   ;;  %v991_v44 = vadd.f32 %v7146_v4, %v943_v6 }
 0x17f   : > { %v902_v11 = vpop.f32.mrf.mxu0  ;;  %3242 = vmatpush2.bf16.msra.mxu1 %v6179_v60  ;;  %v1287_v12 = vpop.f32.mrf.mxu1  ;;  %2897 = vmatpush2.bf16.msra.mxu0 %v6178_v62  ;;  %v1336_v28 = vadd.f32 %v1328_v8, %v7146_v4  ;;  %v6184_v60 = vld [vmem:[%s6536_s17 + $0x190] sm:$0xff]   ;;  %s5353_s17 = sshll.u32 %s6495_s10, 4  ;;  %s6351_s10 = scalar_lea.vmem %s6350_s13, 32 }
 0x180   : > { %3243 = vmatprep.subr.bf16.mxu1 %v8393_v2  ;;  %2898 = vmatprep.subr.bf16.mxu0 %v8393_v2  ;;  %s8346_s25 = scalar_lea.hbm %s8392_s11, %s5353_s17  ;;  %p6353_p1 = scmp.lt.s32.totalorder %s6351_s10, %s6345_s30 }
 0x181   : > { %v903_v19 = vpop.f32.mrf.mxu0  ;;  %v1288_v45 = vpop.f32.mrf.mxu1 }
 0x182   : > { %v934_v42 = vmax.f32 %v7114_v51, %v903_v19  ;;  %v1319_v25 = vmax.f32 %v7116_v54, %v1288_v45  ;;  %p6354_p2 = por %p6353_p1, %p6352_p0 }
 0x183   : > { %v905_v31 = vpop.f32.mrf.mxu0  ;;  %3244 = vmatpush2.bf16.msra.mxu1 %v6181_v36  ;;  %v1290_v49 = vpop.f32.mrf.mxu1  ;;  %2899 = vmatpush2.bf16.msra.mxu0 %v6180_v0 }
 0x184   : > { %v944_v27 = vmax.f32 %v933_v23, %v934_v42  ;;  %3245 = vmatprep.subr.bf16.mxu1 %v8393_v2  ;;  %v1329_v17 = vmax.f32 %v1318_v46, %v1319_v25  ;;  %2900 = vmatprep.subr.bf16.mxu0 %v8393_v2  ;;  %v7371_v42 = vld [vmem:[%s8382_s1 + $0x70] ss:$8 sps:$4 sm:$0xff]   ;;  %p6355_p3 = pnand %p6354_p2, %p6348_p13 }
 0x185   : > { %v908_v18 = vpop.f32.mrf.mxu0  ;;  %2263 = vmatmul.mubr.bf16.gmra.mxu0 %v7342_v43  ;;  %v1293_v54 = vpop.f32.mrf.mxu1  ;;  %2608 = vmatmul.mubr.bf16.gmra.mxu1 %v7342_v43 }
 0x186   : > { %v992_v51 = vadd.f32 %v7170_v40, %v944_v27  ;;  %5114 = vmatprep.mubr.msk.bf16.mxu0 %vm713_vm0, %v7352_v29  ;;  %v1337_v9 = vadd.f32 %v1329_v17, %v7170_v40  ;;  %5152 = vmatprep.mubr.msk.bf16.mxu1 %vm713_vm0, %v7352_v29  ;;  %v935_v62 = vmax.f32 %v7118_v55, %v908_v18 }
 0x187   : > { %v910_v13 = vpop.f32.mrf.mxu0  ;;  %3246 = vmatpush2.bf16.msra.mxu1 %v6183_v32  ;;  %v1295_v59 = vpop.f32.mrf.mxu1  ;;  %2901 = vmatpush2.bf16.msra.mxu0 %v6182_v50  ;;  %v1320_v48 = vmax.f32 %v7121_v56, %v1293_v54  ;;  %v7378_v56 = vld [vmem:[%s8382_s1 + $0x84] ss:$8 sps:$4 sm:$0xff]  }
 0x188   : > { %v5451_v52 = vpack.c.bf16 %v992_v51, %v991_v44  ;;  %3247 = vmatprep.subr.bf16.mxu1 %v8393_v2  ;;  %v5471_v6 = vpack.c.bf16 %v1337_v9, %v1336_v28  ;;  %2902 = vmatprep.subr.bf16.mxu0 %v8393_v2  ;;  %v7393_v51 = vld [vmem:[%s8382_s1 + $0x80] ss:$8 sps:$4 sm:$0xff]  }
 0x189   : > { %v911_v30 = vpop.f32.mrf.mxu0  ;;  %v1296_v47 = vpop.f32.mrf.mxu1  ;;  %8438 = vst [vmem:[#allocation10_spill] sm:$0xff] %v7393_v51  ;;  %v4712_v2 = vld [vmem:[%s8389_s8 + $0x8] sm:$0xff] }
 0x18a   : > { %5644 = vst [vmem:[#allocation2 + $0x10] sm:$0xff] %v5451_v52   ;;  %v936_v8 = vmax.f32 %v7128_v57, %v911_v30  ;;  %5648 = vst [vmem:[#allocation2 + $0x30] sm:$0xff] %v5471_v6   ;;  %v1321_v11 = vmax.f32 %v7130_v58, %v1296_v47  ;;  %v453_v30 = vld [vmem:[%s8386_s5 + $0x10] sm:$0xff] }
 0x18b   : > { %v913_v36 = vpop.f32.mrf.mxu0  ;;  %3248 = vmatpush2.bf16.msra.mxu1 %v6185_v14  ;;  %v1298_v0 = vpop.f32.mrf.mxu1  ;;  %2903 = vmatpush2.bf16.msra.mxu0 %v6184_v60  ;;  %v7424_v47 = vld [vmem:[%s8382_s1 + $0x90] ss:$8 sps:$4 sm:$0xff]  }
 0x18c   : > { %v945_v12 = vmax.f32 %v935_v62, %v936_v8  ;;  %v1330_v19 = vmax.f32 %v1320_v48, %v1321_v11  ;;  %3857 = vperm.xlu0 %6024, %v453_v30   ;;  %8440 = vst [vmem:[#allocation12_spill] sm:$0xff] %v7424_v47  ;;  %v7433_v11 = vld [vmem:[%s8382_s1 + $0xa4] ss:$8 sps:$4 sm:$0xff]  }
 0x18d   : > { %v916_v23 = vpop.f32.mrf.mxu0  ;;  %2271 = vmatmul.mubr.bf16.gmra.mxu0 %v7371_v42  ;;  %v1301_v55 = vpop.f32.mrf.mxu1  ;;  %2616 = vmatmul.mubr.bf16.gmra.mxu1 %v7371_v42  ;;  %8441 = vst [vmem:[#allocation13_spill] sm:$0xff] %v7433_v11  ;;  %v451_v36 = vld [vmem:[%s8386_s5] sm:$0xff] }
 0x18e   : > { %5115 = vmatprep.mubr.msk.bf16.mxu0 %vm713_vm0, %v7378_v56  ;;  %5153 = vmatprep.mubr.msk.bf16.mxu1 %vm713_vm0, %v7378_v56  ;;  %v937_v46 = vmax.f32 %v7132_v61, %v916_v23  ;;  %v1322_v32 = vmax.f32 %v7135_v34, %v1301_v55  ;;  %v993_v61 = vadd.f32 %v7142_v63, %v945_v12  ;;  %v455_v55 = vld [vmem:[%s8386_s5 + $0x20] sm:$0xff] }
 0x18f   : > { %v918_v57 = vpop.f32.mrf.mxu0  ;;  %v1303_v58 = vpop.f32.mrf.mxu1  ;;  %v1338_v54 = vadd.f32 %v1330_v19, %v7142_v63 }
 0x190   : > { %3847 = vperm.xlu0 %6024, %v451_v36  }
 0x191   : > { %v919_v45 = vpop.f32.mrf.mxu0  ;;  %v1304_v31 = vpop.f32.mrf.mxu1 }
 0x192   : > { %v938_v25 = vmax.f32 %v7144_v3, %v919_v45  ;;  %v1323_v27 = vmax.f32 %v7148_v7, %v1304_v31  ;;  %v7404_v7 = vld [vmem:[%s8382_s1 + $0x94] ss:$8 sps:$4 sm:$0xff]  }
 0x193   : > { %v921_v49 = vpop.f32.mrf.mxu0  ;;  %v1306_v17 = vpop.f32.mrf.mxu1  ;;  %8439 = vst [vmem:[#allocation11_spill] sm:$0xff] %v7404_v7  ;;  %v7463_v31 = vld [vmem:[%s8382_s1 + $0xb4] ss:$8 sps:$4 sm:$0xff]  }
 0x194   : > { %v946_v50 = vmax.f32 %v937_v46, %v938_v25  ;;  %v1331_v18 = vmax.f32 %v1322_v32, %v1323_v27  ;;  %3867 = vperm.xlu0 %6024, %v455_v55   ;;  %v7454_v46 = vld [vmem:[%s8382_s1 + $0xa0] ss:$8 sps:$4 sm:$0xff]   ;;  %8443 = vst [vmem:[#allocation15_spill] sm:$0xff] %v7463_v31  ;;  %v4557_v32 = vld [vmem:[%s8387_s6 + $0x10] sm:$0xff] }
 0x195   : > { %v7388_v44 = vpop.f32.mrf.mxu0  ;;  %2279 = vmatmul.mubr.bf16.gmra.mxu0 %v7393_v51  ;;  %v7398_v34 = vpop.f32.mrf.mxu1  ;;  %2624 = vmatmul.mubr.bf16.gmra.mxu1 %v7393_v51  ;;  %8442 = vst [vmem:[#allocation14_spill] sm:$0xff] %v7454_v46 }
 0x196   : > { %v994_v3 = vadd.f32 %v7158_v16, %v946_v50  ;;  %5116 = vmatprep.mubr.msk.bf16.mxu0 %vm713_vm0, %v7404_v7  ;;  %v1339_v28 = vadd.f32 %v1331_v18, %v7158_v16  ;;  %5154 = vmatprep.mubr.msk.bf16.mxu1 %vm713_vm0, %v7404_v7  ;;  %v4555_v18 = vld [vmem:[%s8387_s6] sm:$0xff] }
 0x197   : > { %v1528_v9 = vpop.f32.mrf.mxu0  ;;  %v1873_v14 = vpop.f32.mrf.mxu1 }
 0x198   : > { %v5456_v13 = vpack.c.bf16 %v994_v3, %v993_v61  ;;  %v5476_v52 = vpack.c.bf16 %v1339_v28, %v1338_v54  ;;  %4571 = vperm.xlu0 %6024, %v4557_v32   ;;  %v7484_v28 = vld [vmem:[%s8382_s1 + $0xb0] ss:$8 sps:$4 sm:$0xff]   ;;  %v7517_v32 = vld [vmem:[%s8382_s1 + $0xc0] ss:$8 sps:$4 sm:$0xff]  }
 0x199   : > { %v7412_v59 = vpop.f32.mrf.mxu0  ;;  %v7414_v60 = vpop.f32.mrf.mxu1  ;;  %8444 = vst [vmem:[#allocation16_spill] sm:$0xff] %v7484_v28  ;;  %v454_v14 = vld [vmem:[%s8386_s5 + $0x18] sm:$0xff]  ;;  %8446 = vst [vmem:[#allocation18_spill] sm:$0xff] %v7517_v32 }
 0x19a   : > { %5645 = vst [vmem:[#allocation2 + $0x18] sm:$0xff] %v5456_v13   ;;  %5649 = vst [vmem:[#allocation2 + $0x38] sm:$0xff] %v5476_v52   ;;  %v7493_v13 = vld [vmem:[%s8382_s1 + $0xc4] ss:$8 sps:$4 sm:$0xff]   ;;  %3862 = vperm.xlu1 %6025, %v454_v14  }
 0x19b   : > { %v1531_v6 = vpop.f32.mrf.mxu0  ;;  %v1876_v62 = vpop.f32.mrf.mxu1  ;;  %8445 = vst [vmem:[#allocation17_spill] sm:$0xff] %v7493_v13  ;;  %v4711_v52 = vld [vmem:[%s8389_s8] sm:$0xff] }
 0x19c   : > { %4561 = vperm.xlu0 %6024, %v4555_v18   ;;  %v456_v18 = vld [vmem:[%s8386_s5 + $0x28] sm:$0xff] }
 0x19d   : > { %v7419_v8 = vpop.f32.mrf.mxu0  ;;  %2287 = vmatmul.mubr.bf16.gmra.mxu0 %v7424_v47  ;;  %v7427_v48 = vpop.f32.mrf.mxu1  ;;  %2632 = vmatmul.mubr.bf16.gmra.mxu1 %v7424_v47 }
 0x19e   : > { %5117 = vmatprep.mubr.msk.bf16.mxu0 %vm713_vm0, %v7433_v11  ;;  %5155 = vmatprep.mubr.msk.bf16.mxu1 %vm713_vm0, %v7433_v11 }
 0x19f   : > { %v1536_v12 = vpop.f32.mrf.mxu0  ;;  %v1881_v0 = vpop.f32.mrf.mxu1 }
 0x1a0   : > { %4715 = vperm.xlu0 %6024, %v4711_v52   ;;  %v452_v12 = vld [vmem:[%s8386_s5 + $0x8] sm:$0xff] }
 0x1a1   : > { %v7442_v19 = vpop.f32.mrf.mxu0  ;;  %v7444_v23 = vpop.f32.mrf.mxu1  ;;  %v4777_v0 = vld [vmem:[#allocation4] sm:$0x1]  ;;  %3852 = vperm.xlu1 %6025, %v452_v12  }
 0x1a3   : > { %v1539_v57 = vpop.f32.mrf.mxu0  ;;  %v1884_v58 = vpop.f32.mrf.mxu1 }
 0x1a4   : > { %4780 = vperm.xlu0 %6024, %v4777_v0  }
 0x1a5   : > { %v7449_v45 = vpop.f32.mrf.mxu0  ;;  %2295 = vmatmul.mubr.bf16.gmra.mxu0 %v7454_v46  ;;  %v7457_v25 = vpop.f32.mrf.mxu1  ;;  %2640 = vmatmul.mubr.bf16.gmra.mxu1 %v7454_v46 }
 0x1a6   : > { %5118 = vmatprep.mubr.msk.bf16.mxu0 %vm713_vm0, %v7463_v31  ;;  %5156 = vmatprep.mubr.msk.bf16.mxu1 %vm713_vm0, %v7463_v31  ;;  %v7601_v31 = vld [vmem:[%s8382_s1 + $0xf0] ss:$8 sps:$4 sm:$0xff]  }
 0x1a7   : > { %v1544_v27 = vpop.f32.mrf.mxu0  ;;  %v1889_v49 = vpop.f32.mrf.mxu1  ;;  %3872 = vperm.xlu1 %6025, %v456_v18   ;;  %v7556_v18 = vld [vmem:[%s8382_s1 + $0xe4] ss:$8 sps:$4 sm:$0xff]   ;;  %8453 = vst [vmem:[#allocation25_spill] sm:$0xff] %v7601_v31 }
 0x1a8   : > { %v7526_v49 = vld [vmem:[%s8382_s1 + $0xd4] ss:$8 sps:$4 sm:$0xff]   ;;  %8449 = vst [vmem:[#allocation21_spill] sm:$0xff] %v7556_v18 }
 0x1a9   : > { %v7472_v50 = vpop.f32.mrf.mxu0  ;;  %v7474_v17 = vpop.f32.mrf.mxu1  ;;  %8447 = vst [vmem:[#allocation19_spill] sm:$0xff] %v7526_v49 }
 0x1ab   : > { %v1547_v61 = vpop.f32.mrf.mxu0  ;;  %v1892_v3 = vpop.f32.mrf.mxu1 }
 0x1ad   : > { %v7479_v54 = vpop.f32.mrf.mxu0  ;;  %2303 = vmatmul.mubr.bf16.gmra.mxu0 %v7484_v28  ;;  %v7487_v9 = vpop.f32.mrf.mxu1  ;;  %2648 = vmatmul.mubr.bf16.gmra.mxu1 %v7484_v28 }
 0x1ae   : > { %5119 = vmatprep.mubr.msk.bf16.mxu0 %vm713_vm0, %v7493_v13  ;;  %5157 = vmatprep.mubr.msk.bf16.mxu1 %vm713_vm0, %v7493_v13 }
 0x1af   : > { %v1552_v6 = vpop.f32.mrf.mxu0  ;;  %v1897_v30 = vpop.f32.mrf.mxu1 }
 0x1b0   : > { %v4558_v6 = vld [vmem:[%s8387_s6 + $0x18] sm:$0xff] }
 0x1b1   : > { %v7505_v62 = vpop.f32.mrf.mxu0  ;;  %v7507_v36 = vpop.f32.mrf.mxu1  ;;  %4576 = vperm.xlu1 %6025, %v4558_v6  }
 0x1b3   : > { %v1555_v55 = vpop.f32.mrf.mxu0  ;;  %v1900_v57 = vpop.f32.mrf.mxu1 }
 0x1b4   : > { %v7547_v55 = vld [vmem:[%s8382_s1 + $0xd0] ss:$8 sps:$4 sm:$0xff]  }
 0x1b5   : > { %v7512_v58 = vpop.f32.mrf.mxu0  ;;  %2311 = vmatmul.mubr.bf16.gmra.mxu0 %v7517_v32  ;;  %v7520_v27 = vpop.f32.mrf.mxu1  ;;  %2656 = vmatmul.mubr.bf16.gmra.mxu1 %v7517_v32  ;;  %8448 = vst [vmem:[#allocation20_spill] sm:$0xff] %v7547_v55 }
 0x1b6   : > { %5120 = vmatprep.mubr.msk.bf16.mxu0 %vm713_vm0, %v7526_v49  ;;  %5158 = vmatprep.mubr.msk.bf16.mxu1 %vm713_vm0, %v7526_v49 }
 0x1b7   : > { %v1560_v61 = vpop.f32.mrf.mxu0  ;;  %v1905_v3 = vpop.f32.mrf.mxu1 }
 0x1b8   : > { %v4556_v61 = vld [vmem:[%s8387_s6 + $0x8] sm:$0xff] }
 0x1b9   : > { %v7535_v14 = vpop.f32.mrf.mxu0  ;;  %v7537_v52 = vpop.f32.mrf.mxu1  ;;  %4566 = vperm.xlu1 %6025, %v4556_v61  }
 0x1bb   : > { %v1563_v30 = vpop.f32.mrf.mxu0  ;;  %v1908_v12 = vpop.f32.mrf.mxu1 }
 0x1bd   : > { %v7542_v0 = vpop.f32.mrf.mxu0  ;;  %2319 = vmatmul.mubr.bf16.gmra.mxu0 %v7547_v55  ;;  %v7550_v57 = vpop.f32.mrf.mxu1  ;;  %2664 = vmatmul.mubr.bf16.gmra.mxu1 %v7547_v55 }
 0x1be   : > { %5121 = vmatprep.mubr.msk.bf16.mxu0 %vm713_vm0, %v7556_v18  ;;  %5159 = vmatprep.mubr.msk.bf16.mxu1 %vm713_vm0, %v7556_v18 }
 0x1bf   : > { %v1568_v3 = vpop.f32.mrf.mxu0  ;;  %v1913_v6 = vpop.f32.mrf.mxu1  ;;  %4720 = vperm.xlu1 %6025, %v4712_v2  }
 0x1c0   : > { %v7577_v3 = vld [vmem:[%s8382_s1 + $0xe0] ss:$8 sps:$4 sm:$0xff]   ;;  %v7586_v6 = vld [vmem:[%s8382_s1 + $0xf4] ss:$8 sps:$4 sm:$0xff]  }
 0x1c1   : > { %v7565_v30 = vpop.f32.mrf.mxu0  ;;  %v7567_v12 = vpop.f32.mrf.mxu1  ;;  %8450 = vst [vmem:[#allocation22_spill] sm:$0xff] %v7577_v3  ;;  %8451 = vst [vmem:[#allocation23_spill] sm:$0xff] %v7586_v6 }
 0x1c3   : > { %v1571_v55 = vpop.f32.mrf.mxu0  ;;  %v1916_v49 = vpop.f32.mrf.mxu1 }
 0x1c5   : > { %v7572_v32 = vpop.f32.mrf.mxu0  ;;  %2327 = vmatmul.mubr.bf16.gmra.mxu0 %v7577_v3  ;;  %v7580_v61 = vpop.f32.mrf.mxu1  ;;  %2672 = vmatmul.mubr.bf16.gmra.mxu1 %v7577_v3 }
 0x1c6   : > { %5122 = vmatprep.mubr.msk.bf16.mxu0 %vm713_vm0, %v7586_v6  ;;  %5160 = vmatprep.mubr.msk.bf16.mxu1 %vm713_vm0, %v7586_v6 }
 0x1c7   : > { %v1576_v2 = vpop.f32.mrf.mxu0  ;;  %v1921_v49 = vpop.f32.mrf.mxu1 }
 0x1c8   : > { %v6322_v49 = vld [vmem:[%s8382_s1 + $0x4] ss:$8 sps:$4 sm:$0xff]  }
 0x1c9   : > { %v7592_v55 = vpop.f32.mrf.mxu0  ;;  %v7594_v18 = vpop.f32.mrf.mxu1 }
 0x1cb   : > { %v1579_v13 = vpop.f32.mrf.mxu0  ;;  %v1924_v28 = vpop.f32.mrf.mxu1 }
 0x1cd   : > { %v7596_v3 = vpop.f32.mrf.mxu0  ;;  %2335 = vmatmul.mubr.bf16.gmra.mxu0 %v7601_v31  ;;  %v7604_v2 = vpop.f32.mrf.mxu1  ;;  %2680 = vmatmul.mubr.bf16.gmra.mxu1 %v7601_v31 }
 0x1ce   : > { %8452 = vst [vmem:[#allocation24_spill] sm:$0xff] %v7596_v3  ;;  %8454 = vst [vmem:[#allocation26_spill] sm:$0xff] %v7604_v2  ;;  %5183 = vmatprep.mubr.msk.bf16.mxu0 %vm713_vm0, %v6322_v49  ;;  %5221 = vmatprep.mubr.msk.bf16.mxu1 %vm713_vm0, %v6322_v49 }
 0x1cf   : > { %v1584_v28 = vpop.f32.mrf.mxu0  ;;  %v1929_v13 = vpop.f32.mrf.mxu1 }
 0x1d1   : > { %v7612_v6 = vpop.f32.mrf.mxu0  ;;  %v7614_v46 = vpop.f32.mrf.mxu1 }
 0x1d2   : > { %8455 = vst [vmem:[#allocation27_spill] sm:$0xff] %v7612_v6  ;;  %8456 = vst [vmem:[#allocation28_spill] sm:$0xff] %v7614_v46 }
 0x1d3   : > { %v1587_v11 = vpop.f32.mrf.mxu0  ;;  %v1932_v47 = vpop.f32.mrf.mxu1 }
 0x1d5   : > { %v1590_v7 = vpop.f32.mrf.mxu0  ;;  %2905 = vmatmul.mubr.bf16.vlgmr.msra.gmra.mxu0 %v7155_v39  ;;  %v1935_v31 = vpop.f32.mrf.mxu1  ;;  %3250 = vmatmul.mubr.bf16.vlgmr.msra.gmra.mxu1 %v7155_v39 }
 0x1d6   : > { %5184 = vmatprep.mubr.msk.bf16.mxu0 %vm713_vm0, %v7164_v20  ;;  %5222 = vmatprep.mubr.msk.bf16.mxu1 %vm713_vm0, %v7164_v20  ;;  %v1653_v13 = vmax.f32 %v7388_v44, %v1590_v7  ;;  %v1998_v63 = vmax.f32 %v7398_v34, %v1935_v31 }
 0x1d7   : > { %v1592_v16 = vpop.f32.mrf.mxu0  ;;  %v1937_v49 = vpop.f32.mrf.mxu1 }
 0x1d9   : > { %v1593_v28 = vpop.f32.mrf.mxu0  ;;  %v1938_v47 = vpop.f32.mrf.mxu1 }
 0x1da   : > { %v1654_v11 = vmax.f32 %v7412_v59, %v1593_v28  ;;  %v1999_v51 = vmax.f32 %v7414_v60, %v1938_v47 }
 0x1db   : > { %v1595_v46 = vpop.f32.mrf.mxu0  ;;  %v1940_v2 = vpop.f32.mrf.mxu1 }
 0x1dc   : > { %v1669_v39 = vmax.f32 %v1653_v13, %v1654_v11  ;;  %v2014_v6 = vmax.f32 %v1998_v63, %v1999_v51 }
 0x1dd   : > { %v1598_v3 = vpop.f32.mrf.mxu0  ;;  %2913 = vmatmul.mubr.bf16.gmra.mxu0 %v7188_v1  ;;  %v1943_v16 = vpop.f32.mrf.mxu1  ;;  %3258 = vmatmul.mubr.bf16.gmra.mxu1 %v7188_v1 }
 0x1de   : > { %5185 = vmatprep.mubr.msk.bf16.mxu0 %vm713_vm0, %v7198_v35  ;;  %5223 = vmatprep.mubr.msk.bf16.mxu1 %vm713_vm0, %v7198_v35  ;;  %v1655_v7 = vmax.f32 %v7419_v8, %v1598_v3  ;;  %v2000_v51 = vmax.f32 %v7427_v48, %v1943_v16  ;;  %v1677_v35 = vadd.f32 %v1669_v39, %v7208_v15 }
 0x1df   : > { %v1600_v20 = vpop.f32.mrf.mxu0  ;;  %v1945_v44 = vpop.f32.mrf.mxu1  ;;  %v2022_v8 = vadd.f32 %v2014_v6, %v7208_v15 }
 0x1e1   : > { %v1601_v34 = vpop.f32.mrf.mxu0  ;;  %v1946_v63 = vpop.f32.mrf.mxu1 }
 0x1e2   : > { %v1656_v59 = vmax.f32 %v7442_v19, %v1601_v34  ;;  %v2001_v60 = vmax.f32 %v7444_v23, %v1946_v63 }
 0x1e3   : > { %v1603_v46 = vpop.f32.mrf.mxu0  ;;  %v1948_v31 = vpop.f32.mrf.mxu1 }
 0x1e4   : > { %v1670_v1 = vmax.f32 %v1655_v7, %v1656_v59  ;;  %v2015_v2 = vmax.f32 %v2000_v51, %v2001_v60 }
 0x1e5   : > { %v1606_v49 = vpop.f32.mrf.mxu0  ;;  %2921 = vmatmul.mubr.bf16.gmra.mxu0 %v7222_v10  ;;  %v1951_v13 = vpop.f32.mrf.mxu1  ;;  %3266 = vmatmul.mubr.bf16.gmra.mxu1 %v7222_v10 }
 0x1e6   : > { %v1678_v28 = vadd.f32 %v1670_v1, %v7214_v26  ;;  %5186 = vmatprep.mubr.msk.bf16.mxu0 %vm713_vm0, %v7232_v33  ;;  %v2023_v48 = vadd.f32 %v2015_v2, %v7214_v26  ;;  %5224 = vmatprep.mubr.msk.bf16.mxu1 %vm713_vm0, %v7232_v33  ;;  %v1657_v39 = vmax.f32 %v7449_v45, %v1606_v49 }
 0x1e7   : > { %v1608_v19 = vpop.f32.mrf.mxu0  ;;  %v1953_v3 = vpop.f32.mrf.mxu1  ;;  %v2002_v20 = vmax.f32 %v7457_v25, %v1951_v13 }
 0x1e8   : > { %v5481_v23 = vpack.c.bf16 %v1678_v28, %v1677_v35  ;;  %v5501_v11 = vpack.c.bf16 %v2023_v48, %v2022_v8 }
 0x1e9   : > { %v1609_v47 = vpop.f32.mrf.mxu0  ;;  %v1954_v16 = vpop.f32.mrf.mxu1 }
 0x1ea   : > { %5650 = vst [vmem:[#allocation2 + $0x40] sm:$0xff] %v5481_v23   ;;  %v1658_v10 = vmax.f32 %v7472_v50, %v1609_v47  ;;  %5654 = vst [vmem:[#allocation2 + $0x60] sm:$0xff] %v5501_v11   ;;  %v2003_v6 = vmax.f32 %v7474_v17, %v1954_v16 }
 0x1eb   : > { %v1611_v44 = vpop.f32.mrf.mxu0  ;;  %v1956_v7 = vpop.f32.mrf.mxu1 }
 0x1ec   : > { %v1671_v34 = vmax.f32 %v1657_v39, %v1658_v10  ;;  %v2016_v59 = vmax.f32 %v2002_v20, %v2003_v6 }
 0x1ed   : > { %v1614_v33 = vpop.f32.mrf.mxu0  ;;  %2929 = vmatmul.mubr.bf16.gmra.mxu0 %v7254_v21  ;;  %v1959_v63 = vpop.f32.mrf.mxu1  ;;  %3274 = vmatmul.mubr.bf16.gmra.mxu1 %v7254_v21 }
 0x1ee   : > { %5187 = vmatprep.mubr.msk.bf16.mxu0 %vm713_vm0, %v7262_v22  ;;  %5225 = vmatprep.mubr.msk.bf16.mxu1 %vm713_vm0, %v7262_v22  ;;  %v1659_v17 = vmax.f32 %v7479_v54, %v1614_v33  ;;  %v2004_v46 = vmax.f32 %v7487_v9, %v1959_v63  ;;  %v1679_v22 = vadd.f32 %v1671_v34, %v7181_v53 }
 0x1ef   : > { %v1616_v45 = vpop.f32.mrf.mxu0  ;;  %v1961_v25 = vpop.f32.mrf.mxu1  ;;  %v2024_v54 = vadd.f32 %v2016_v59, %v7181_v53 }
 0x1f1   : > { %v1617_v50 = vpop.f32.mrf.mxu0  ;;  %v1962_v60 = vpop.f32.mrf.mxu1 }
 0x1f2   : > { %v1660_v51 = vmax.f32 %v7505_v62, %v1617_v50  ;;  %v2005_v1 = vmax.f32 %v7507_v36, %v1962_v60 }
 0x1f3   : > { %v1619_v31 = vpop.f32.mrf.mxu0  ;;  %v1964_v2 = vpop.f32.mrf.mxu1 }
 0x1f4   : > { %v1672_v21 = vmax.f32 %v1659_v17, %v1660_v51  ;;  %v2017_v49 = vmax.f32 %v2004_v46, %v2005_v1 }
 0x1f5   : > { %v1622_v35 = vpop.f32.mrf.mxu0  ;;  %2937 = vmatmul.mubr.bf16.gmra.mxu0 %v7282_v41  ;;  %v1967_v13 = vpop.f32.mrf.mxu1  ;;  %3282 = vmatmul.mubr.bf16.gmra.mxu1 %v7282_v41 }
 0x1f6   : > { %v1680_v28 = vadd.f32 %v1672_v21, %v7191_v5  ;;  %5188 = vmatprep.mubr.msk.bf16.mxu0 %vm713_vm0, %v7292_v24  ;;  %v2025_v9 = vadd.f32 %v2017_v49, %v7191_v5  ;;  %5226 = vmatprep.mubr.msk.bf16.mxu1 %vm713_vm0, %v7292_v24  ;;  %v1661_v23 = vmax.f32 %v7512_v58, %v1622_v35 }
 0x1f7   : > { %v1624_v62 = vpop.f32.mrf.mxu0  ;;  %v1969_v8 = vpop.f32.mrf.mxu1  ;;  %v2006_v11 = vmax.f32 %v7520_v27, %v1967_v13 }
 0x1f8   : > { %v5486_v36 = vpack.c.bf16 %v1680_v28, %v1679_v22  ;;  %v5506_v48 = vpack.c.bf16 %v2025_v9, %v2024_v54  ;;  %v8458_v9 = vld [vmem:[#allocation27_spill] sm:$0xff]  ;;  %v8459_v8 = vld [vmem:[#allocation26_spill] sm:$0xff] }
 0x1f9   : > { %v1625_v19 = vpop.f32.mrf.mxu0  ;;  %v1970_v3 = vpop.f32.mrf.mxu1 }
 0x1fa   : > { %5651 = vst [vmem:[#allocation2 + $0x48] sm:$0xff] %v5486_v36   ;;  %v1662_v41 = vmax.f32 %v7535_v14, %v1625_v19  ;;  %5655 = vst [vmem:[#allocation2 + $0x68] sm:$0xff] %v5506_v48   ;;  %v2007_v47 = vmax.f32 %v7537_v52, %v1970_v3  ;;  %v8460_v19 = vld [vmem:[#allocation28_spill] sm:$0xff] }
 0x1fb   : > { %v1627_v39 = vpop.f32.mrf.mxu0  ;;  %v1972_v16 = vpop.f32.mrf.mxu1 }
 0x1fc   : > { %v1673_v10 = vmax.f32 %v1661_v23, %v1662_v41  ;;  %v2018_v20 = vmax.f32 %v2006_v11, %v2007_v47  ;;  %v8461_v39 = vld [vmem:[#allocation10_spill] sm:$0xff]  ;;  %v8463_v16 = vld [vmem:[#allocation9_spill] sm:$0xff] }
 0x1fd   : > { %v1630_v24 = vpop.f32.mrf.mxu0  ;;  %2945 = vmatmul.mubr.bf16.gmra.mxu0 %v7314_v37  ;;  %v1975_v6 = vpop.f32.mrf.mxu1  ;;  %3290 = vmatmul.mubr.bf16.gmra.mxu1 %v7314_v37 }
 0x1fe   : > { %5189 = vmatprep.mubr.msk.bf16.mxu0 %vm713_vm0, %v7322_v38  ;;  %5227 = vmatprep.mubr.msk.bf16.mxu1 %vm713_vm0, %v7322_v38  ;;  %v1663_v52 = vmax.f32 %v7542_v0, %v1630_v24  ;;  %v2008_v7 = vmax.f32 %v7550_v57, %v1975_v6  ;;  %v1681_v38 = vadd.f32 %v1673_v10, %v7146_v4  ;;  %v8464_v6 = vld [vmem:[#allocation11_spill] sm:$0xff] }
 0x1ff   : > { %v1632_v58 = vpop.f32.mrf.mxu0  ;;  %v1977_v27 = vpop.f32.mrf.mxu1  ;;  %v2026_v0 = vadd.f32 %v2018_v20, %v7146_v4 }
 0x201   : > { %v1633_v14 = vpop.f32.mrf.mxu0  ;;  %v1978_v34 = vpop.f32.mrf.mxu1 }
 0x202   : > { %v1664_v44 = vmax.f32 %v7565_v30, %v1633_v14  ;;  %v2009_v59 = vmax.f32 %v7567_v12, %v1978_v34 }
 0x203   : > { %v1635_v33 = vpop.f32.mrf.mxu0  ;;  %v1980_v63 = vpop.f32.mrf.mxu1 }
 0x204   : > { %v1674_v37 = vmax.f32 %v1663_v52, %v1664_v44  ;;  %v2019_v45 = vmax.f32 %v2008_v7, %v2009_v59 }
 0x205   : > { %v1638_v25 = vpop.f32.mrf.mxu0  ;;  %2953 = vmatmul.mubr.bf16.gmra.mxu0 %v7342_v43  ;;  %v1983_v17 = vpop.f32.mrf.mxu1  ;;  %3298 = vmatmul.mubr.bf16.gmra.mxu1 %v7342_v43 }
 0x206   : > { %v1682_v50 = vadd.f32 %v1674_v37, %v7170_v40  ;;  %5190 = vmatprep.mubr.msk.bf16.mxu0 %vm713_vm0, %v7352_v29  ;;  %v2027_v57 = vadd.f32 %v2019_v45, %v7170_v40  ;;  %5228 = vmatprep.mubr.msk.bf16.mxu1 %vm713_vm0, %v7352_v29  ;;  %v1665_v1 = vmax.f32 %v7572_v32, %v1638_v25  ;;  %v8465_v45 = vld [vmem:[#allocation12_spill] sm:$0xff] }
 0x207   : > { %v1640_v30 = vpop.f32.mrf.mxu0  ;;  %v1985_v51 = vpop.f32.mrf.mxu1  ;;  %v2010_v21 = vmax.f32 %v7580_v61, %v1983_v17 }
 0x208   : > { %v5491_v12 = vpack.c.bf16 %v1682_v50, %v1681_v38  ;;  %v5511_v60 = vpack.c.bf16 %v2027_v57, %v2026_v0  ;;  %v8466_v38 = vld [vmem:[#allocation13_spill] sm:$0xff] }
 0x209   : > { %v1641_v46 = vpop.f32.mrf.mxu0  ;;  %v1986_v31 = vpop.f32.mrf.mxu1  ;;  %v6187_v51 = vld [vmem:[#allocation2 + $0x38] sm:$0xff]  }
 0x20a   : > { %5652 = vst [vmem:[#allocation2 + $0x50] sm:$0xff] %v5491_v12   ;;  %v1666_v43 = vmax.f32 %v7592_v55, %v1641_v46  ;;  %5656 = vst [vmem:[#allocation2 + $0x70] sm:$0xff] %v5511_v60   ;;  %v2011_v2 = vmax.f32 %v7594_v18, %v1986_v31  ;;  %v8457_v18 = vld [vmem:[#allocation24_spill] sm:$0xff] }
 0x20b   : > { %v1643_v49 = vpop.f32.mrf.mxu0  ;;  %v1988_v22 = vpop.f32.mrf.mxu1 }
 0x20c   : > { %v1675_v35 = vmax.f32 %v1665_v1, %v1666_v43  ;;  %v2020_v28 = vmax.f32 %v2010_v21, %v2011_v2  ;;  %v8467_v1 = vld [vmem:[#allocation14_spill] sm:$0xff]  ;;  %v6189_v2 = vld [vmem:[#allocation2 + $0x30] sm:$0xff]   ;;  %v8468_v22 = vld [vmem:[#allocation15_spill] sm:$0xff] }
 0x20d   : > { %v1646_v29 = vpop.f32.mrf.mxu0  ;;  %2961 = vmatmul.mubr.bf16.gmra.mxu0 %v7371_v42  ;;  %v1991_v13 = vpop.f32.mrf.mxu1  ;;  %3306 = vmatmul.mubr.bf16.gmra.mxu1 %v7371_v42 }
 0x20e   : > { %5191 = vmatprep.mubr.msk.bf16.mxu0 %vm713_vm0, %v7378_v56  ;;  %5229 = vmatprep.mubr.msk.bf16.mxu1 %vm713_vm0, %v7378_v56  ;;  %v1667_v54 = vmax.f32 %v8457_v18, %v1646_v29  ;;  %v2012_v48 = vmax.f32 %v8459_v8, %v1991_v13  ;;  %v8462_v56 = vld [vmem:[#allocation8_spill] sm:$0xff] }
 0x20f   : > { %v1648_v32 = vpop.f32.mrf.mxu0  ;;  %v1993_v61 = vpop.f32.mrf.mxu1  ;;  %v1683_v10 = vadd.f32 %v1675_v35, %v8462_v56  ;;  %v2028_v58 = vadd.f32 %v2020_v28, %v8462_v56  ;;  %v6190_v35 = vld [vmem:[#allocation2 + $0x68] sm:$0xff]  }
 0x210   : > { %v6191_v32 = vld [vmem:[#allocation2 + $0x28] sm:$0xff]  }
 0x211   : > { %v1649_v55 = vpop.f32.mrf.mxu0  ;;  %v1994_v36 = vpop.f32.mrf.mxu1  ;;  %v6188_v43 = vld [vmem:[#allocation2 + $0x70] sm:$0xff]  }
 0x212   : > { %v1668_v62 = vmax.f32 %v8458_v9, %v1649_v55  ;;  %v2013_v23 = vmax.f32 %v8460_v19, %v1994_v36  ;;  %v8469_v18 = vld [vmem:[#allocation16_spill] sm:$0xff]  ;;  %v6193_v36 = vld [vmem:[#allocation2 + $0x20] sm:$0xff]   ;;  %v8470_v19 = vld [vmem:[#allocation17_spill] sm:$0xff] }
 0x213   : > { %v1651_v41 = vpop.f32.mrf.mxu0  ;;  %v1996_v3 = vpop.f32.mrf.mxu1 }
 0x214   : > { %v1676_v42 = vmax.f32 %v1667_v54, %v1668_v62  ;;  %v2021_v11 = vmax.f32 %v2012_v48, %v2013_v23  ;;  %v6192_v54 = vld [vmem:[#allocation2 + $0x60] sm:$0xff]   ;;  %v6195_v3 = vld [vmem:[#allocation2 + $0x18] sm:$0xff]  }
 0x215   : > { %v7708_v47 = vpop.f32.mrf.mxu0  ;;  %2969 = vmatmul.mubr.bf16.gmra.mxu0 %v8461_v39  ;;  %v7713_v24 = vpop.f32.mrf.mxu1  ;;  %3314 = vmatmul.mubr.bf16.gmra.mxu1 %v8461_v39 }
 0x216   : > { %v1684_v20 = vadd.f32 %v1676_v42, %v8463_v16  ;;  %5192 = vmatprep.mubr.msk.bf16.mxu0 %vm713_vm0, %v8464_v6  ;;  %v2029_v27 = vadd.f32 %v2021_v11, %v8463_v16  ;;  %5230 = vmatprep.mubr.msk.bf16.mxu1 %vm713_vm0, %v8464_v6 }
 0x217   : > { %v2218_v14 = vpop.f32.mrf.mxu0  ;;  %v2563_v44 = vpop.f32.mrf.mxu1 }
 0x218   : > { %v5496_v52 = vpack.c.bf16 %v1684_v20, %v1683_v10  ;;  %v5516_v34 = vpack.c.bf16 %v2029_v27, %v2028_v58  ;;  %v8471_v10 = vld [vmem:[#allocation18_spill] sm:$0xff]  ;;  %v6196_v20 = vld [vmem:[#allocation2 + $0x50] sm:$0xff]   ;;  %v8472_v44 = vld [vmem:[#allocation19_spill] sm:$0xff] }
 0x219   : > { %v7722_v7 = vpop.f32.mrf.mxu0  ;;  %v7724_v59 = vpop.f32.mrf.mxu1  ;;  %v6197_v27 = vld [vmem:[#allocation2 + $0x10] sm:$0xff]  }
 0x21a   : > { %5653 = vst [vmem:[#allocation2 + $0x58] sm:$0xff] %v5496_v52   ;;  %5657 = vst [vmem:[#allocation2 + $0x78] sm:$0xff] %v5516_v34   ;;  %v6198_v52 = vld [vmem:[#allocation2 + $0x48] sm:$0xff]  }
 0x21b   : > { %v2221_v33 = vpop.f32.mrf.mxu0  ;;  %v2566_v37 = vpop.f32.mrf.mxu1 }
 0x21d   : > { %v7726_v63 = vpop.f32.mrf.mxu0  ;;  %2977 = vmatmul.mubr.bf16.gmra.mxu0 %v8465_v45  ;;  %v7729_v25 = vpop.f32.mrf.mxu1  ;;  %3322 = vmatmul.mubr.bf16.gmra.mxu1 %v8465_v45  ;;  %v6199_v45 = vld [vmem:[#allocation2 + $0x8] sm:$0xff]  }
 0x21e   : > { %5193 = vmatprep.mubr.msk.bf16.mxu0 %vm713_vm0, %v8466_v38  ;;  %5231 = vmatprep.mubr.msk.bf16.mxu1 %vm713_vm0, %v8466_v38 }
 0x21f   : > { %v2226_v50 = vpop.f32.mrf.mxu0  ;;  %v2571_v17 = vpop.f32.mrf.mxu1 }
 0x220   : > { %v8473_v17 = vld [vmem:[#allocation20_spill] sm:$0xff] }
 0x221   : > { %v7736_v0 = vpop.f32.mrf.mxu0  ;;  %v7738_v57 = vpop.f32.mrf.mxu1  ;;  %v6186_v30 = vld [vmem:[#allocation2 + $0x78] sm:$0xff]  }
 0x222   : > { %5682 = vmatprep.subr.bf16.mxu0 %v6186_v30  ;;  %5965 = vmatprep.subr.bf16.mxu1 %v6186_v30  ;;  %v6194_v48 = vld [vmem:[#allocation2 + $0x58] sm:$0xff]   ;;  %v6200_v30 = vld [vmem:[#allocation2 + $0x40] sm:$0xff]  }
 0x223   : > { %v2229_v12 = vpop.f32.mrf.mxu0  ;;  %v2574_v60 = vpop.f32.mrf.mxu1  ;;  %5973 = vmatpush3.bf16.msra.mxu1 %v6187_v51  ;;  %5683 = vmatpush3.bf16.msra.mxu0 %v6187_v51 }
 0x224   : > { %5684 = vmatprep.subr.bf16.mxu0 %v6188_v43  ;;  %5966 = vmatprep.subr.bf16.mxu1 %v6188_v43  ;;  %v6201_v60 = vld [vmem:[#allocation2] sm:$0xff]   ;;  %v8474_v43 = vld [vmem:[#allocation21_spill] sm:$0xff] }
 0x225   : > { %v7740_v46 = vpop.f32.mrf.mxu0  ;;  %2985 = vmatmul.mubr.bf16.gmra.mxu0 %v8467_v1  ;;  %v7743_v31 = vpop.f32.mrf.mxu1  ;;  %3330 = vmatmul.mubr.bf16.gmra.mxu1 %v8467_v1 }
 0x226   : > { %5194 = vmatprep.mubr.msk.bf16.mxu0 %vm713_vm0, %v8468_v22  ;;  %5232 = vmatprep.mubr.msk.bf16.mxu1 %vm713_vm0, %v8468_v22 }
 0x227   : > { %v2234_v21 = vpop.f32.mrf.mxu0  ;;  %v2579_v49 = vpop.f32.mrf.mxu1  ;;  %5974 = vmatpush3.bf16.msra.mxu1 %v6189_v2  ;;  %5685 = vmatpush3.bf16.msra.mxu0 %v6189_v2 }
 0x228   : > { %5967 = vmatprep.subr.bf16.mxu1 %v6190_v35  ;;  %5686 = vmatprep.subr.bf16.mxu0 %v6190_v35 }
 0x229   : > { %v7750_v28 = vpop.f32.mrf.mxu0  ;;  %v7752_v29 = vpop.f32.mrf.mxu1 }
 0x22b   : > { %v2237_v13 = vpop.f32.mrf.mxu0  ;;  %v2582_v61 = vpop.f32.mrf.mxu1  ;;  %5975 = vmatpush3.bf16.msra.mxu1 %v6191_v32  ;;  %5687 = vmatpush3.bf16.msra.mxu0 %v6191_v32 }
 0x22c   : > { %5688 = vmatprep.subr.bf16.mxu0 %v6192_v54  ;;  %5968 = vmatprep.subr.bf16.mxu1 %v6192_v54  ;;  %v8475_v13 = vld [vmem:[#allocation22_spill] sm:$0xff]  ;;  %v8476_v61 = vld [vmem:[#allocation23_spill] sm:$0xff] }
 0x22d   : > { %v7754_v55 = vpop.f32.mrf.mxu0  ;;  %2993 = vmatmul.mubr.bf16.gmra.mxu0 %v8469_v18  ;;  %v7757_v9 = vpop.f32.mrf.mxu1  ;;  %3338 = vmatmul.mubr.bf16.gmra.mxu1 %v8469_v18 }
 0x22e   : > { %5195 = vmatprep.mubr.msk.bf16.mxu0 %vm713_vm0, %v8470_v19  ;;  %5233 = vmatprep.mubr.msk.bf16.mxu1 %vm713_vm0, %v8470_v19  ;;  %v7818_v19 = vld [vmem:[%s8383_s2 + $0x84] ss:$8 sps:$4 sm:$0xff]  }
 0x22f   : > { %v2242_v62 = vpop.f32.mrf.mxu0  ;;  %v2587_v8 = vpop.f32.mrf.mxu1  ;;  %5976 = vmatpush3.bf16.msra.mxu1 %v6193_v36  ;;  %5689 = vmatpush3.bf16.msra.mxu0 %v6193_v36 }
 0x230   : > { %5969 = vmatprep.subr.bf16.mxu1 %v6194_v48  ;;  %5690 = vmatprep.subr.bf16.mxu0 %v6194_v48  ;;  %v7813_v8 = vld [vmem:[%s8383_s2 + $0x4] ss:$8 sps:$4 sm:$0xff]  }
 0x231   : > { %v7764_v23 = vpop.f32.mrf.mxu0  ;;  %v7766_v41 = vpop.f32.mrf.mxu1 }
 0x233   : > { %v2245_v42 = vpop.f32.mrf.mxu0  ;;  %v2590_v11 = vpop.f32.mrf.mxu1  ;;  %5977 = vmatpush3.bf16.msra.mxu1 %v6195_v3  ;;  %5691 = vmatpush3.bf16.msra.mxu0 %v6195_v3 }
 0x234   : > { %5692 = vmatprep.subr.bf16.mxu0 %v6196_v20  ;;  %5970 = vmatprep.subr.bf16.mxu1 %v6196_v20  ;;  %v8477_v11 = vld [vmem:[#allocation25_spill] sm:$0xff] }
 0x235   : > { %v7768_v39 = vpop.f32.mrf.mxu0  ;;  %3001 = vmatmul.mubr.bf16.gmra.mxu0 %v8471_v10  ;;  %v7771_v6 = vpop.f32.mrf.mxu1  ;;  %3346 = vmatmul.mubr.bf16.gmra.mxu1 %v8471_v10 }
 0x236   : > { %5196 = vmatprep.mubr.msk.bf16.mxu0 %vm713_vm0, %v8472_v44  ;;  %5234 = vmatprep.mubr.msk.bf16.mxu1 %vm713_vm0, %v8472_v44  ;;  %v7840_v44 = vld [vmem:[%s8383_s2 + $0x14] ss:$8 sps:$4 sm:$0xff]  }
 0x237   : > { %v2250_v58 = vpop.f32.mrf.mxu0  ;;  %v2595_v14 = vpop.f32.mrf.mxu1  ;;  %5978 = vmatpush3.bf16.msra.mxu1 %v6197_v27  ;;  %5693 = vmatpush3.bf16.msra.mxu0 %v6197_v27 }
 0x238   : > { %5971 = vmatprep.subr.bf16.mxu1 %v6198_v52  ;;  %5694 = vmatprep.subr.bf16.mxu0 %v6198_v52  ;;  %v7833_v14 = vld [vmem:[%s8383_s2] ss:$8 sps:$4 sm:$0xff]  }
 0x239   : > { %v7778_v34 = vpop.f32.mrf.mxu0  ;;  %v7780_v33 = vpop.f32.mrf.mxu1 }
 0x23b   : > { %v2253_v37 = vpop.f32.mrf.mxu0  ;;  %v2598_v38 = vpop.f32.mrf.mxu1  ;;  %5979 = vmatpush3.bf16.msra.mxu1 %v6199_v45  ;;  %5695 = vmatpush3.bf16.msra.mxu0 %v6199_v45 }
 0x23c   : > { %5696 = vmatprep.subr.bf16.mxu0 %v6200_v30  ;;  %5972 = vmatprep.subr.bf16.mxu1 %v6200_v30  ;;  %v7845_v37 = vld [vmem:[%s8383_s2 + $0x80] ss:$8 sps:$4 sm:$0xff]   ;;  %v7850_v38 = vld [vmem:[%s8383_s2 + $0x94] ss:$8 sps:$4 sm:$0xff]  }
 0x23d   : > { %v7782_v50 = vpop.f32.mrf.mxu0  ;;  %3009 = vmatmul.mubr.bf16.gmra.mxu0 %v8473_v17  ;;  %v7785_v12 = vpop.f32.mrf.mxu1  ;;  %3354 = vmatmul.mubr.bf16.gmra.mxu1 %v8473_v17 }
 0x23e   : > { %5197 = vmatprep.mubr.msk.bf16.mxu0 %vm713_vm0, %v8474_v43  ;;  %5235 = vmatprep.mubr.msk.bf16.mxu1 %vm713_vm0, %v8474_v43 }
 0x23f   : > { %v2258_v51 = vpop.f32.mrf.mxu0  ;;  %v2603_v1 = vpop.f32.mrf.mxu1  ;;  %5980 = vmatpush3.bf16.msra.mxu1 %v6201_v60  ;;  %5697 = vmatpush3.bf16.msra.mxu0 %v6201_v60 }
 0x241   : > { %v7792_v21 = vpop.f32.mrf.mxu0  ;;  %v7794_v2 = vpop.f32.mrf.mxu1 }
 0x243   : > { %v2261_v49 = vpop.f32.mrf.mxu0  ;;  %v2606_v35 = vpop.f32.mrf.mxu1 }
 0x244   : > { %v7859_v49 = vld [vmem:[%s8383_s2 + $0x10] ss:$8 sps:$4 sm:$0xff]  }
 0x245   : > { %v7796_v22 = vpop.f32.mrf.mxu0  ;;  %3017 = vmatmul.mubr.bf16.gmra.mxu0 %v8475_v13  ;;  %v7799_v32 = vpop.f32.mrf.mxu1  ;;  %3362 = vmatmul.mubr.bf16.gmra.mxu1 %v8475_v13 }
 0x246   : > { %5198 = vmatprep.mubr.msk.bf16.mxu0 %vm713_vm0, %v8476_v61  ;;  %5236 = vmatprep.mubr.msk.bf16.mxu1 %vm713_vm0, %v8476_v61 }
 0x247   : > { %v2266_v18 = vpop.f32.mrf.mxu0  ;;  %v2611_v54 = vpop.f32.mrf.mxu1 }
 0x248   : > { %v7866_v18 = vld [vmem:[%s8383_s2 + $0x24] ss:$8 sps:$4 sm:$0xff]   ;;  %v7871_v54 = vld [vmem:[%s8383_s2 + $0x90] ss:$8 sps:$4 sm:$0xff]  }
 0x249   : > { %v7806_v62 = vpop.f32.mrf.mxu0  ;;  %v7808_v36 = vpop.f32.mrf.mxu1 }
 0x24b   : > { %v2269_v48 = vpop.f32.mrf.mxu0  ;;  %v2614_v42 = vpop.f32.mrf.mxu1 }
 0x24d   : > { %v7820_v3 = vpop.f32.mrf.mxu0  ;;  %3025 = vmatmul.mubr.bf16.gmra.mxu0 %v8477_v11  ;;  %v7823_v10 = vpop.f32.mrf.mxu1  ;;  %3370 = vmatmul.mubr.bf16.gmra.mxu1 %v8477_v11 }
 0x24e   : > { %3730 = vmatprep.mubr.bf16.mxu0 %v7813_v8  ;;  %3794 = vmatprep.mubr.bf16.mxu1 %v7818_v19 }
 0x24f   : > { %v2274_v20 = vpop.f32.mrf.mxu0  ;;  %v2619_v58 = vpop.f32.mrf.mxu1 }
 0x251   : > { %v7828_v27 = vpop.f32.mrf.mxu0  ;;  %v7835_v52 = vpop.f32.mrf.mxu1 }
 0x253   : > { %v2277_v45 = vpop.f32.mrf.mxu0  ;;  %v2622_v17 = vpop.f32.mrf.mxu1 }
 0x255   : > { %v2280_v30 = vpop.f32.mrf.mxu0  ;;  %3731 = vmatmul.mubr.bf16.vlgmr.msra.gmra.mxu0 %v7833_v14  ;;  %v2625_v51 = vpop.f32.mrf.mxu1  ;;  %3795 = vmatmul.mubr.bf16.vlgmr.msra.gmra.mxu1 %v7845_v37 }
 0x256   : > { %3738 = vmatprep.mubr.bf16.mxu0 %v7840_v44  ;;  %3802 = vmatprep.mubr.bf16.mxu1 %v7850_v38  ;;  %v2343_v35 = vmax.f32 %v7708_v47, %v2280_v30  ;;  %v2688_v48 = vmax.f32 %v7713_v24, %v2625_v51  ;;  %v7878_v47 = vld [vmem:[%s8383_s2 + $0xa4] ss:$8 sps:$4 sm:$0xff]   ;;  %v7887_v51 = vld [vmem:[%s8383_s2 + $0x20] ss:$8 sps:$4 sm:$0xff]  }
 0x257   : > { %v2282_v60 = vpop.f32.mrf.mxu0  ;;  %v2627_v1 = vpop.f32.mrf.mxu1 }
 0x259   : > { %v2283_v43 = vpop.f32.mrf.mxu0  ;;  %v2628_v61 = vpop.f32.mrf.mxu1 }
 0x25a   : > { %v2344_v13 = vmax.f32 %v7722_v7, %v2283_v43  ;;  %v2689_v42 = vmax.f32 %v7724_v59, %v2628_v61 }
 0x25b   : > { %v2285_v11 = vpop.f32.mrf.mxu0  ;;  %v2630_v20 = vpop.f32.mrf.mxu1 }
 0x25c   : > { %v2359_v7 = vmax.f32 %v2343_v35, %v2344_v13  ;;  %v2704_v58 = vmax.f32 %v2688_v48, %v2689_v42  ;;  %v7894_v35 = vld [vmem:[%s8383_s2 + $0x34] ss:$8 sps:$4 sm:$0xff]   ;;  %v7899_v13 = vld [vmem:[%s8383_s2 + $0xa0] ss:$8 sps:$4 sm:$0xff]  }
 0x25d   : > { %v2288_v45 = vpop.f32.mrf.mxu0  ;;  %3739 = vmatmul.mubr.bf16.gmra.mxu0 %v7859_v49  ;;  %v2633_v17 = vpop.f32.mrf.mxu1  ;;  %3803 = vmatmul.mubr.bf16.gmra.mxu1 %v7871_v54  ;;  %8478 = vst [vmem:[#allocation24_spill] sm:$0xff] %v7899_v13 }
 0x25e   : > { %3746 = vmatprep.mubr.bf16.mxu0 %v7866_v18  ;;  %3810 = vmatprep.mubr.bf16.mxu1 %v7878_v47  ;;  %v2345_v60 = vmax.f32 %v7726_v63, %v2288_v45  ;;  %v2690_v61 = vmax.f32 %v7729_v25, %v2633_v17  ;;  %v7906_v63 = vld [vmem:[%s8383_s2 + $0xb4] ss:$8 sps:$4 sm:$0xff]   ;;  %v2712_v25 = vadd.f32 %v2704_v58, %v7208_v15 }
 0x25f   : > { %v2290_v24 = vpop.f32.mrf.mxu0  ;;  %v2635_v59 = vpop.f32.mrf.mxu1  ;;  %8479 = vst [vmem:[#allocation27_spill] sm:$0xff] %v7906_v63 }
 0x260   : > { %v2367_v24 = vadd.f32 %v2359_v7, %v7208_v15  ;;  %v7919_v7 = vld [vmem:[%s8383_s2 + $0x30] ss:$8 sps:$4 sm:$0xff]  }
 0x261   : > { %v2291_v30 = vpop.f32.mrf.mxu0  ;;  %v2636_v43 = vpop.f32.mrf.mxu1 }
 0x262   : > { %v2346_v1 = vmax.f32 %v7736_v0, %v2291_v30  ;;  %v2691_v48 = vmax.f32 %v7738_v57, %v2636_v43 }
 0x263   : > { %v2293_v42 = vpop.f32.mrf.mxu0  ;;  %v2638_v11 = vpop.f32.mrf.mxu1 }
 0x264   : > { %v2360_v0 = vmax.f32 %v2345_v60, %v2346_v1  ;;  %v2705_v20 = vmax.f32 %v2690_v61, %v2691_v48  ;;  %v7931_v11 = vld [vmem:[%s8383_s2 + $0xb0] ss:$8 sps:$4 sm:$0xff]  }
 0x265   : > { %v2296_v45 = vpop.f32.mrf.mxu0  ;;  %3747 = vmatmul.mubr.bf16.gmra.mxu0 %v7887_v51  ;;  %v2641_v30 = vpop.f32.mrf.mxu1  ;;  %3811 = vmatmul.mubr.bf16.gmra.mxu1 %v7899_v13  ;;  %8480 = vst [vmem:[#allocation26_spill] sm:$0xff] %v7931_v11 }
 0x266   : > { %v2368_v59 = vadd.f32 %v2360_v0, %v7214_v26  ;;  %3754 = vmatprep.mubr.bf16.mxu0 %v7894_v35  ;;  %v2713_v57 = vadd.f32 %v2705_v20, %v7214_v26  ;;  %3818 = vmatprep.mubr.bf16.mxu1 %v7906_v63  ;;  %v2347_v48 = vmax.f32 %v7740_v46, %v2296_v45  ;;  %v7926_v0 = vld [vmem:[%s8383_s2 + $0x44] ss:$8 sps:$4 sm:$0xff]  }
 0x267   : > { %v2298_v17 = vpop.f32.mrf.mxu0  ;;  %v2643_v1 = vpop.f32.mrf.mxu1  ;;  %v2692_v20 = vmax.f32 %v7743_v31, %v2641_v30  ;;  %v7942_v31 = vld [vmem:[%s8383_s2 + $0x40] ss:$8 sps:$4 sm:$0xff]  }
 0x268   : > { %v5521_v60 = vpack.c.bf16 %v2368_v59, %v2367_v24  ;;  %v5541_v43 = vpack.c.bf16 %v2713_v57, %v2712_v25 }
 0x269   : > { %v2299_v61 = vpop.f32.mrf.mxu0  ;;  %v2644_v58 = vpop.f32.mrf.mxu1 }
 0x26a   : > { %5658 = vst [vmem:[#allocation2 + $0x80] sm:$0xff] %v5521_v60   ;;  %v2348_v42 = vmax.f32 %v7750_v28, %v2299_v61  ;;  %5662 = vst [vmem:[#allocation2 + $0xa0] sm:$0xff] %v5541_v43   ;;  %v2693_v24 = vmax.f32 %v7752_v29, %v2644_v58  ;;  %v7949_v61 = vld [vmem:[%s8383_s2 + $0x54] ss:$8 sps:$4 sm:$0xff]  }
 0x26b   : > { %v2301_v59 = vpop.f32.mrf.mxu0  ;;  %v2646_v45 = vpop.f32.mrf.mxu1 }
 0x26c   : > { %v2361_v46 = vmax.f32 %v2347_v48, %v2348_v42  ;;  %v2706_v28 = vmax.f32 %v2692_v20, %v2693_v24 }
 0x26d   : > { %v2304_v25 = vpop.f32.mrf.mxu0  ;;  %3755 = vmatmul.mubr.bf16.gmra.mxu0 %v7919_v7  ;;  %v2649_v57 = vpop.f32.mrf.mxu1  ;;  %3819 = vmatmul.mubr.bf16.gmra.mxu1 %v7931_v11 }
 0x26e   : > { %3762 = vmatprep.mubr.bf16.mxu0 %v7926_v0  ;;  %4071 = vmatprep.mubr.bf16.mxu1 %v7813_v8  ;;  %v2349_v29 = vmax.f32 %v7754_v55, %v2304_v25  ;;  %v2694_v48 = vmax.f32 %v7757_v9, %v2649_v57  ;;  %v2369_v55 = vadd.f32 %v2361_v46, %v7181_v53 }
 0x26f   : > { %v2306_v17 = vpop.f32.mrf.mxu0  ;;  %v2651_v60 = vpop.f32.mrf.mxu1 }
 0x270   : > { %v2714_v17 = vadd.f32 %v2706_v28, %v7181_v53  ;;  %v7969_v28 = vld [vmem:[%s8383_s2 + $0x64] ss:$8 sps:$4 sm:$0xff]  }
 0x271   : > { %v2307_v1 = vpop.f32.mrf.mxu0  ;;  %v2652_v43 = vpop.f32.mrf.mxu1 }
 0x272   : > { %v2350_v30 = vmax.f32 %v7764_v23, %v2307_v1  ;;  %v2695_v42 = vmax.f32 %v7766_v41, %v2652_v43 }
 0x273   : > { %v2309_v58 = vpop.f32.mrf.mxu0  ;;  %v2654_v24 = vpop.f32.mrf.mxu1 }
 0x274   : > { %v2362_v20 = vmax.f32 %v2349_v29, %v2350_v30  ;;  %v2707_v59 = vmax.f32 %v2694_v48, %v2695_v42  ;;  %v7962_v30 = vld [vmem:[%s8383_s2 + $0x50] ss:$8 sps:$4 sm:$0xff]  }
 0x275   : > { %v2312_v45 = vpop.f32.mrf.mxu0  ;;  %3763 = vmatmul.mubr.bf16.gmra.mxu0 %v7942_v31  ;;  %v2657_v25 = vpop.f32.mrf.mxu1 }
 0x276   : > { %v2370_v23 = vadd.f32 %v2362_v20, %v7191_v5  ;;  %3770 = vmatprep.mubr.bf16.mxu0 %v7949_v61  ;;  %v2715_v9 = vadd.f32 %v2707_v59, %v7191_v5  ;;  %v2351_v46 = vmax.f32 %v7768_v39, %v2312_v45  ;;  %v2696_v42 = vmax.f32 %v7771_v6, %v2657_v25 }
 0x277   : > { %v2314_v57 = vpop.f32.mrf.mxu0  ;;  %v2659_v60 = vpop.f32.mrf.mxu1 }
 0x278   : > { %v5526_v41 = vpack.c.bf16 %v2370_v23, %v2369_v55  ;;  %v5546_v1 = vpack.c.bf16 %v2715_v9, %v2714_v17  ;;  %v7978_v9 = vld [vmem:[%s8383_s2 + $0x60] ss:$8 sps:$4 sm:$0xff]   ;;  %v7985_v57 = vld [vmem:[%s8383_s2 + $0x74] ss:$8 sps:$4 sm:$0xff]  }
 0x279   : > { %v2315_v29 = vpop.f32.mrf.mxu0  ;;  %v2660_v48 = vpop.f32.mrf.mxu1 }
 0x27a   : > { %5659 = vst [vmem:[#allocation2 + $0x88] sm:$0xff] %v5526_v41   ;;  %v2352_v43 = vmax.f32 %v7778_v34, %v2315_v29  ;;  %5663 = vst [vmem:[#allocation2 + $0xa8] sm:$0xff] %v5546_v1   ;;  %v2697_v58 = vmax.f32 %v7780_v33, %v2660_v48 }
 0x27b   : > { %v2317_v20 = vpop.f32.mrf.mxu0  ;;  %v2662_v59 = vpop.f32.mrf.mxu1 }
 0x27c   : > { %v2363_v24 = vmax.f32 %v2351_v46, %v2352_v43  ;;  %v2708_v55 = vmax.f32 %v2696_v42, %v2697_v58 }
 0x27d   : > { %v2320_v23 = vpop.f32.mrf.mxu0  ;;  %3771 = vmatmul.mubr.bf16.gmra.mxu0 %v7962_v30  ;;  %v2665_v39 = vpop.f32.mrf.mxu1 }
 0x27e   : > { %3778 = vmatprep.mubr.bf16.mxu0 %v7969_v28  ;;  %v2353_v6 = vmax.f32 %v7782_v50, %v2320_v23  ;;  %v2698_v41 = vmax.f32 %v7785_v12, %v2665_v39  ;;  %v2371_v50 = vadd.f32 %v2363_v24, %v7146_v4  ;;  %v2716_v58 = vadd.f32 %v2708_v55, %v7146_v4 }
 0x27f   : > { %v2322_v34 = vpop.f32.mrf.mxu0  ;;  %v2667_v45 = vpop.f32.mrf.mxu1 }
 0x280   : > { %v7998_v34 = vld [vmem:[%s8383_s2 + $0x70] ss:$8 sps:$4 sm:$0xff]  }
 0x281   : > { %v2323_v17 = vpop.f32.mrf.mxu0  ;;  %v2668_v25 = vpop.f32.mrf.mxu1 }
 0x282   : > { %v2354_v33 = vmax.f32 %v7792_v21, %v2323_v17  ;;  %v2699_v60 = vmax.f32 %v7794_v2, %v2668_v25 }
 0x283   : > { %v2325_v1 = vpop.f32.mrf.mxu0  ;;  %v2670_v46 = vpop.f32.mrf.mxu1 }
 0x284   : > { %v2364_v29 = vmax.f32 %v2353_v6, %v2354_v33  ;;  %v2709_v43 = vmax.f32 %v2698_v41, %v2699_v60 }
 0x285   : > { %v2328_v48 = vpop.f32.mrf.mxu0  ;;  %3779 = vmatmul.mubr.bf16.gmra.mxu0 %v7978_v9  ;;  %v2673_v42 = vpop.f32.mrf.mxu1 }
 0x286   : > { %v2372_v21 = vadd.f32 %v2364_v29, %v7170_v40  ;;  %3786 = vmatprep.mubr.bf16.mxu0 %v7985_v57  ;;  %v2717_v12 = vadd.f32 %v2709_v43, %v7170_v40  ;;  %v2355_v24 = vmax.f32 %v7796_v22, %v2328_v48  ;;  %v2700_v55 = vmax.f32 %v7799_v32, %v2673_v42 }
 0x287   : > { %v2330_v20 = vpop.f32.mrf.mxu0  ;;  %v2675_v59 = vpop.f32.mrf.mxu1 }
 0x288   : > { %v5531_v2 = vpack.c.bf16 %v2372_v21, %v2371_v50  ;;  %v5551_v23 = vpack.c.bf16 %v2717_v12, %v2716_v58 }
 0x289   : > { %v2331_v39 = vpop.f32.mrf.mxu0  ;;  %v2676_v17 = vpop.f32.mrf.mxu1 }
 0x28a   : > { %5660 = vst [vmem:[#allocation2 + $0x90] sm:$0xff] %v5531_v2   ;;  %v2356_v45 = vmax.f32 %v7806_v62, %v2331_v39  ;;  %5664 = vst [vmem:[#allocation2 + $0xb0] sm:$0xff] %v5551_v23   ;;  %v2701_v6 = vmax.f32 %v7808_v36, %v2676_v17 }
 0x28b   : > { %v2333_v33 = vpop.f32.mrf.mxu0  ;;  %v2678_v41 = vpop.f32.mrf.mxu1 }
 0x28c   : > { %v2365_v25 = vmax.f32 %v2355_v24, %v2356_v45  ;;  %v2710_v60 = vmax.f32 %v2700_v55, %v2701_v6 }
 0x28d   : > { %v2336_v1 = vpop.f32.mrf.mxu0  ;;  %3787 = vmatmul.mubr.bf16.gmra.mxu0 %v7998_v34  ;;  %v2681_v29 = vpop.f32.mrf.mxu1 }
 0x28e   : > { %4382 = vmatprep.mubr.bf16.mxu0 %v7813_v8  ;;  %v2357_v62 = vmax.f32 %v7820_v3, %v2336_v1  ;;  %v2702_v36 = vmax.f32 %v7823_v10, %v2681_v29  ;;  %v2373_v8 = vadd.f32 %v2365_v25, %v8462_v56  ;;  %v2718_v3 = vadd.f32 %v2710_v60, %v8462_v56 }
 0x28f   : > { %v2338_v46 = vpop.f32.mrf.mxu0  ;;  %v2683_v22 = vpop.f32.mrf.mxu1 }
 0x290   : > { %v6239_v22 = vld [vmem:[#allocation2 + $0x78] sm:$0xff]  }
 0x291   : > { %v2339_v43 = vpop.f32.mrf.mxu0  ;;  %v2684_v32 = vpop.f32.mrf.mxu1 }
 0x292   : > { %v2358_v48 = vmax.f32 %v7828_v27, %v2339_v43  ;;  %v2703_v50 = vmax.f32 %v7835_v52, %v2684_v32 }
 0x293   : > { %v2341_v21 = vpop.f32.mrf.mxu0  ;;  %v2686_v58 = vpop.f32.mrf.mxu1 }
 0x294   : > { %v2366_v42 = vmax.f32 %v2357_v62, %v2358_v48  ;;  %v2711_v12 = vmax.f32 %v2702_v36, %v2703_v50  ;;  %v6240_v62 = vld [vmem:[#allocation2 + $0xb0] sm:$0xff]  }
 0x295   : > { %v8010_v20 = vpop.f32.mrf.mxu0  ;;  %v8014_v59 = vpop.f32.mrf.mxu1  ;;  %v6241_v50 = vld [vmem:[#allocation2 + $0x70] sm:$0xff]  }
 0x296   : > { %v2374_v2 = vadd.f32 %v2366_v42, %v8463_v16  ;;  %v2719_v27 = vadd.f32 %v2711_v12, %v8463_v16  ;;  %v6242_v42 = vld [vmem:[#allocation2 + $0xa8] sm:$0xff]  }
 0x297   : > { %v2908_v23 = vpop.f32.mrf.mxu0  ;;  %v3253_v39 = vpop.f32.mrf.mxu1 }
 0x298   : > { %v5536_v10 = vpack.c.bf16 %v2374_v2, %v2373_v8  ;;  %v5556_v52 = vpack.c.bf16 %v2719_v27, %v2718_v3  ;;  %v6243_v2 = vld [vmem:[#allocation2 + $0x68] sm:$0xff]   ;;  %v6244_v27 = vld [vmem:[#allocation2 + $0xa0] sm:$0xff]  }
 0x299   : > { %v8018_v24 = vpop.f32.mrf.mxu0  ;;  %v8020_v45 = vpop.f32.mrf.mxu1 }
 0x29a   : > { %5661 = vst [vmem:[#allocation2 + $0x98] sm:$0xff] %v5536_v10   ;;  %5665 = vst [vmem:[#allocation2 + $0xb8] sm:$0xff] %v5556_v52   ;;  %v6245_v52 = vld [vmem:[#allocation2 + $0x60] sm:$0xff]  }
 0x29b   : > { %v2911_v17 = vpop.f32.mrf.mxu0  ;;  %v3256_v55 = vpop.f32.mrf.mxu1 }
 0x29d   : > { %v8022_v6 = vpop.f32.mrf.mxu0  ;;  %v8024_v33 = vpop.f32.mrf.mxu1 }
 0x29f   : > { %v2916_v25 = vpop.f32.mrf.mxu0  ;;  %v3261_v41 = vpop.f32.mrf.mxu1 }
 0x2a1   : > { %v8026_v60 = vpop.f32.mrf.mxu0  ;;  %v8028_v1 = vpop.f32.mrf.mxu1  ;;  %v6238_v29 = vld [vmem:[#allocation2 + $0xb8] sm:$0xff]  }
 0x2a2   : > { %5770 = vmatprep.subr.bf16.mxu1 %v6238_v29  ;;  %v6246_v55 = vld [vmem:[#allocation2 + $0x98] sm:$0xff]  }
 0x2a3   : > { %v2919_v46 = vpop.f32.mrf.mxu0  ;;  %v3264_v43 = vpop.f32.mrf.mxu1  ;;  %5771 = vmatpush3.bf16.msra.mxu1 %v6239_v22 }
 0x2a4   : > { %5772 = vmatprep.subr.bf16.mxu1 %v6240_v62  ;;  %v6247_v46 = vld [vmem:[#allocation2 + $0x58] sm:$0xff]   ;;  %v6248_v43 = vld [vmem:[#allocation2 + $0x90] sm:$0xff]  }
 0x2a5   : > { %v8030_v48 = vpop.f32.mrf.mxu0  ;;  %v8032_v32 = vpop.f32.mrf.mxu1 }
 0x2a7   : > { %v2924_v36 = vpop.f32.mrf.mxu0  ;;  %v3269_v21 = vpop.f32.mrf.mxu1  ;;  %5773 = vmatpush3.bf16.msra.mxu1 %v6241_v50 }
 0x2a8   : > { %5774 = vmatprep.subr.bf16.mxu1 %v6242_v42  ;;  %v6249_v21 = vld [vmem:[#allocation2 + $0x50] sm:$0xff]  }
 0x2a9   : > { %v8034_v58 = vpop.f32.mrf.mxu0  ;;  %v8036_v12 = vpop.f32.mrf.mxu1 }
 0x2ab   : > { %v2927_v8 = vpop.f32.mrf.mxu0  ;;  %v3272_v3 = vpop.f32.mrf.mxu1  ;;  %5775 = vmatpush3.bf16.msra.mxu1 %v6243_v2 }
 0x2ac   : > { %5776 = vmatprep.subr.bf16.mxu1 %v6244_v27  ;;  %v6250_v8 = vld [vmem:[#allocation2 + $0x88] sm:$0xff]  }
 0x2ad   : > { %v8038_v23 = vpop.f32.mrf.mxu0  ;;  %v8040_v10 = vpop.f32.mrf.mxu1 }
 0x2af   : > { %v2932_v39 = vpop.f32.mrf.mxu0  ;;  %v3277_v17 = vpop.f32.mrf.mxu1  ;;  %5777 = vmatpush3.bf16.msra.mxu1 %v6245_v52 }
 0x2b0   : > { %5778 = vmatprep.subr.bf16.mxu1 %v6246_v55  ;;  %v6251_v39 = vld [vmem:[#allocation2 + $0x48] sm:$0xff]   ;;  %v6252_v17 = vld [vmem:[#allocation2 + $0x80] sm:$0xff]  }
 0x2b1   : > { %v8042_v25 = vpop.f32.mrf.mxu0  ;;  %v8044_v41 = vpop.f32.mrf.mxu1 }
 0x2b3   : > { %v2935_v29 = vpop.f32.mrf.mxu0  ;;  %v3280_v22 = vpop.f32.mrf.mxu1  ;;  %5779 = vmatpush3.bf16.msra.mxu1 %v6247_v46 }
 0x2b4   : > { %5780 = vmatprep.subr.bf16.mxu1 %v6248_v43  ;;  %v6253_v22 = vld [vmem:[#allocation2 + $0x40] sm:$0xff]  }
 0x2b5   : > { %v8046_v62 = vpop.f32.mrf.mxu0  ;;  %v8048_v36 = vpop.f32.mrf.mxu1 }
 0x2b7   : > { %v2940_v50 = vpop.f32.mrf.mxu0  ;;  %v3285_v42 = vpop.f32.mrf.mxu1  ;;  %5781 = vmatpush3.bf16.msra.mxu1 %v6249_v21 }
 0x2b8   : > { %5782 = vmatprep.subr.bf16.mxu1 %v6250_v8  ;;  %v8481_v42 = vmov 0  }
 0x2b9   : > { %v8050_v2 = vpop.f32.mrf.mxu0  ;;  %v8052_v3 = vpop.f32.mrf.mxu1 }
 0x2bb   : > { %v2943_v27 = vpop.f32.mrf.mxu0  ;;  %v3288_v52 = vpop.f32.mrf.mxu1  ;;  %5783 = vmatpush3.bf16.msra.mxu1 %v6251_v39 }
 0x2bc   : > { %5784 = vmatprep.subr.bf16.mxu1 %v6252_v17 }
 0x2bd   : > { %v8054_v55 = vpop.f32.mrf.mxu0  ;;  %v8056_v29 = vpop.f32.mrf.mxu1 }
 0x2bf   : > { %v2948_v46 = vpop.f32.mrf.mxu0  ;;  %v3293_v43 = vpop.f32.mrf.mxu1  ;;  %5785 = vmatpush3.bf16.msra.mxu1 %v6253_v22 }
 0x2c0   : > { %4658 = vmatprep.subr.bf16.mxu1 %v8481_v42 }
 0x2c1   : > { %v8058_v50 = vpop.f32.mrf.mxu0  ;;  %v8060_v21 = vpop.f32.mrf.mxu1 }
 0x2c2   : > { %4072 = vmatmul.mubr.bf16.vlgmr.msra.gmra.mxu1 %v7833_v14 }
 0x2c3   : > { %v2951_v8 = vpop.f32.mrf.mxu0  ;;  %v3296_v27 = vpop.f32.mrf.mxu1  ;;  %4079 = vmatprep.mubr.bf16.mxu1 %v7840_v44 }
 0x2c5   : > { %v8064_v52 = vpop.f32.mrf.mxu0  ;;  %v8067_v39 = vpop.f32.mrf.mxu1 }
 0x2c7   : > { %v2956_v17 = vpop.f32.mrf.mxu0  ;;  %v3301_v46 = vpop.f32.mrf.mxu1 }
 0x2c9   : > { %v8069_v43 = vpop.f32.mrf.mxu0  ;;  %v8071_v11 = vpop.f32.mrf.mxu1 }
 0x2ca   : > { %4080 = vmatmul.mubr.bf16.gmra.mxu1 %v7859_v49 }
 0x2cb   : > { %v2959_v22 = vpop.f32.mrf.mxu0  ;;  %v3304_v16 = vpop.f32.mrf.mxu1  ;;  %4087 = vmatprep.mubr.bf16.mxu1 %v7866_v18 }
 0x2cd   : > { %v8074_v8 = vpop.f32.mrf.mxu0  ;;  %v8077_v14 = vpop.f32.mrf.mxu1 }
 0x2ce   : > { %8482 = vst [vmem:[#allocation28_spill] sm:$0xff] %v8074_v8  ;;  %8483 = vst [vmem:[#allocation10_spill] sm:$0xff] %v8077_v14 }
 0x2cf   : > { %v2964_v27 = vpop.f32.mrf.mxu0  ;;  %v3309_v44 = vpop.f32.mrf.mxu1 }
 0x2d1   : > { %v8079_v42 = vpop.f32.mrf.mxu0  ;;  %v8081_v17 = vpop.f32.mrf.mxu1 }
 0x2d2   : > { %8484 = vst [vmem:[#allocation11_spill] sm:$0xff] %v8079_v42  ;;  %8485 = vst [vmem:[#allocation12_spill] sm:$0xff] %v8081_v17  ;;  %4088 = vmatmul.mubr.bf16.gmra.mxu1 %v7887_v51 }
 0x2d3   : > { %v2967_v46 = vpop.f32.mrf.mxu0  ;;  %v3312_v56 = vpop.f32.mrf.mxu1  ;;  %4095 = vmatprep.mubr.bf16.mxu1 %v7894_v35 }
 0x2d5   : > { %v2970_v22 = vpop.f32.mrf.mxu0  ;;  %v3315_v16 = vpop.f32.mrf.mxu1 }
 0x2d6   : > { %v3033_v18 = vmax.f32 %v8010_v20, %v2970_v22  ;;  %v3378_v14 = vmax.f32 %v8014_v59, %v3315_v16 }
 0x2d7   : > { %v2972_v49 = vpop.f32.mrf.mxu0  ;;  %v3317_v63 = vpop.f32.mrf.mxu1 }
 0x2d9   : > { %v2973_v13 = vpop.f32.mrf.mxu0  ;;  %v3318_v44 = vpop.f32.mrf.mxu1 }
 0x2da   : > { %v3034_v27 = vmax.f32 %v8018_v24, %v2973_v13  ;;  %v3379_v17 = vmax.f32 %v8020_v45, %v3318_v44  ;;  %4096 = vmatmul.mubr.bf16.gmra.mxu1 %v7919_v7 }
 0x2db   : > { %v2975_v46 = vpop.f32.mrf.mxu0  ;;  %v3320_v42 = vpop.f32.mrf.mxu1  ;;  %4103 = vmatprep.mubr.bf16.mxu1 %v7926_v0 }
 0x2dc   : > { %v3049_v56 = vmax.f32 %v3033_v18, %v3034_v27  ;;  %v3394_v51 = vmax.f32 %v3378_v14, %v3379_v17 }
 0x2dd   : > { %v2978_v35 = vpop.f32.mrf.mxu0  ;;  %v3323_v63 = vpop.f32.mrf.mxu1 }
 0x2de   : > { %v3035_v13 = vmax.f32 %v8022_v6, %v2978_v35  ;;  %v3380_v45 = vmax.f32 %v8024_v33, %v3323_v63 }
 0x2df   : > { %v2980_v49 = vpop.f32.mrf.mxu0  ;;  %v3325_v8 = vpop.f32.mrf.mxu1 }
 0x2e0   : > { %v3057_v8 = vadd.f32 %v3049_v56, %v7208_v15 }
 0x2e1   : > { %v2981_v20 = vpop.f32.mrf.mxu0  ;;  %v3326_v59 = vpop.f32.mrf.mxu1 }
 0x2e2   : > { %v3036_v24 = vmax.f32 %v8026_v60, %v2981_v20  ;;  %v3381_v22 = vmax.f32 %v8028_v1, %v3326_v59  ;;  %4104 = vmatmul.mubr.bf16.gmra.mxu1 %v7942_v31  ;;  %v3402_v60 = vadd.f32 %v3394_v51, %v7208_v15 }
 0x2e3   : > { %v2983_v42 = vpop.f32.mrf.mxu0  ;;  %v3328_v7 = vpop.f32.mrf.mxu1  ;;  %4111 = vmatprep.mubr.bf16.mxu1 %v7949_v61 }
 0x2e4   : > { %v3050_v16 = vmax.f32 %v3035_v13, %v3036_v24  ;;  %v3395_v14 = vmax.f32 %v3380_v45, %v3381_v22 }
 0x2e5   : > { %v2986_v0 = vpop.f32.mrf.mxu0  ;;  %v3331_v17 = vpop.f32.mrf.mxu1 }
 0x2e6   : > { %v3058_v6 = vadd.f32 %v3050_v16, %v7214_v26  ;;  %v3403_v33 = vadd.f32 %v3395_v14, %v7214_v26  ;;  %v3037_v31 = vmax.f32 %v8030_v48, %v2986_v0  ;;  %v3382_v56 = vmax.f32 %v8032_v32, %v3331_v17 }
 0x2e7   : > { %v2988_v18 = vpop.f32.mrf.mxu0  ;;  %v3333_v27 = vpop.f32.mrf.mxu1 }
 0x2e8   : > { %v5561_v1 = vpack.c.bf16 %v3058_v6, %v3057_v8  ;;  %v5581_v44 = vpack.c.bf16 %v3403_v33, %v3402_v60 }
 0x2e9   : > { %v2989_v46 = vpop.f32.mrf.mxu0  ;;  %v3334_v61 = vpop.f32.mrf.mxu1 }
 0x2ea   : > { %5666 = vst [vmem:[#allocation2 + $0xc0] sm:$0xff] %v5561_v1   ;;  %v3038_v35 = vmax.f32 %v8034_v58, %v2989_v46  ;;  %5670 = vst [vmem:[#allocation2 + $0xe0] sm:$0xff] %v5581_v44   ;;  %v3383_v63 = vmax.f32 %v8036_v12, %v3334_v61  ;;  %4112 = vmatmul.mubr.bf16.gmra.mxu1 %v7962_v30 }
 0x2eb   : > { %v2991_v49 = vpop.f32.mrf.mxu0  ;;  %v3336_v51 = vpop.f32.mrf.mxu1  ;;  %4119 = vmatprep.mubr.bf16.mxu1 %v7969_v28 }
 0x2ec   : > { %v3051_v15 = vmax.f32 %v3037_v31, %v3038_v35  ;;  %v3396_v26 = vmax.f32 %v3382_v56, %v3383_v63 }
 0x2ed   : > { %v2994_v20 = vpop.f32.mrf.mxu0  ;;  %v3339_v13 = vpop.f32.mrf.mxu1 }
 0x2ee   : > { %v3039_v58 = vmax.f32 %v8038_v23, %v2994_v20  ;;  %v3384_v12 = vmax.f32 %v8040_v10, %v3339_v13  ;;  %v3059_v14 = vadd.f32 %v3051_v15, %v7181_v53 }
 0x2ef   : > { %v2996_v24 = vpop.f32.mrf.mxu0  ;;  %v3341_v48 = vpop.f32.mrf.mxu1 }
 0x2f1   : > { %v2997_v59 = vpop.f32.mrf.mxu0  ;;  %v3342_v32 = vpop.f32.mrf.mxu1 }
 0x2f2   : > { %v3040_v45 = vmax.f32 %v8042_v25, %v2997_v59  ;;  %v3385_v22 = vmax.f32 %v8044_v41, %v3342_v32  ;;  %4120 = vmatmul.mubr.bf16.gmra.mxu1 %v7978_v9  ;;  %v3404_v25 = vadd.f32 %v3396_v26, %v7181_v53 }
 0x2f3   : > { %v2999_v42 = vpop.f32.mrf.mxu0  ;;  %v3344_v30 = vpop.f32.mrf.mxu1  ;;  %4127 = vmatprep.mubr.bf16.mxu1 %v7985_v57 }
 0x2f4   : > { %v3052_v16 = vmax.f32 %v3039_v58, %v3040_v45  ;;  %v3397_v7 = vmax.f32 %v3384_v12, %v3385_v22 }
 0x2f5   : > { %v3002_v28 = vpop.f32.mrf.mxu0  ;;  %v3347_v0 = vpop.f32.mrf.mxu1 }
 0x2f6   : > { %v3060_v23 = vadd.f32 %v3052_v16, %v7191_v5  ;;  %v3405_v10 = vadd.f32 %v3397_v7, %v7191_v5  ;;  %v3041_v9 = vmax.f32 %v8046_v62, %v3002_v28  ;;  %v3386_v18 = vmax.f32 %v8048_v36, %v3347_v0 }
 0x2f7   : > { %v3004_v8 = vpop.f32.mrf.mxu0  ;;  %v3349_v6 = vpop.f32.mrf.mxu1 }
 0x2f8   : > { %v5566_v41 = vpack.c.bf16 %v3060_v23, %v3059_v14  ;;  %v5586_v17 = vpack.c.bf16 %v3405_v10, %v3404_v25  ;;  %v8487_v23 = vld [vmem:[#allocation11_spill] sm:$0xff]  ;;  %v8488_v25 = vld [vmem:[#allocation10_spill] sm:$0xff]  ;;  %v8489_v10 = vld [vmem:[#allocation12_spill] sm:$0xff] }
 0x2f9   : > { %v3005_v60 = vpop.f32.mrf.mxu0  ;;  %v3350_v57 = vpop.f32.mrf.mxu1 }
 0x2fa   : > { %5667 = vst [vmem:[#allocation2 + $0xc8] sm:$0xff] %v5566_v41   ;;  %v3042_v33 = vmax.f32 %v8050_v2, %v3005_v60  ;;  %5671 = vst [vmem:[#allocation2 + $0xe8] sm:$0xff] %v5586_v17   ;;  %v3387_v1 = vmax.f32 %v8052_v3, %v3350_v57  ;;  %4128 = vmatmul.mubr.bf16.gmra.mxu1 %v7998_v34  ;;  %v8490_v17 = vld [vmem:[#allocation24_spill] sm:$0xff] }
 0x2fb   : > { %v3007_v27 = vpop.f32.mrf.mxu0  ;;  %v3352_v44 = vpop.f32.mrf.mxu1  ;;  %4135 = vmatprep.mubr.bf16.mxu1 %v7818_v19 }
 0x2fc   : > { %v3053_v53 = vmax.f32 %v3041_v9, %v3042_v33  ;;  %v3398_v5 = vmax.f32 %v3386_v18, %v3387_v1  ;;  %v8491_v9 = vld [vmem:[#allocation27_spill] sm:$0xff]  ;;  %v8492_v33 = vld [vmem:[#allocation8_spill] sm:$0xff]  ;;  %v8493_v18 = vld [vmem:[#allocation9_spill] sm:$0xff] }
 0x2fd   : > { %v3010_v46 = vpop.f32.mrf.mxu0  ;;  %v3355_v31 = vpop.f32.mrf.mxu1 }
 0x2fe   : > { %v3043_v2 = vmax.f32 %v8054_v55, %v3010_v46  ;;  %v3388_v3 = vmax.f32 %v8056_v29, %v3355_v31  ;;  %v3061_v20 = vadd.f32 %v3053_v53, %v7146_v4 }
 0x2ff   : > { %v3012_v35 = vpop.f32.mrf.mxu0  ;;  %v3357_v62 = vpop.f32.mrf.mxu1 }
 0x301   : > { %v3013_v61 = vpop.f32.mrf.mxu0  ;;  %v3358_v36 = vpop.f32.mrf.mxu1 }
 0x302   : > { %v3044_v56 = vmax.f32 %v8058_v50, %v3013_v61  ;;  %v3389_v63 = vmax.f32 %v8060_v21, %v3358_v36  ;;  %4136 = vmatmul.mubr.bf16.gmra.mxu1 %v7845_v37  ;;  %v3406_v50 = vadd.f32 %v3398_v5, %v7146_v4 }
 0x303   : > { %v3015_v49 = vpop.f32.mrf.mxu0  ;;  %v3360_v51 = vpop.f32.mrf.mxu1  ;;  %4143 = vmatprep.mubr.bf16.mxu1 %v7850_v38 }
 0x304   : > { %v3054_v15 = vmax.f32 %v3043_v2, %v3044_v56  ;;  %v3399_v26 = vmax.f32 %v3388_v3, %v3389_v63  ;;  %v8494_v56 = vld [vmem:[#allocation26_spill] sm:$0xff] }
 0x305   : > { %v3018_v19 = vpop.f32.mrf.mxu0  ;;  %v3363_v13 = vpop.f32.mrf.mxu1 }
 0x306   : > { %v3062_v55 = vadd.f32 %v3054_v15, %v7170_v40  ;;  %v3407_v29 = vadd.f32 %v3399_v26, %v7170_v40  ;;  %v3045_v37 = vmax.f32 %v8064_v52, %v3018_v19  ;;  %v3390_v32 = vmax.f32 %v8067_v39, %v3363_v13 }
 0x307   : > { %v3020_v24 = vpop.f32.mrf.mxu0  ;;  %v3365_v48 = vpop.f32.mrf.mxu1 }
 0x308   : > { %v5571_v21 = vpack.c.bf16 %v3062_v55, %v3061_v20  ;;  %v5591_v59 = vpack.c.bf16 %v3407_v29, %v3406_v50  ;;  %v6255_v55 = vld [vmem:[#allocation2 + $0xb8] sm:$0xff]   ;;  %v6257_v48 = vld [vmem:[#allocation2 + $0xb0] sm:$0xff]  }
 0x309   : > { %v3021_v58 = vpop.f32.mrf.mxu0  ;;  %v3366_v38 = vpop.f32.mrf.mxu1 }
 0x30a   : > { %5668 = vst [vmem:[#allocation2 + $0xd0] sm:$0xff] %v5571_v21   ;;  %v3046_v45 = vmax.f32 %v8069_v43, %v3021_v58  ;;  %5672 = vst [vmem:[#allocation2 + $0xf0] sm:$0xff] %v5591_v59   ;;  %v3391_v12 = vmax.f32 %v8071_v11, %v3366_v38  ;;  %4144 = vmatmul.mubr.bf16.gmra.mxu1 %v7871_v54  ;;  %v8486_v43 = vld [vmem:[#allocation28_spill] sm:$0xff] }
 0x30b   : > { %v3023_v22 = vpop.f32.mrf.mxu0  ;;  %v3368_v42 = vpop.f32.mrf.mxu1  ;;  %4151 = vmatprep.mubr.bf16.mxu1 %v7878_v47  ;;  %v6258_v59 = vld [vmem:[#allocation2 + $0xe8] sm:$0xff]  }
 0x30c   : > { %v3055_v4 = vmax.f32 %v3045_v37, %v3046_v45  ;;  %v3400_v40 = vmax.f32 %v3390_v32, %v3391_v12  ;;  %v6259_v38 = vld [vmem:[#allocation2 + $0xa8] sm:$0xff]   ;;  %v6260_v12 = vld [vmem:[#allocation2 + $0xe0] sm:$0xff]  }
 0x30d   : > { %v3026_v16 = vpop.f32.mrf.mxu0  ;;  %v3371_v30 = vpop.f32.mrf.mxu1 }
 0x30e   : > { %v3047_v14 = vmax.f32 %v8486_v43, %v3026_v16  ;;  %v3392_v11 = vmax.f32 %v8488_v25, %v3371_v30  ;;  %v3063_v57 = vadd.f32 %v3055_v4, %v8492_v33  ;;  %v3408_v53 = vadd.f32 %v3400_v40, %v8492_v33  ;;  %v6261_v30 = vld [vmem:[#allocation2 + $0xa0] sm:$0xff]  }
 0x30f   : > { %v3028_v7 = vpop.f32.mrf.mxu0  ;;  %v3373_v52 = vpop.f32.mrf.mxu1 }
 0x311   : > { %v3029_v28 = vpop.f32.mrf.mxu0  ;;  %v3374_v39 = vpop.f32.mrf.mxu1  ;;  %v6256_v13 = vld [vmem:[#allocation2 + $0xf0] sm:$0xff]  }
 0x312   : > { %v3048_v0 = vmax.f32 %v8487_v23, %v3029_v28  ;;  %v3393_v8 = vmax.f32 %v8489_v10, %v3374_v39  ;;  %4152 = vmatmul.mubr.bf16.gmra.mxu1 %v8490_v17  ;;  %v6263_v10 = vld [vmem:[#allocation2 + $0x98] sm:$0xff]  }
 0x313   : > { %v3031_v41 = vpop.f32.mrf.mxu0  ;;  %v3376_v54 = vpop.f32.mrf.mxu1  ;;  %4159 = vmatprep.mubr.bf16.mxu1 %v8491_v9 }
 0x314   : > { %v3056_v6 = vmax.f32 %v3047_v14, %v3048_v0  ;;  %v3401_v60 = vmax.f32 %v3392_v11, %v3393_v8  ;;  %v6264_v54 = vld [vmem:[#allocation2 + $0xd0] sm:$0xff]  }
 0x315   : > { %v8144_v47 = vpop.f32.mrf.mxu0  ;;  %v5746_v27 = vpop.f32.mrf.mxu1 }
 0x316   : > { %v3064_v1 = vadd.f32 %v3056_v6, %v8493_v18  ;;  %v3409_v44 = vadd.f32 %v3401_v60, %v8493_v18 }
 0x317   : > { %v8151_v5 = vpop.f32.mrf.mxu0  ;;  %v5747_v31 = vpop.f32.mrf.mxu1 }
 0x318   : > { %v5576_v46 = vpack.c.bf16 %v3064_v1, %v3063_v57  ;;  %v5596_v35 = vpack.c.bf16 %v3409_v44, %v3408_v53  ;;  %v5748_v42 = vadd.f32 %v5747_v31, %v5746_v27  ;;  %v6265_v57 = vld [vmem:[#allocation2 + $0x90] sm:$0xff]   ;;  %v8168_v1 = vpop.permute.xlu0 %3857  ;;  %v6266_v53 = vld [vmem:[#allocation2 + $0xc8] sm:$0xff]   ;;  %v8170_v44 = vpop.permute.xlu1 %3862 }
 0x319   : > { %v8153_v62 = vpop.f32.mrf.mxu0  ;;  %v5749_v61 = vpop.f32.mrf.mxu1 }
 0x31a   : > { %5669 = vst [vmem:[#allocation2 + $0xd8] sm:$0xff] %v5576_v46   ;;  %5673 = vst [vmem:[#allocation2 + $0xf8] sm:$0xff] %v5596_v35   ;;  %4160 = vmatmul.mubr.bf16.gmra.mxu1 %v8494_v56  ;;  %v6267_v56 = vld [vmem:[#allocation2 + $0x88] sm:$0xff]  }
 0x31b   : > { %v8155_v2 = vpop.f32.mrf.mxu0  ;;  %v5750_v36 = vpop.f32.mrf.mxu1 }
 0x31c   : > { %v5751_v28 = vadd.f32 %v5750_v36, %v5749_v61 }
 0x31d   : > { %v8158_v3 = vpop.f32.mrf.mxu0  ;;  %v5752_v63 = vpop.f32.mrf.mxu1 }
 0x31f   : > { %v8160_v49 = vpop.f32.mrf.mxu0  ;;  %v5753_v15 = vpop.f32.mrf.mxu1 }
 0x320   : > { %v5754_v40 = vadd.f32 %v5753_v15, %v5752_v63  ;;  %v6268_v15 = vld [vmem:[#allocation2 + $0xc0] sm:$0xff]  }
 0x321   : > { %v8162_v51 = vpop.f32.mrf.mxu0  ;;  %v6254_v26 = vld [vmem:[#allocation2 + $0xf8] sm:$0xff]   ;;  %v5755_v19 = vpop.f32.mrf.mxu1 }
 0x322   : > { %5858 = vmatprep.subr.bf16.mxu0 %v6254_v26  ;;  %v6262_v14 = vld [vmem:[#allocation2 + $0xd8] sm:$0xff]  }
 0x323   : > { %v8164_v20 = vpop.f32.mrf.mxu0  ;;  %v5756_v50 = vpop.f32.mrf.mxu1  ;;  %5859 = vmatpush3.bf16.msra.mxu0 %v6255_v55 }
 0x324   : > { %5860 = vmatprep.subr.bf16.mxu0 %v6256_v13  ;;  %v5757_v25 = vadd.f32 %v5756_v50, %v5755_v19 }
 0x325   : > { %v5710_v29 = vpop.f32.mrf.mxu0  ;;  %v8166_v24 = vpop.f32.mrf.mxu1 }
 0x327   : > { %v5711_v21 = vpop.f32.mrf.mxu0  ;;  %v5759_v58 = vpop.f32.mrf.mxu1  ;;  %5861 = vmatpush3.bf16.msra.mxu0 %v6257_v48 }
 0x328   : > { %5862 = vmatprep.subr.bf16.mxu0 %v6258_v59  ;;  %v5712_v4 = vadd.f32 %v5711_v21, %v5710_v29  ;;  %v5760_v55 = vadd.f32 %v5759_v58, %v8166_v24  ;;  %v6269_v29 = vld [vmem:[#allocation2 + $0x80] sm:$0xff]  }
 0x329   : > { %v5713_v37 = vpop.f32.mrf.mxu0  ;;  %v5761_v32 = vpop.f32.mrf.mxu1  ;;  %v6323_v58 = vld [vmem:[%s8383_s2] ss:$8 sps:$4 sm:$0xff]  }
 0x32a   : > { %v3831_v0 = vmax.f32 %v5712_v4, %v5748_v42  ;;  %v8177_v42 = vpop.permute.xlu1 %3852 }
 0x32b   : > { %v5714_v45 = vpop.f32.mrf.mxu0  ;;  %5863 = vmatpush3.bf16.msra.mxu0 %v6259_v38  ;;  %v5762_v7 = vpop.f32.mrf.mxu1 }
 0x32c   : > { %5864 = vmatprep.subr.bf16.mxu0 %v6260_v12  ;;  %v5715_v52 = vadd.f32 %v5714_v45, %v5713_v37  ;;  %v5763_v59 = vadd.f32 %v5762_v7, %v5761_v32  ;;  %v8175_v38 = vpop.permute.xlu0 %3847  ;;  %v6324_v32 = vld [vmem:[%s8383_s2 + $0x14] ss:$8 sps:$4 sm:$0xff]  }
 0x32d   : > { %v5716_v22 = vpop.f32.mrf.mxu0  ;;  %v5764_v8 = vpop.f32.mrf.mxu1 }
 0x32e   : > { %v3832_v41 = vmax.f32 %v5715_v52, %v5751_v28 }
 0x32f   : > { %v5717_v16 = vpop.f32.mrf.mxu0  ;;  %5865 = vmatpush3.bf16.msra.mxu0 %v6261_v30  ;;  %v5765_v18 = vpop.f32.mrf.mxu1 }
 0x330   : > { %v5718_v43 = vadd.f32 %v5717_v16, %v5716_v22  ;;  %5866 = vmatprep.subr.bf16.mxu0 %v6262_v14  ;;  %v5766_v13 = vadd.f32 %v5765_v18, %v5764_v8  ;;  %v6325_v8 = vld [vmem:[%s8383_s2 + $0x10] ss:$8 sps:$4 sm:$0xff]  }
 0x331   : > { %v5719_v23 = vpop.f32.mrf.mxu0  ;;  %v5767_v36 = vpop.f32.mrf.mxu1 }
 0x332   : > { %v3833_v39 = vmax.f32 %v5718_v43, %v5754_v40  ;;  %v8185_v43 = vpop.permute.xlu0 %3867 }
 0x333   : > { %v5720_v11 = vpop.f32.mrf.mxu0  ;;  %5867 = vmatpush3.bf16.msra.mxu0 %v6263_v10  ;;  %v5768_v21 = vpop.f32.mrf.mxu1 }
 0x334   : > { %v5721_v6 = vadd.f32 %v5720_v11, %v5719_v23  ;;  %v3841_v60 = vmax.f32 %v3831_v0, %v3833_v39  ;;  %5868 = vmatprep.subr.bf16.mxu0 %v6264_v54  ;;  %v5769_v4 = vadd.f32 %v5768_v21, %v5767_v36  ;;  %v8187_v23 = vpop.permute.xlu1 %3872  ;;  %v5700_v54 = vadd.f32 %v8151_v5, %v8144_v47  ;;  %v6327_v5 = vld [vmem:[%s8383_s2 + $0x20] ss:$8 sps:$4 sm:$0xff]   ;;  %v6329_v36 = vld [vmem:[%s8383_s2 + $0x30] ss:$8 sps:$4 sm:$0xff]  }
 0x335   : > { %v5722_v17 = vpop.f32.mrf.mxu0 }
 0x336   : > { %v3834_v9 = vmax.f32 %v5721_v6, %v5757_v25  ;;  %v3877_v31 = vadd.f32 %v8168_v1, %v3841_v60  ;;  %v6326_v6 = vld [vmem:[%s8383_s2 + $0x24] ss:$8 sps:$4 sm:$0xff]  }
 0x337   : > { %v5723_v33 = vpop.f32.mrf.mxu0  ;;  %5869 = vmatpush3.bf16.msra.mxu0 %v6265_v57 }
 0x338   : > { %v3842_v27 = vmax.f32 %v3832_v41, %v3834_v9  ;;  %5870 = vmatprep.subr.bf16.mxu0 %v6266_v53  ;;  %v5724_v19 = vadd.f32 %v5723_v33, %v5722_v17  ;;  %v5706_v17 = vadd.f32 %v8160_v49, %v8158_v3  ;;  %v5703_v33 = vadd.f32 %v8155_v2, %v8153_v62  ;;  %v6328_v62 = vld [vmem:[%s8383_s2 + $0x34] ss:$8 sps:$4 sm:$0xff]  }
 0x339   : > { %v5725_v46 = vpop.f32.mrf.mxu0  ;;  %v5709_v53 = vadd.f32 %v8164_v20, %v8162_v51 }
 0x33a   : > { %v3878_v35 = vadd.f32 %v8170_v44, %v3842_v27  ;;  %v3835_v12 = vmax.f32 %v5724_v19, %v5760_v55  ;;  %v6333_v19 = vld [vmem:[%s8383_s2 + $0x50] ss:$8 sps:$4 sm:$0xff]   ;;  %v6334_v55 = vld [vmem:[%s8383_s2 + $0x64] ss:$8 sps:$4 sm:$0xff]  }
 0x33b   : > { %v5726_v61 = vpop.f32.mrf.mxu0  ;;  %5871 = vmatpush3.bf16.msra.mxu0 %v6267_v56 }
 0x33c   : > { %v5606_v63 = vpack.c.bf16 %v3878_v35, %v3877_v31  ;;  %5872 = vmatprep.subr.bf16.mxu0 %v6268_v15  ;;  %v5727_v48 = vadd.f32 %v5726_v61, %v5725_v46  ;;  %v6331_v15 = vld [vmem:[%s8383_s2 + $0x40] ss:$8 sps:$4 sm:$0xff]  }
 0x33d   : > { %v5728_v26 = vpop.f32.mrf.mxu0 }
 0x33e   : > { %5674 = vst [vmem:[#allocation3 + $0x8] sm:$0xff] %v5606_v63   ;;  %v3836_v16 = vmax.f32 %v5727_v48, %v5763_v59  ;;  %v6330_v63 = vld [vmem:[%s8383_s2 + $0x44] ss:$8 sps:$4 sm:$0xff]   ;;  %v6338_v48 = vld [vmem:[%s8383_s2 + $0x80] ss:$8 sps:$4 sm:$0xff]  }
 0x33f   : > { %v5729_v50 = vpop.f32.mrf.mxu0  ;;  %5873 = vmatpush3.bf16.msra.mxu0 %v6269_v29  ;;  %v6337_v29 = vld [vmem:[%s8383_s2 + $0x84] ss:$8 sps:$4 sm:$0xff]   ;;  %v6339_v59 = vld [vmem:[%s8383_s2 + $0x94] ss:$8 sps:$4 sm:$0xff]  }
 0x340   : > { %v5730_v37 = vadd.f32 %v5729_v50, %v5728_v26  ;;  %v6332_v26 = vld [vmem:[%s8383_s2 + $0x54] ss:$8 sps:$4 sm:$0xff]  }
 0x341   : > { %v5731_v45 = vpop.f32.mrf.mxu0  ;;  %v6336_v50 = vld [vmem:[%s8383_s2 + $0x74] ss:$8 sps:$4 sm:$0xff]  }
 0x342   : > { %v3837_v22 = vmax.f32 %v5730_v37, %v5766_v13  ;;  %4383 = vmatmul.mubr.bf16.vlgmr.msra.gmra.mxu0 %v6323_v58  ;;  %v6335_v13 = vld [vmem:[%s8383_s2 + $0x60] ss:$8 sps:$4 sm:$0xff]  }
 0x343   : > { %v5732_v40 = vpop.f32.mrf.mxu0  ;;  %4390 = vmatprep.mubr.bf16.mxu0 %v6324_v32  ;;  %v6343_v32 = vld [vmem:[%s8383_s2 + $0xb4] ss:$8 sps:$4 sm:$0xff]  }
 0x344   : > { %v5733_v24 = vadd.f32 %v5732_v40, %v5731_v45  ;;  %v3843_v7 = vmax.f32 %v3835_v12, %v3837_v22  ;;  %v6340_v22 = vld [vmem:[%s8383_s2 + $0x90] ss:$8 sps:$4 sm:$0xff]  }
 0x345   : > { %v5734_v30 = vpop.f32.mrf.mxu0 }
 0x346   : > { %v3838_v52 = vmax.f32 %v5733_v24, %v5769_v4  ;;  %v3879_v39 = vadd.f32 %v8185_v43, %v3843_v7  ;;  %v6341_v4 = vld [vmem:[%s8383_s2 + $0xa4] ss:$8 sps:$4 sm:$0xff]  }
 0x347   : > { %v5735_v28 = vpop.f32.mrf.mxu0 }
 0x348   : > { %v3844_v14 = vmax.f32 %v3836_v16, %v3838_v52  ;;  %v5736_v60 = vadd.f32 %v5735_v28, %v5734_v30  ;;  %v6342_v30 = vld [vmem:[%s8383_s2 + $0xa0] ss:$8 sps:$4 sm:$0xff]  }
 0x349   : > { %v5737_v0 = vpop.f32.mrf.mxu0 }
 0x34a   : > { %v3880_v25 = vadd.f32 %v8187_v23, %v3844_v14  ;;  %4391 = vmatmul.mubr.bf16.gmra.mxu0 %v6325_v8  ;;  %v3827_v46 = vmax.f32 %v5700_v54, %v5736_v60 }
 0x34b   : > { %v5738_v11 = vpop.f32.mrf.mxu0  ;;  %4398 = vmatprep.mubr.bf16.mxu0 %v6326_v6 }
 0x34c   : > { %v5611_v10 = vpack.c.bf16 %v3880_v25, %v3879_v39  ;;  %v5739_v57 = vadd.f32 %v5738_v11, %v5737_v0  ;;  %v6344_v0 = vld [vmem:[%s8383_s2 + $0xb0] ss:$8 sps:$4 sm:$0xff]  }
 0x34d   : > { %v5740_v41 = vpop.f32.mrf.mxu0 }
 0x34e   : > { %5675 = vst [vmem:[#allocation3 + $0x10] sm:$0xff] %v5611_v10   ;;  %v3828_v61 = vmax.f32 %v5703_v33, %v5739_v57 }
 0x34f   : > { %v5741_v9 = vpop.f32.mrf.mxu0 }
 0x350   : > { %v5742_v18 = vadd.f32 %v5741_v9, %v5740_v41 }
 0x351   : > { %v5743_v27 = vpop.f32.mrf.mxu0 }
 0x352   : > { %v3829_v31 = vmax.f32 %v5706_v17, %v5742_v18  ;;  %4399 = vmatmul.mubr.bf16.gmra.mxu0 %v6327_v5 }
 0x353   : > { %v5744_v35 = vpop.f32.mrf.mxu0  ;;  %4406 = vmatprep.mubr.bf16.mxu0 %v6328_v62 }
 0x354   : > { %v5745_v47 = vadd.f32 %v5744_v35, %v5743_v27  ;;  %v3839_v2 = vmax.f32 %v3827_v46, %v3829_v31 }
 0x356   : > { %v3830_v3 = vmax.f32 %v5709_v53, %v5745_v47  ;;  %v3875_v51 = vadd.f32 %v8175_v38, %v3839_v2 }
 0x358   : > { %v3840_v49 = vmax.f32 %v3828_v61, %v3830_v3 }
 0x35a   : > { %v3876_v20 = vadd.f32 %v8177_v42, %v3840_v49  ;;  %4407 = vmatmul.mubr.bf16.gmra.mxu0 %v6329_v36 }
 0x35b   : > { %4414 = vmatprep.mubr.bf16.mxu0 %v6330_v63 }
 0x35c   : > { %v5601_v56 = vpack.c.bf16 %v3876_v20, %v3875_v51 }
 0x35e   : > { %5602 = vst [vmem:[#allocation3] sm:$0xff] %v5601_v56  }
 0x362   : > { %4415 = vmatmul.mubr.bf16.gmra.mxu0 %v6331_v15 }
 0x363   : > { %4422 = vmatprep.mubr.bf16.mxu0 %v6332_v26 }
 0x36a   : > { %4423 = vmatmul.mubr.bf16.gmra.mxu0 %v6333_v19 }
 0x36b   : > { %4430 = vmatprep.mubr.bf16.mxu0 %v6334_v55 }
 0x372   : > { %4431 = vmatmul.mubr.bf16.gmra.mxu0 %v6335_v13 }
 0x373   : > { %4438 = vmatprep.mubr.bf16.mxu0 %v6336_v50 }
 0x37a   : > { %4439 = vmatmul.mubr.bf16.gmra.mxu0 %v7998_v34 }
 0x37b   : > { %4446 = vmatprep.mubr.bf16.mxu0 %v6337_v29 }
 0x382   : > { %v5786_v21 = vpop.f32.mrf.mxu1  ;;  %4447 = vmatmul.mubr.bf16.gmra.mxu0 %v6338_v48 }
 0x383   : > { %4454 = vmatprep.mubr.bf16.mxu0 %v6339_v59 }
 0x384   : > { %v5787_v37 = vpop.f32.mrf.mxu1 }
 0x385   : > { %v5788_v46 = vadd.f32 %v5787_v37, %v5786_v21 }
 0x386   : > { %v5789_v45 = vpop.f32.mrf.mxu1 }
 0x388   : > { %v5790_v12 = vpop.f32.mrf.mxu1 }
 0x389   : > { %v5791_v47 = vadd.f32 %v5790_v12, %v5789_v45 }
 0x38a   : > { %v5792_v34 = vpop.f32.mrf.mxu1  ;;  %4455 = vmatmul.mubr.bf16.gmra.mxu0 %v6340_v22 }
 0x38b   : > { %4462 = vmatprep.mubr.bf16.mxu0 %v6341_v4 }
 0x38c   : > { %v5793_v40 = vpop.f32.mrf.mxu1 }
 0x38d   : > { %v5794_v31 = vadd.f32 %v5793_v40, %v5792_v34 }
 0x38e   : > { %v5795_v16 = vpop.f32.mrf.mxu1 }
 0x390   : > { %v5796_v24 = vpop.f32.mrf.mxu1 }
 0x391   : > { %v5797_v3 = vadd.f32 %v5796_v24, %v5795_v16 }
 0x392   : > { %v5798_v58 = vpop.f32.mrf.mxu1  ;;  %4463 = vmatmul.mubr.bf16.gmra.mxu0 %v6342_v30 }
 0x393   : > { %4470 = vmatprep.mubr.bf16.mxu0 %v6343_v32 }
 0x394   : > { %v5799_v7 = vpop.f32.mrf.mxu1 }
 0x395   : > { %v5800_v37 = vadd.f32 %v5799_v7, %v5798_v58 }
 0x396   : > { %v5801_v52 = vpop.f32.mrf.mxu1 }
 0x398   : > { %v5802_v28 = vpop.f32.mrf.mxu1 }
 0x399   : > { %v5803_v22 = vadd.f32 %v5802_v28, %v5801_v52 }
 0x39a   : > { %v5804_v14 = vpop.f32.mrf.mxu1  ;;  %4471 = vmatmul.mubr.bf16.gmra.mxu0 %v6344_v0 }
 0x39c   : > { %v5805_v39 = vpop.f32.mrf.mxu1 }
 0x39d   : > { %v5806_v45 = vadd.f32 %v5805_v39, %v5804_v14 }
 0x39e   : > { %v5807_v25 = vpop.f32.mrf.mxu1 }
 0x3a0   : > { %v5808_v11 = vpop.f32.mrf.mxu1 }
 0x3a1   : > { %v5809_v24 = vadd.f32 %v5808_v11, %v5807_v25 }
 0x3a2   : > { %v8262_v10 = vpop.f32.mrf.mxu1 }
 0x3a4   : > { %v8264_v8 = vpop.f32.mrf.mxu1 }
 0x3a5   : > { %v5812_v25 = vadd.f32 %v8264_v8, %v8262_v10 }
 0x3a6   : > { %v8266_v41 = vpop.f32.mrf.mxu1 }
 0x3a8   : > { %v8268_v6 = vpop.f32.mrf.mxu1 }
 0x3aa   : > { %v5816_v54 = vpop.f32.mrf.mxu1 }
 0x3ac   : > { %v5817_v17 = vpop.f32.mrf.mxu1 }
 0x3ad   : > { %v5818_v11 = vadd.f32 %v5817_v17, %v5816_v54 }
 0x3ae   : > { %v8270_v60 = vpop.f32.mrf.mxu1 }
 0x3b0   : > { %v8272_v9 = vpop.f32.mrf.mxu1 }
 0x3b2   : > { %v5822_v33 = vpop.f32.mrf.mxu1 }
 0x3b4   : > { %v5823_v57 = vpop.f32.mrf.mxu1 }
 0x3b5   : > { %v5824_v35 = vadd.f32 %v5823_v57, %v5822_v33 }
 0x3b6   : > { %v5825_v18 = vpop.f32.mrf.mxu1 }
 0x3b7   : > { %v4168_v49 = vmax.f32 %v5788_v46, %v5824_v35 }
 0x3b8   : > { %v5826_v27 = vpop.f32.mrf.mxu1 }
 0x3b9   : > { %v5827_v5 = vadd.f32 %v5826_v27, %v5825_v18 }
 0x3ba   : > { %v5828_v53 = vpop.f32.mrf.mxu1 }
 0x3bb   : > { %v4169_v56 = vmax.f32 %v5791_v47, %v5827_v5  ;;  %v5815_v47 = vadd.f32 %v8268_v6, %v8266_v41 }
 0x3bc   : > { %v5829_v61 = vpop.f32.mrf.mxu1 }
 0x3bd   : > { %v5830_v62 = vadd.f32 %v5829_v61, %v5828_v53 }
 0x3be   : > { %v5831_v2 = vpop.f32.mrf.mxu1 }
 0x3bf   : > { %v4170_v51 = vmax.f32 %v5794_v31, %v5830_v62 }
 0x3c0   : > { %v5832_v20 = vpop.f32.mrf.mxu1 }
 0x3c1   : > { %v5833_v36 = vadd.f32 %v5832_v20, %v5831_v2  ;;  %v4180_v15 = vmax.f32 %v4168_v49, %v4170_v51 }
 0x3c2   : > { %v5834_v63 = vpop.f32.mrf.mxu1 }
 0x3c3   : > { %v4171_v26 = vmax.f32 %v5797_v3, %v5833_v36  ;;  %v4186_v50 = vadd.f32 %v4180_v15, %v8175_v38  ;;  %v5821_v3 = vadd.f32 %v8272_v9, %v8270_v60  ;;  %v6281_v60 = vld [vmem:[%s8384_s3 + $0x4] ss:$8 sps:$4 sm:$0xff]  }
 0x3c4   : > { %v5835_v19 = vpop.f32.mrf.mxu1  ;;  %5348 = vmatprep.mubr.msk.bf16.mxu1 %vm4651_vm1, %v6281_v60 }
 0x3c5   : > { %v4181_v55 = vmax.f32 %v4169_v56, %v4171_v26  ;;  %v5836_v12 = vadd.f32 %v5835_v19, %v5834_v63 }
 0x3c6   : > { %v5837_v13 = vpop.f32.mrf.mxu1 }
 0x3c7   : > { %v4187_v29 = vadd.f32 %v4181_v55, %v8177_v42  ;;  %v4172_v30 = vmax.f32 %v5800_v37, %v5836_v12 }
 0x3c8   : > { %v5838_v21 = vpop.f32.mrf.mxu1 }
 0x3c9   : > { %v5616_v48 = vpack.c.bf16 %v4187_v29, %v4186_v50  ;;  %v5839_v4 = vadd.f32 %v5838_v21, %v5837_v13 }
 0x3ca   : > { %v5840_v59 = vpop.f32.mrf.mxu1 }
 0x3cb   : > { %5676 = vst [vmem:[#allocation3 + $0x18] sm:$0xff] %v5616_v48   ;;  %v4173_v33 = vmax.f32 %v5803_v22, %v5839_v4 }
 0x3cc   : > { %v5841_v34 = vpop.f32.mrf.mxu1 }
 0x3cd   : > { %v5842_v40 = vadd.f32 %v5841_v34, %v5840_v59 }
 0x3ce   : > { %v5843_v16 = vpop.f32.mrf.mxu1 }
 0x3cf   : > { %v4174_v32 = vmax.f32 %v5806_v45, %v5842_v40 }
 0x3d0   : > { %v5844_v0 = vpop.f32.mrf.mxu1 }
 0x3d1   : > { %v5845_v57 = vadd.f32 %v5844_v0, %v5843_v16  ;;  %v4182_v27 = vmax.f32 %v4172_v30, %v4174_v32 }
 0x3d2   : > { %v5846_v18 = vpop.f32.mrf.mxu1 }
 0x3d3   : > { %v4175_v53 = vmax.f32 %v5809_v24, %v5845_v57  ;;  %v4188_v7 = vadd.f32 %v4182_v27, %v8168_v1 }
 0x3d4   : > { %v5847_v46 = vpop.f32.mrf.mxu1 }
 0x3d5   : > { %v4183_v31 = vmax.f32 %v4173_v33, %v4175_v53  ;;  %v5848_v35 = vadd.f32 %v5847_v46, %v5846_v18 }
 0x3d6   : > { %v5849_v58 = vpop.f32.mrf.mxu1 }
 0x3d7   : > { %v4189_v14 = vadd.f32 %v4183_v31, %v8170_v44  ;;  %v4176_v49 = vmax.f32 %v5812_v25, %v5848_v35 }
 0x3d8   : > { %v5850_v52 = vpop.f32.mrf.mxu1 }
 0x3d9   : > { %v5621_v28 = vpack.c.bf16 %v4189_v14, %v4188_v7  ;;  %v5851_v5 = vadd.f32 %v5850_v52, %v5849_v58 }
 0x3da   : > { %v5852_v39 = vpop.f32.mrf.mxu1 }
 0x3db   : > { %5677 = vst [vmem:[#allocation3 + $0x20] sm:$0xff] %v5621_v28   ;;  %v4177_v56 = vmax.f32 %v5815_v47, %v5851_v5 }
 0x3dc   : > { %v5853_v61 = vpop.f32.mrf.mxu1 }
 0x3dd   : > { %v5854_v62 = vadd.f32 %v5853_v61, %v5852_v39 }
 0x3de   : > { %v5855_v2 = vpop.f32.mrf.mxu1 }
 0x3df   : > { %v4178_v51 = vmax.f32 %v5818_v11, %v5854_v62 }
 0x3e0   : > { %v5856_v20 = vpop.f32.mrf.mxu1 }
 0x3e1   : > { %v5857_v36 = vadd.f32 %v5856_v20, %v5855_v2  ;;  %v4184_v63 = vmax.f32 %v4176_v49, %v4178_v51 }
 0x3e3   : > { %v4179_v10 = vmax.f32 %v5821_v3, %v5857_v36  ;;  %v4190_v54 = vadd.f32 %v4184_v63, %v8185_v43 }
 0x3e5   : > { %v4185_v8 = vmax.f32 %v4177_v56, %v4179_v10 }
 0x3e7   : > { %v4191_v17 = vadd.f32 %v4185_v8, %v8187_v23 }
 0x3e9   : > { %v5626_v15 = vpack.c.bf16 %v4191_v17, %v4190_v54 }
 0x3eb   : > { %5678 = vst [vmem:[#allocation3 + $0x28] sm:$0xff] %v5626_v15  }
 0x402   : > { %v5874_v41 = vpop.f32.mrf.mxu0 }
 0x404   : > { %v5875_v6 = vpop.f32.mrf.mxu0 }
 0x405   : > { %v5876_v52 = vadd.f32 %v5875_v6, %v5874_v41 }
 0x406   : > { %v5877_v9 = vpop.f32.mrf.mxu0 }
 0x408   : > { %v5878_v26 = vpop.f32.mrf.mxu0 }
 0x409   : > { %v5879_v11 = vadd.f32 %v5878_v26, %v5877_v9 }
 0x40a   : > { %v5880_v19 = vpop.f32.mrf.mxu0 }
 0x40c   : > { %v5881_v55 = vpop.f32.mrf.mxu0 }
 0x40d   : > { %v5882_v31 = vadd.f32 %v5881_v55, %v5880_v19 }
 0x40e   : > { %v5883_v13 = vpop.f32.mrf.mxu0 }
 0x410   : > { %v5884_v50 = vpop.f32.mrf.mxu0 }
 0x411   : > { %v5885_v35 = vadd.f32 %v5884_v50, %v5883_v13 }
 0x412   : > { %v5886_v29 = vpop.f32.mrf.mxu0 }
 0x414   : > { %v5887_v21 = vpop.f32.mrf.mxu0 }
 0x415   : > { %v5888_v60 = vadd.f32 %v5887_v21, %v5886_v29 }
 0x416   : > { %v5889_v48 = vpop.f32.mrf.mxu0 }
 0x418   : > { %v5890_v59 = vpop.f32.mrf.mxu0 }
 0x419   : > { %v5891_v55 = vadd.f32 %v5890_v59, %v5889_v48 }
 0x41a   : > { %v5892_v37 = vpop.f32.mrf.mxu0 }
 0x41c   : > { %v5893_v45 = vpop.f32.mrf.mxu0 }
 0x41d   : > { %v5894_v17 = vadd.f32 %v5893_v45, %v5892_v37 }
 0x41e   : > { %v5895_v12 = vpop.f32.mrf.mxu0 }
 0x420   : > { %v5896_v34 = vpop.f32.mrf.mxu0 }
 0x421   : > { %v5897_v13 = vadd.f32 %v5896_v34, %v5895_v12 }
 0x422   : > { %v8290_v22 = vpop.f32.mrf.mxu0 }
 0x424   : > { %v8292_v4 = vpop.f32.mrf.mxu0 }
 0x426   : > { %v8294_v40 = vpop.f32.mrf.mxu0 }
 0x428   : > { %v8296_v16 = vpop.f32.mrf.mxu0 }
 0x42a   : > { %v5904_v24 = vpop.f32.mrf.mxu0 }
 0x42c   : > { %v5905_v30 = vpop.f32.mrf.mxu0 }
 0x42d   : > { %v5906_v48 = vadd.f32 %v5905_v30, %v5904_v24 }
 0x42e   : > { %v8298_v32 = vpop.f32.mrf.mxu0 }
 0x430   : > { %v8300_v0 = vpop.f32.mrf.mxu0 }
 0x432   : > { %v5910_v33 = vpop.f32.mrf.mxu0 }
 0x434   : > { %v5911_v57 = vpop.f32.mrf.mxu0 }
 0x435   : > { %v5912_v58 = vadd.f32 %v5911_v57, %v5910_v33 }
 0x436   : > { %v5913_v18 = vpop.f32.mrf.mxu0 }
 0x437   : > { %v4479_v61 = vmax.f32 %v5876_v52, %v5912_v58 }
 0x438   : > { %v5914_v27 = vpop.f32.mrf.mxu0 }
 0x439   : > { %v5915_v28 = vadd.f32 %v5914_v27, %v5913_v18 }
 0x43a   : > { %v5916_v53 = vpop.f32.mrf.mxu0 }
 0x43b   : > { %v4480_v62 = vmax.f32 %v5879_v11, %v5915_v28 }
 0x43c   : > { %v5917_v46 = vpop.f32.mrf.mxu0 }
 0x43d   : > { %v5918_v7 = vadd.f32 %v5917_v46, %v5916_v53 }
 0x43e   : > { %v5919_v14 = vpop.f32.mrf.mxu0 }
 0x43f   : > { %v4481_v39 = vmax.f32 %v5882_v31, %v5918_v7  ;;  %v5900_v7 = vadd.f32 %v8292_v4, %v8290_v22 }
 0x440   : > { %v5920_v25 = vpop.f32.mrf.mxu0 }
 0x441   : > { %v5921_v47 = vadd.f32 %v5920_v25, %v5919_v14  ;;  %v4491_v2 = vmax.f32 %v4479_v61, %v4481_v39 }
 0x442   : > { %v5922_v5 = vpop.f32.mrf.mxu0 }
 0x443   : > { %v4482_v3 = vmax.f32 %v5885_v35, %v5921_v47  ;;  %v4497_v56 = vadd.f32 %v4491_v2, %v8175_v38  ;;  %v8495_v47 = vmov 0  }
 0x444   : > { %v5923_v49 = vpop.f32.mrf.mxu0 }
 0x445   : > { %v4492_v51 = vmax.f32 %v4480_v62, %v4482_v3  ;;  %v5924_v15 = vadd.f32 %v5923_v49, %v5922_v5  ;;  %v6277_v62 = vld [vmem:[#allocation3] sm:$0xff]   ;;  %v6282_v49 = vld [vmem:[%s8384_s3 + $0x14] ss:$8 sps:$4 sm:$0xff]  }
 0x446   : > { %v5925_v20 = vpop.f32.mrf.mxu0  ;;  %v6279_v3 = vld [vmem:[%s8384_s3] ss:$8 sps:$4 sm:$0xff]  }
 0x447   : > { %v4498_v36 = vadd.f32 %v4492_v51, %v8177_v42  ;;  %v4483_v50 = vmax.f32 %v5888_v60, %v5924_v15  ;;  %v6284_v51 = vld [vmem:[%s8384_s3 + $0x10] ss:$8 sps:$4 sm:$0xff]  }
 0x448   : > { %v5926_v63 = vpop.f32.mrf.mxu0 }
 0x449   : > { %v5631_v10 = vpack.c.bf16 %v4498_v36, %v4497_v56  ;;  %v5927_v9 = vadd.f32 %v5926_v63, %v5925_v20  ;;  %v6408_v20 = vmov 0.0  }
 0x44a   : > { %v5928_v8 = vpop.f32.mrf.mxu0 }
 0x44b   : > { %5679 = vst [vmem:[#allocation3 + $0x30] sm:$0xff] %v5631_v10   ;;  %v4484_v57 = vmax.f32 %v5891_v55, %v5927_v9 }
 0x44c   : > { %v5929_v54 = vpop.f32.mrf.mxu0 }
 0x44d   : > { %v5930_v41 = vadd.f32 %v5929_v54, %v5928_v8  ;;  %v4577_v8 = vpop.permute.xlu1 %4576 }
 0x44e   : > { %v5931_v6 = vpop.f32.mrf.mxu0 }
 0x44f   : > { %v4485_v26 = vmax.f32 %v5894_v17, %v5930_v41  ;;  %v4572_v17 = vpop.permute.xlu0 %4571 }
 0x450   : > { %v5932_v19 = vpop.f32.mrf.mxu0 }
 0x451   : > { %v5933_v33 = vadd.f32 %v5932_v19, %v5931_v6  ;;  %v4493_v42 = vmax.f32 %v4483_v50, %v4485_v26  ;;  %v4567_v9 = vpop.permute.xlu1 %4566 }
 0x452   : > { %v5934_v38 = vpop.f32.mrf.mxu0  ;;  %v6271_v22 = vld [vmem:[#allocation3 + $0x30] sm:$0xff]  }
 0x453   : > { %v4486_v18 = vmax.f32 %v5897_v13, %v5933_v33  ;;  %v4499_v37 = vadd.f32 %v4493_v42, %v8168_v1  ;;  %v5903_v1 = vadd.f32 %v8296_v16, %v8294_v40  ;;  %v6272_v16 = vld [vmem:[#allocation3 + $0x28] sm:$0xff]   ;;  %v4562_v13 = vpop.permute.xlu0 %4561 }
 0x454   : > { %v5935_v27 = vpop.f32.mrf.mxu0 }
 0x455   : > { %v4494_v53 = vmax.f32 %v4484_v57, %v4486_v18  ;;  %v5936_v59 = vadd.f32 %v5935_v27, %v5934_v38  ;;  %v6285_v38 = vld [vmem:[%s8388_s7] sm:$0xff]  }
 0x456   : > { %v5937_v46 = vpop.f32.mrf.mxu0 }
 0x457   : > { %v4500_v45 = vadd.f32 %v4494_v53, %v8170_v44  ;;  %v5909_v44 = vadd.f32 %v8300_v0, %v8298_v32  ;;  %v4487_v39 = vmax.f32 %v5900_v7, %v5936_v59  ;;  %v6273_v32 = vld [vmem:[#allocation3 + $0x20] sm:$0xff]   ;;  %v6274_v0 = vld [vmem:[#allocation3 + $0x18] sm:$0xff]   ;;  %v4716_v42 = vpop.permute.xlu0 %4715  ;;  %v4721_v53 = vpop.permute.xlu1 %4720 }
 0x458   : > { %v5938_v31 = vpop.f32.mrf.mxu0 }
 0x459   : > { %v5636_v29 = vpack.c.bf16 %v4500_v45, %v4499_v37  ;;  %v5939_v14 = vadd.f32 %v5938_v31, %v5937_v46 }
 0x45a   : > { %v5940_v21 = vpop.f32.mrf.mxu0 }
 0x45b   : > { %5680 = vst [vmem:[#allocation3 + $0x38] sm:$0xff] %v5636_v29   ;;  %v4488_v35 = vmax.f32 %v5903_v1, %v5939_v14 }
 0x45c   : > { %v5941_v58 = vpop.f32.mrf.mxu0 }
 0x45d   : > { %v5942_v12 = vadd.f32 %v5941_v58, %v5940_v21  ;;  %v4775_v58 = vld [vmem:[%s8390_s9] sm:$0x1] }
 0x45e   : > { %v5943_v34 = vpop.f32.mrf.mxu0 }
 0x45f   : > { %v4489_v52 = vmax.f32 %v5906_v48, %v5942_v12  ;;  %v4783_v48 = vlaneseq }
 0x460   : > { %v5944_v28 = vpop.f32.mrf.mxu0 }
 0x461   : > { %v5945_v25 = vadd.f32 %v5944_v28, %v5943_v34  ;;  %v4495_v24 = vmax.f32 %v4487_v39, %v4489_v52  ;;  %v4784_v59 = vshrl.u32 %v4783_v48, 7  ;;  %v4781_v34 = vpop.permute.xlu0 %4780 }
 0x462   : > { %v6270_v11 = vld [vmem:[#allocation3 + $0x38] sm:$0xff]  }
 0x463   : > { %v4490_v30 = vmax.f32 %v5909_v44, %v5945_v25  ;;  %4659 = vmatpush1.bf16.msra.mxu1 %v6270_v11  ;;  %v4501_v4 = vadd.f32 %v4495_v24, %v8185_v43  ;;  %v6275_v43 = vld [vmem:[#allocation3 + $0x10] sm:$0xff]   ;;  %v4785_v12 = vsub.s32 0, %v4784_v59 }
 0x464   : > { %4660 = vmatprep.subr.bf16.mxu1 %v8495_v47 }
 0x465   : > { %v4496_v61 = vmax.f32 %v4488_v35, %v4490_v30  ;;  %v4786_v7 = vrot.slane %v4781_v34, %v4785_v12 }
 0x467   : > { %v4502_v5 = vadd.f32 %v4496_v61, %v8187_v23  ;;  %4661 = vmatpush1.bf16.msra.mxu1 %v6271_v22  ;;  %v6276_v23 = vld [vmem:[#allocation3 + $0x8] sm:$0xff]  }
 0x468   : > { %4662 = vmatprep.subr.bf16.mxu1 %v8495_v47 }
 0x469   : > { %v5641_v40 = vpack.c.bf16 %v4502_v5, %v4501_v4 }
 0x46b   : > { %5681 = vst [vmem:[#allocation3 + $0x40] sm:$0xff] %v5641_v40   ;;  %4663 = vmatpush1.bf16.msra.mxu1 %v6272_v16 }
 0x46c   : > { %4664 = vmatprep.subr.bf16.mxu1 %v8495_v47 }
 0x46f   : > { %4665 = vmatpush1.bf16.msra.mxu1 %v6273_v32 }
 0x470   : > { %4666 = vmatprep.subr.bf16.mxu1 %v8495_v47 }
 0x472   : > { %v6278_v2 = vld [vmem:[#allocation3 + $0x40] sm:$0xff]  }
 0x473   : > { %4667 = vmatpush1.bf16.msra.mxu1 %v6274_v0 }
 0x474   : > { %4668 = vmatprep.subr.bf16.mxu1 %v8495_v47 }
 0x477   : > { %4669 = vmatpush1.bf16.msra.mxu1 %v6275_v43 }
 0x478   : > { %4670 = vmatprep.subr.bf16.mxu1 %v8495_v47 }
 0x47b   : > { %4671 = vmatpush1.bf16.msra.mxu1 %v6276_v23 }
 0x47c   : > { %4672 = vmatprep.subr.bf16.mxu1 %v8495_v47 }
 0x47f   : > { %4673 = vmatpush1.bf16.msra.mxu1 %v6277_v62 }
 0x480   : > { %4688 = vmatprep.subr.bf16.mxu1 %v8495_v47 }
 0x483   : > { %4689 = vmatpush2.bf16.msra.mxu1 %v6278_v2 }
 0x484   : > { %5951 = vmatprep.subr.bf16.mxu1 %v6408_v20 }
 0x486   : > { %4691 = vmatmul.mubr.bf16.vlgmr.msra.gmra.mxu1 %v6279_v3 }
 0x487   : > { %5349 = vmatprep.mubr.msk.bf16.mxu1 %vm4651_vm1, %v6282_v49 }
 0x48e   : > { %4699 = vmatmul.mubr.bf16.gmra.mxu1 %v6284_v51 }
 0x48f   : > { %5955 = vmatprep.mubr.msk.bf16.mxu1 %vm6409_vm2, %v6408_v20 }
 0x546   : > { %v4692_v56 = vpop.f32.mrf.mxu1 }
 0x547   : > { %v4693_v50 = vadd.f32 %v4692_v56, %v4562_v13 }
 0x548   : > { %v4694_v36 = vpop.f32.mrf.mxu1 }
 0x54a   : > { %v4695_v63 = vpop.f32.mrf.mxu1 }
 0x54b   : > { %v4696_v19 = vadd.f32 %v4695_v63, %v4567_v9 }
 0x54c   : > { %v4697_v10 = vpop.f32.mrf.mxu1 }
 0x54d   : > { %v4709_v33 = vpack.c.bf16 %v4696_v19, %v4693_v50 }
 0x54e   : > { %v4700_v54 = vpop.f32.mrf.mxu1 }
 0x54f   : > { %v4701_v6 = vadd.f32 %v4700_v54, %v4572_v17 }
 0x550   : > { %v4702_v15 = vpop.f32.mrf.mxu1 }
 0x552   : > { %v4703_v41 = vpop.f32.mrf.mxu1 }
 0x553   : > { %v4704_v60 = vadd.f32 %v4703_v41, %v4577_v8 }
 0x554   : > { %v4705_v26 = vpop.f32.mrf.mxu1 }
 0x555   : > { %v4710_v55 = vpack.c.bf16 %v4704_v60, %v4701_v6 }
 0x557   : > { %5952 = vmatpush3.bf16.msra.mxu1 %v4710_v55 }
 0x558   : > { %5953 = vmatprep.subr.bf16.mxu1 %v6408_v20 }
 0x55b   : > { %5954 = vmatpush3.bf16.msra.mxu1 %v4709_v33 }
 0x55c   : > { %5959 = vmatprep.subr.bf16.mxu1 %v6408_v20 }
 0x55e   : > { %5956 = vmatmul.mubr.msk.bf16.vlgmr.msra.gmra.mxu1 %vm4728_vm3, %v6285_v38 }
 0x55f   : > { %5961 = vmatprep.mubr.msk.bf16.mxu1 %vm6409_vm2, %v6408_v20 }
 0x61e   : > { %v4766_v57 = vpop.f32.mrf.mxu1 }
 0x61f   : > { %v4767_v27 = vadd.f32 %v4766_v57, %v4716_v42 }
 0x620   : > { %v5957_v18 = vpop.f32.mrf.mxu1 }
 0x621   : > { %v4773_v31 = vmax.f32 %v4767_v27, 0.0 }
 0x622   : > { %v4769_v46 = vpop.f32.mrf.mxu1 }
 0x623   : > { %v4770_v37 = vadd.f32 %v4769_v46, %v4721_v53 }
 0x624   : > { %v5958_v45 = vpop.f32.mrf.mxu1 }
 0x625   : > { %v4774_v29 = vmax.f32 %v4770_v37, 0.0 }
 0x627   : > { %v4776_v21 = vpack.c.bf16 %v4774_v29, %v4773_v31 }
 0x629   : > { %5960 = vmatpush3.bf16.msra.mxu1 %v4776_v21 }
 0x62c   : > { %5962 = vmatmul.mubr.msk.bf16.vlgmr.msra.gmra.mxu1 %vm4651_vm1, %v4775_v58 }
 0x6ec   : > { %v4824_v14 = vpop.f32.mrf.mxu1 }
 0x6ed   : > { %v4825_v52 = vadd.f32 %v4824_v14, %v4786_v7 }
 0x6ee   : > { %v5963_v28 = vpop.f32.mrf.mxu1 }
 0x6ef   : > { %v4830_v1 = vsub.f32 0.0, %v4825_v52 }
 0x6f0   : > { %v4827_v44 = vpop.f32.mrf.mxu1 }
 0x6f1   : > { %v4831_v39 = vmul.f32 1.442695, %v4830_v1 }
 0x6f2   : > { %v5964_v25 = vpop.f32.mrf.mxu1 }
 0x6f3   : > { %6286 = vpow2.f32 %v4831_v39 }
 0x700   : > { %v6287_v11 = vpop.eup %6286 }
 0x701   : > { %v4833_v35 = vadd.f32 1.0, %v6287_v11 }
 0x703   : > { %6288 = vrcp.f32 %v4833_v35 }
 0x710   : > { %v6289_v24 = vpop.eup %6288 }
 0x711   : > { %4835 = vst [vmem:[%s380_s15] sm:$0x1] %v6289_v24 }
 0x712   : > { %6358 = shalt.err (!%p6355_p3)
}
 0x713   : > { %s6359_s17 = scalar_lea.hbm %s8346_s25, 16  ;;  %s6363_s18 = scalar_lea.hbm %s8392_s11, 32 }
 0x714   : > { %p6360_p4 = scmp.ne.s32.totalorder %s8346_s25, %s6359_s17  ;;  %p6364_p9 = scmp.lt.s32.totalorder %s8346_s25, %s8392_s11 }
 0x715   : > { %p6365_p10 = scmp.lt.s32.totalorder %s6363_s18, %s6359_s17 }
 0x716   : > { %p6361_p7 = pnand %p6360_p4, %p6512_p5 }
 0x717   : > { %p6366_p11 = por %p6365_p10, %p6364_p9 }
 0x718   : > { %p6362_p8 = pneg %p6361_p7 }
 0x71a   : > { %p6367_p12 = pnand %p6366_p11, %p6362_p8 }
 0x71c   : > { %6370 = shalt.err (!%p6367_p12)
}
 0x71d   : > { %5982 = dma.vmem_to_hbm [thread:$0]  (%p6512_p5), %s4850_s16, 16, %s8346_s25, %s4837_s26  }
 0x71e PF: > { %p5988_p13 = scmp.ge.s32.totalorder %s6405_s22, 2  ;;  %s4861_s30 = sand.u32 1, %s6393_s19  }
 0x71f   : > { %s4862_s13 = scalar_lea.sflag [#allocation6], %s4861_s30 }
 0x720   : > { %p5985_p0 = pnand %p5988_p13, %p6516_p6 }
 0x722   : > { %p5986_p1 = pneg %p5985_p0 }
 0x724   : > { %6388 = dma.done.wait (%p5986_p1), %s4862_s13, 16  }
 0x725   : > { %6390 = vsyncadd (%p5986_p1), %s4862_s13, 4294967280  ;;  %p23_p2 = scmp.ge.s32.totalorder %s6499_s24, 4   ;;  %s8496_s19 = smov %s6397_s20 }
 0x726   : > { %s8497_s20 = smov %s6401_s21  ;;  %s8498_s21 = smov %s6510_s27 }
 0x727   : > { %s8499_s22 = smov %s6499_s24  ;;  %25 = sbr.rel (!%p23_p2) target bundleno = 6 (0x6), region = 99 }
 0x72c   :  { %4866 = vsyncpa [#allocation6], 1 }
 0x72d   :  { %4868 = vsyncpa [#allocation6 + $0x1], 1 }

</bundles_post_ra>
